<compile_context>
chip_gen: v5e
topology: v5e:2x2
jax: 0.10.0
libtpu: 0.0.40
codegen_flags: <defaults>
</compile_context>

<pallas_src>
import jax
import jax.numpy as jnp
from jax import lax
from jax.experimental import pallas as pl
from jax.experimental.pallas import tpu as pltpu


# ---------------------------------------------------------------------------
# Host-side weight transforms (pure JAX, outside the kernel, run once per call)
# ---------------------------------------------------------------------------
def _build_m1(w1):
    """conv1 (6,1,5,5) -> (5, 32, 168) per-kernel-row dense matrices.

    M1[i, w, ow*6+co] = w1[co, 0, i, w-ow] for 0 <= w-ow <= 4, else 0.
    Rows = input W position (32), cols = (conv1 out ow, out channel) = 28*6.
    """
    w = jnp.arange(32)[:, None]
    ow = jnp.arange(28)[None, :]
    j = w - ow                                              # (32, 28)
    valid = ((j >= 0) & (j <= 4)).astype(jnp.float32)
    jc = jnp.clip(j, 0, 4)
    w1k = jnp.transpose(w1[:, 0, :, :], (1, 2, 0))          # (5,5,6) [i,j,co]
    m = w1k[:, jc, :] * valid[None, :, :, None]             # (5,32,28,6)
    return m.reshape(5, 32, 28 * 6).astype(jnp.bfloat16)


def _build_m2(w2):
    """conv2 (16,6,5,5) -> (5, 168, 160); pool-1 W pairing and 1/4 folded in.

    M2[i, w1*6+ci, ow2*16+co] = 0.25 * w2[co, ci, i, w1//2 - ow2]
                                for 0 <= w1//2 - ow2 <= 4, else 0.
    """
    w1 = jnp.arange(28)[:, None]
    ow2 = jnp.arange(10)[None, :]
    j = w1 // 2 - ow2                                       # (28, 10)
    valid = ((j >= 0) & (j <= 4)).astype(jnp.float32)
    jc = jnp.clip(j, 0, 4)
    w2k = jnp.transpose(w2, (2, 3, 1, 0))                   # (5,5,6,16) [i,j,ci,co]
    m = w2k[:, jc, :, :] * valid[None, :, :, None, None] * 0.25  # (5,28,10,6,16)
    m = jnp.transpose(m, (0, 1, 3, 2, 4))                   # (5,28,6,10,16)
    return m.reshape(5, 28 * 6, 10 * 16).astype(jnp.bfloat16)


def _build_m3(w3):
    """pool-2 + conv3 fused: (120,16,5,5) -> (1600, 120) dense matrix.

    M3[h2*160 + w2*16 + c2, co] = 0.25 * w3[co, c2, h2//2, w2//2].
    """
    h2 = jnp.arange(10)
    w2 = jnp.arange(10)
    w3k = jnp.transpose(w3, (2, 3, 1, 0))                   # (5,5,16,120) [i,j,c2,co]
    m = 0.25 * w3k[h2[:, None] // 2, w2[None, :] // 2, :, :]  # (10,10,16,120)
    return m.reshape(1600, 120).astype(jnp.bfloat16)


# ---------------------------------------------------------------------------
# Fused kernel: conv1 -> pool -> conv2 -> pool -> conv3 -> fc1 -> fc2
# ---------------------------------------------------------------------------
def _lenet_kernel(x_ref, m1_ref, b1_ref, m2_ref, b2_ref, m3_ref, b3_ref,
                  l1_ref, l1b_ref, l2_ref, l2b_ref,
                  out_ref, s1_ref, a2_ref):
    TB = x_ref.shape[0]
    f32 = jnp.float32

    # --- conv1 + ReLU + H-pairing half of avg-pool-1 ------------------------
    # Input rows are parity-grouped: row r<16 holds image row 2r, row r>=16
    # holds image row 2(r-16)+1.  One (TB*32, 32) @ (32, 168) MXU matmul per
    # conv kernel row i; results combined with unit-stride H slices only.
    x2d = x_ref[...].reshape(TB * 32, 32)
    acc = [None, None]                       # conv1 pre-act, even/odd out rows
    for i in range(5):
        z = jnp.dot(x2d, m1_ref[i], preferred_element_type=f32)
        z = z.reshape(TB, 32, 168)
        for s in (0, 1):                     # output-row parity
            p, d = (s + i) % 2, (s + i) // 2
            base = p * 16 + d                # parity block + half-row shift
            piece = z[:, base:base + 14, :]
            acc[s] = piece if acc[s] is None else acc[s] + piece
    b1 = b1_ref[...]
    s1 = jnp.maximum(acc[0] + b1, 0.0) + jnp.maximum(acc[1] + b1, 0.0)
    s1_ref[:, 0:14, :] = s1.astype(jnp.bfloat16)
    s1_ref[:, 14:16, :] = jnp.zeros((TB, 2, 168), jnp.bfloat16)  # pad rows

    # --- conv2 + ReLU (pool-1 W pairing and 1/4 scale live inside m2) -------
    a1p = s1_ref[...].reshape(TB * 16, 168)
    acc2 = None
    for i in range(5):
        z = jnp.dot(a1p, m2_ref[i], preferred_element_type=f32)
        z = z.reshape(TB, 16, 160)[:, i:i + 10, :]
        acc2 = z if acc2 is None else acc2 + z
    a2 = jnp.maximum(acc2 + b2_ref[...], 0.0)                # (TB, 10, 160)
    a2_ref[...] = a2.astype(jnp.bfloat16)

    # --- avg-pool-2 + conv3 + ReLU fused into one (TB,1600)@(1600,120) dot ---
    feat = jnp.concatenate([a2_ref[:, h, :] for h in range(10)], axis=-1)
    a3 = jnp.dot(feat, m3_ref[...], preferred_element_type=f32) + b3_ref[...]
    a3 = jnp.maximum(a3, 0.0)

    # --- linear1 + ReLU + linear2 --------------------------------------------
    h4 = jnp.dot(a3.astype(jnp.bfloat16), l1_ref[...],
                 preferred_element_type=f32) + l1b_ref[...]
    h4 = jnp.maximum(h4, 0.0)
    out_ref[...] = jnp.dot(h4.astype(jnp.bfloat16), l2_ref[...],
                           preferred_element_type=f32) + l2b_ref[...]


# ---------------------------------------------------------------------------
# Wrapper: one fused pallas_call, grid over batch tiles
# ---------------------------------------------------------------------------
def lenet_forward(x, params, *, batch_tile=64):
    """x: (B, 1, 32, 32) NCHW f32 -> (B, 10) f32 logits."""
    B, Cin, H, W = x.shape
    assert (Cin, H, W) == (1, 32, 32), (Cin, H, W)

    TB = B if B < batch_tile else batch_tile
    if TB < B:
        assert TB % 8 == 0, "batch_tile must be a multiple of 8"
    Bp = pl.cdiv(B, TB) * TB

    # Parity-reorder the 32 input rows (all even rows, then all odd rows): this
    # turns every downstream stride-2 H access (pool pairing) into a plain
    # unit-stride slice inside the kernel.  Done once in XLA, free.
    x2 = x[:, 0, :, :]
    x_perm = jnp.concatenate([x2[:, 0::2, :], x2[:, 1::2, :]], axis=1)
    x_perm = x_perm.astype(jnp.bfloat16)
    if Bp != B:
        x_perm = jnp.pad(x_perm, ((0, Bp - B), (0, 0), (0, 0)))

    m1 = _build_m1(params["conv1_w"])
    m2 = _build_m2(params["conv2_w"])
    m3 = _build_m3(params["conv3_w"])
    b1e = jnp.tile(params["conv1_b"], 28).reshape(1, 168).astype(jnp.float32)
    b2e = jnp.tile(params["conv2_b"], 10).reshape(1, 160).astype(jnp.float32)
    b3e = params["conv3_b"].reshape(1, 120).astype(jnp.float32)
    l1w = params["lin1_w"].T.astype(jnp.bfloat16)
    l2w = params["lin2_w"].T.astype(jnp.bfloat16)
    l1b = params["lin1_b"].reshape(1, 84).astype(jnp.float32)
    l2b = params["lin2_b"].reshape(1, 10).astype(jnp.float32)

    def resident(a):   # small weight, fully resident in VMEM every grid step
        return pl.BlockSpec(a.shape, lambda i, _n=a.ndim: (0,) * _n)

    out = pl.pallas_call(
        _lenet_kernel,
        out_shape=jax.ShapeDtypeStruct((Bp, 10), jnp.float32),
        grid_spec=pltpu.PrefetchScalarGridSpec(
            num_scalar_prefetch=0,
            grid=(Bp // TB,),
            in_specs=[
                pl.BlockSpec((TB, 32, 32), lambda i: (i, 0, 0)),
                resident(m1), resident(b1e),
                resident(m2), resident(b2e),
                resident(m3), resident(b3e),
                resident(l1w), resident(l1b),
                resident(l2w), resident(l2b),
            ],
            out_specs=pl.BlockSpec((TB, 10), lambda i: (i, 0)),
            scratch_shapes=[
                pltpu.VMEM((TB, 16, 168), jnp.bfloat16),   # H-paired conv1 act
                pltpu.VMEM((TB, 10, 160), jnp.bfloat16),   # conv2 act
            ],
        ),
        compiler_params=pltpu.CompilerParams(
            dimension_semantics=("parallel",),
            vmem_limit_bytes=32 * 1024 * 1024,
        ),
    )(x_perm, m1, b1e, m2, b2e, m3, b3e, l1w, l1b, l2w, l2b)

    return out[:B]


# ---------------------------------------------------------------------------
# Params + pure-JAX f32 reference (loose numerical self-check)
# ---------------------------------------------------------------------------
def init_params(key):
    ks = jax.random.split(key, 10)
    scale = 0.1
    return {
        "conv1_w": jax.random.normal(ks[0], (6, 1, 5, 5), jnp.float32) * scale,
        "conv1_b": jax.random.normal(ks[1], (6,), jnp.float32) * scale,
        "conv2_w": jax.random.normal(ks[2], (16, 6, 5, 5), jnp.float32) * scale,
        "conv2_b": jax.random.normal(ks[3], (16,), jnp.float32) * scale,
        "conv3_w": jax.random.normal(ks[4], (120, 16, 5, 5), jnp.float32) * scale,
        "conv3_b": jax.random.normal(ks[5], (120,), jnp.float32) * scale,
        "lin1_w": jax.random.normal(ks[6], (84, 120), jnp.float32) * scale,  # torch (out,in)
        "lin1_b": jax.random.normal(ks[7], (84,), jnp.float32) * scale,
        "lin2_w": jax.random.normal(ks[8], (10, 84), jnp.float32) * scale,
        "lin2_b": jax.random.normal(ks[9], (10,), jnp.float32) * scale,
    }


def lenet_reference(x, p):
    def conv(h, w, b):
        y = lax.conv_general_dilated(
            h, w, (1, 1), "VALID",
            dimension_numbers=("NCHW", "OIHW", "NCHW"),
            precision=lax.Precision.HIGHEST)
        return jax.nn.relu(y + b.reshape(1, -1, 1, 1))

    def pool(h):
        s = lax.reduce_window(h, 0.0, lax.add, (1, 1, 2, 2), (1, 1, 2, 2), "VALID")
        return s * 0.25

    h = pool(conv(x, p["conv1_w"], p["conv1_b"]))
    h = pool(conv(h, p["conv2_w"], p["conv2_b"]))
    h = conv(h, p["conv3_w"], p["conv3_b"])
    h = h.reshape(h.shape[0], -1)
    h = jax.nn.relu(h @ p["lin1_w"].T + p["lin1_b"])
    return h @ p["lin2_w"].T + p["lin2_b"]


if __name__ == "__main__":
    key = jax.random.PRNGKey(0)
    k_x, k_p = jax.random.split(key)
    x = jax.random.normal(k_x, (2, 1, 32, 32), jnp.float32)  # classic LeNet input
    params = init_params(k_p)

    fwd = jax.jit(lenet_forward)
    out = jax.block_until_ready(fwd(x, params))
    assert out.shape == (2, 10), out.shape

    # Loose tolerance: matmul inputs are bf16 (f32 accumulation) by design.
    ref = lenet_reference(x, params)
    err = float(jnp.max(jnp.abs(out - ref)))
    assert err < 5e-2, f"max abs err vs f32 reference = {err}"

    print("KERNEL_OK")
</pallas_src>

<mosaic_0001>
module attributes {stable_mosaic.version = 11 : i64} {
  func.func @_lenet_kernel(%arg0: i32, %arg1: memref<2x32x32xbf16, #tpu.memory_space<vmem>>, %arg2: memref<5x32x168xbf16, #tpu.memory_space<vmem>>, %arg3: memref<1x168xf32, #tpu.memory_space<vmem>>, %arg4: memref<5x168x160xbf16, #tpu.memory_space<vmem>>, %arg5: memref<1x160xf32, #tpu.memory_space<vmem>>, %arg6: memref<1600x120xbf16, #tpu.memory_space<vmem>>, %arg7: memref<1x120xf32, #tpu.memory_space<vmem>>, %arg8: memref<120x84xbf16, #tpu.memory_space<vmem>>, %arg9: memref<1x84xf32, #tpu.memory_space<vmem>>, %arg10: memref<84x10xbf16, #tpu.memory_space<vmem>>, %arg11: memref<1x10xf32, #tpu.memory_space<vmem>>, %arg12: memref<2x10xf32, #tpu.memory_space<vmem>>, %arg13: memref<2x16x168xbf16, #tpu.memory_space<vmem>>, %arg14: memref<2x10x160xbf16, #tpu.memory_space<vmem>>) attributes {dimension_semantics = [#tpu.dimension_semantics<parallel>], iteration_bounds = array<i64: 1>, scalar_prefetch = 0 : i64, scratch_operands = 2 : i64, tpu.core_type = #tpu.core_type<tc>, window_params = [{transform_indices = @transform_0, window_bounds = array<i64: 2, 32, 32>}, {pipeline_mode = #tpu.pipeline_mode<synchronous>, transform_indices = @transform_1, window_bounds = array<i64: 5, 32, 168>}, {pipeline_mode = #tpu.pipeline_mode<synchronous>, transform_indices = @transform_2, window_bounds = array<i64: 1, 168>}, {pipeline_mode = #tpu.pipeline_mode<synchronous>, transform_indices = @transform_3, window_bounds = array<i64: 5, 168, 160>}, {pipeline_mode = #tpu.pipeline_mode<synchronous>, transform_indices = @transform_4, window_bounds = array<i64: 1, 160>}, {pipeline_mode = #tpu.pipeline_mode<synchronous>, transform_indices = @transform_5, window_bounds = array<i64: 1600, 120>}, {pipeline_mode = #tpu.pipeline_mode<synchronous>, transform_indices = @transform_6, window_bounds = array<i64: 1, 120>}, {pipeline_mode = #tpu.pipeline_mode<synchronous>, transform_indices = @transform_7, window_bounds = array<i64: 120, 84>}, {pipeline_mode = #tpu.pipeline_mode<synchronous>, transform_indices = @transform_8, window_bounds = array<i64: 1, 84>}, {pipeline_mode = #tpu.pipeline_mode<synchronous>, transform_indices = @transform_9, window_bounds = array<i64: 84, 10>}, {pipeline_mode = #tpu.pipeline_mode<synchronous>, transform_indices = @transform_10, window_bounds = array<i64: 1, 10>}, {transform_indices = @transform_11, window_bounds = array<i64: 2, 10>}]} {
    %c0 = arith.constant 0 : index
    %c0_0 = arith.constant 0 : index
    %c0_1 = arith.constant 0 : index
    %0 = vector.load %arg1[%c0, %c0_0, %c0_1] : memref<2x32x32xbf16, #tpu.memory_space<vmem>>, vector<2x32x32xbf16>
    %1 = vector.shape_cast %0 : vector<2x32x32xbf16> to vector<64x32xbf16>
    %c0_2 = arith.constant 0 : index
    %c0_3 = arith.constant 0 : index
    %c0_4 = arith.constant 0 : index
    %2 = vector.load %arg2[%c0_2, %c0_3, %c0_4] : memref<5x32x168xbf16, #tpu.memory_space<vmem>>, vector<1x32x168xbf16>
    %3 = vector.shape_cast %2 : vector<1x32x168xbf16> to vector<32x168xbf16>
    %cst = arith.constant dense<0.000000e+00> : vector<64x168xf32>
    %4 = tpu.matmul %1, %3, %cst {dimension_numbers = #tpu.dot_dimension_numbers<[1], [0], [0], [1], [0, 0, 1, 1], [], []>} : vector<64x32xbf16>, vector<32x168xbf16>, vector<64x168xf32> -> vector<64x168xf32>
    %5 = vector.shape_cast %4 : vector<64x168xf32> to vector<2x32x168xf32>
    %6 = vector.extract_strided_slice %5 {offsets = [0, 0, 0], sizes = [2, 14, 168], strides = [1, 1, 1]} : vector<2x32x168xf32> to vector<2x14x168xf32>
    %7 = vector.extract_strided_slice %5 {offsets = [0, 16, 0], sizes = [2, 14, 168], strides = [1, 1, 1]} : vector<2x32x168xf32> to vector<2x14x168xf32>
    %c1 = arith.constant 1 : index
    %c0_5 = arith.constant 0 : index
    %c0_6 = arith.constant 0 : index
    %8 = vector.load %arg2[%c1, %c0_5, %c0_6] : memref<5x32x168xbf16, #tpu.memory_space<vmem>>, vector<1x32x168xbf16>
    %9 = vector.shape_cast %8 : vector<1x32x168xbf16> to vector<32x168xbf16>
    %cst_7 = arith.constant dense<0.000000e+00> : vector<64x168xf32>
    %10 = tpu.matmul %1, %9, %cst_7 {dimension_numbers = #tpu.dot_dimension_numbers<[1], [0], [0], [1], [0, 0, 1, 1], [], []>} : vector<64x32xbf16>, vector<32x168xbf16>, vector<64x168xf32> -> vector<64x168xf32>
    %11 = vector.shape_cast %10 : vector<64x168xf32> to vector<2x32x168xf32>
    %12 = vector.extract_strided_slice %11 {offsets = [0, 16, 0], sizes = [2, 14, 168], strides = [1, 1, 1]} : vector<2x32x168xf32> to vector<2x14x168xf32>
    %13 = arith.addf %6, %12 : vector<2x14x168xf32>
    %14 = vector.extract_strided_slice %11 {offsets = [0, 1, 0], sizes = [2, 14, 168], strides = [1, 1, 1]} : vector<2x32x168xf32> to vector<2x14x168xf32>
    %15 = arith.addf %7, %14 : vector<2x14x168xf32>
    %c2 = arith.constant 2 : index
    %c0_8 = arith.constant 0 : index
    %c0_9 = arith.constant 0 : index
    %16 = vector.load %arg2[%c2, %c0_8, %c0_9] : memref<5x32x168xbf16, #tpu.memory_space<vmem>>, vector<1x32x168xbf16>
    %17 = vector.shape_cast %16 : vector<1x32x168xbf16> to vector<32x168xbf16>
    %cst_10 = arith.constant dense<0.000000e+00> : vector<64x168xf32>
    %18 = tpu.matmul %1, %17, %cst_10 {dimension_numbers = #tpu.dot_dimension_numbers<[1], [0], [0], [1], [0, 0, 1, 1], [], []>} : vector<64x32xbf16>, vector<32x168xbf16>, vector<64x168xf32> -> vector<64x168xf32>
    %19 = vector.shape_cast %18 : vector<64x168xf32> to vector<2x32x168xf32>
    %20 = vector.extract_strided_slice %19 {offsets = [0, 1, 0], sizes = [2, 14, 168], strides = [1, 1, 1]} : vector<2x32x168xf32> to vector<2x14x168xf32>
    %21 = arith.addf %13, %20 : vector<2x14x168xf32>
    %22 = vector.extract_strided_slice %19 {offsets = [0, 17, 0], sizes = [2, 14, 168], strides = [1, 1, 1]} : vector<2x32x168xf32> to vector<2x14x168xf32>
    %23 = arith.addf %15, %22 : vector<2x14x168xf32>
    %c3 = arith.constant 3 : index
    %c0_11 = arith.constant 0 : index
    %c0_12 = arith.constant 0 : index
    %24 = vector.load %arg2[%c3, %c0_11, %c0_12] : memref<5x32x168xbf16, #tpu.memory_space<vmem>>, vector<1x32x168xbf16>
    %25 = vector.shape_cast %24 : vector<1x32x168xbf16> to vector<32x168xbf16>
    %cst_13 = arith.constant dense<0.000000e+00> : vector<64x168xf32>
    %26 = tpu.matmul %1, %25, %cst_13 {dimension_numbers = #tpu.dot_dimension_numbers<[1], [0], [0], [1], [0, 0, 1, 1], [], []>} : vector<64x32xbf16>, vector<32x168xbf16>, vector<64x168xf32> -> vector<64x168xf32>
    %27 = vector.shape_cast %26 : vector<64x168xf32> to vector<2x32x168xf32>
    %28 = vector.extract_strided_slice %27 {offsets = [0, 17, 0], sizes = [2, 14, 168], strides = [1, 1, 1]} : vector<2x32x168xf32> to vector<2x14x168xf32>
    %29 = arith.addf %21, %28 : vector<2x14x168xf32>
    %30 = vector.extract_strided_slice %27 {offsets = [0, 2, 0], sizes = [2, 14, 168], strides = [1, 1, 1]} : vector<2x32x168xf32> to vector<2x14x168xf32>
    %31 = arith.addf %23, %30 : vector<2x14x168xf32>
    %c4 = arith.constant 4 : index
    %c0_14 = arith.constant 0 : index
    %c0_15 = arith.constant 0 : index
    %32 = vector.load %arg2[%c4, %c0_14, %c0_15] : memref<5x32x168xbf16, #tpu.memory_space<vmem>>, vector<1x32x168xbf16>
    %33 = vector.shape_cast %32 : vector<1x32x168xbf16> to vector<32x168xbf16>
    %cst_16 = arith.constant dense<0.000000e+00> : vector<64x168xf32>
    %34 = tpu.matmul %1, %33, %cst_16 {dimension_numbers = #tpu.dot_dimension_numbers<[1], [0], [0], [1], [0, 0, 1, 1], [], []>} : vector<64x32xbf16>, vector<32x168xbf16>, vector<64x168xf32> -> vector<64x168xf32>
    %35 = vector.shape_cast %34 : vector<64x168xf32> to vector<2x32x168xf32>
    %36 = vector.extract_strided_slice %35 {offsets = [0, 2, 0], sizes = [2, 14, 168], strides = [1, 1, 1]} : vector<2x32x168xf32> to vector<2x14x168xf32>
    %37 = arith.addf %29, %36 : vector<2x14x168xf32>
    %38 = vector.extract_strided_slice %35 {offsets = [0, 18, 0], sizes = [2, 14, 168], strides = [1, 1, 1]} : vector<2x32x168xf32> to vector<2x14x168xf32>
    %39 = arith.addf %31, %38 : vector<2x14x168xf32>
    %c0_17 = arith.constant 0 : index
    %c0_18 = arith.constant 0 : index
    %40 = vector.load %arg3[%c0_17, %c0_18] : memref<1x168xf32, #tpu.memory_space<vmem>>, vector<1x168xf32>
    %41 = vector.shape_cast %40 : vector<1x168xf32> to vector<1x1x168xf32>
    %42 = vector.broadcast %41 : vector<1x1x168xf32> to vector<2x14x168xf32>
    %43 = arith.addf %37, %42 : vector<2x14x168xf32>
    %cst_19 = arith.constant 0.000000e+00 : f32
    %44 = vector.broadcast %cst_19 : f32 to vector<2x14x168xf32>
    %45 = arith.maximumf %43, %44 : vector<2x14x168xf32>
    %46 = vector.shape_cast %40 : vector<1x168xf32> to vector<1x1x168xf32>
    %47 = vector.broadcast %46 : vector<1x1x168xf32> to vector<2x14x168xf32>
    %48 = arith.addf %39, %47 : vector<2x14x168xf32>
    %cst_20 = arith.constant 0.000000e+00 : f32
    %49 = vector.broadcast %cst_20 : f32 to vector<2x14x168xf32>
    %50 = arith.maximumf %48, %49 : vector<2x14x168xf32>
    %51 = arith.addf %45, %50 : vector<2x14x168xf32>
    %52 = arith.truncf %51 : vector<2x14x168xf32> to vector<2x14x168xbf16>
    %c0_21 = arith.constant 0 : index
    %c0_22 = arith.constant 0 : index
    %c0_23 = arith.constant 0 : index
    %53 = vector.load %arg13[%c0_21, %c0_22, %c0_23] : memref<2x16x168xbf16, #tpu.memory_space<vmem>>, vector<2x14x168xbf16>
    tpu.vector_store %arg13[%c0_21, %c0_22, %c0_23], %52 {strides = array<i32>} : memref<2x16x168xbf16, #tpu.memory_space<vmem>>, vector<2x14x168xbf16>,
    %cst_24 = arith.constant 0.000000e+00 : bf16
    %54 = vector.broadcast %cst_24 : bf16 to vector<2x2x168xbf16>
    %c0_25 = arith.constant 0 : index
    %c14 = arith.constant 14 : index
    %c0_26 = arith.constant 0 : index
    %55 = vector.load %arg13[%c0_25, %c14, %c0_26] : memref<2x16x168xbf16, #tpu.memory_space<vmem>>, vector<2x2x168xbf16>
    tpu.vector_store %arg13[%c0_25, %c14, %c0_26], %54 {strides = array<i32>} : memref<2x16x168xbf16, #tpu.memory_space<vmem>>, vector<2x2x168xbf16>,
    %c0_27 = arith.constant 0 : index
    %c0_28 = arith.constant 0 : index
    %c0_29 = arith.constant 0 : index
    %56 = vector.load %arg13[%c0_27, %c0_28, %c0_29] : memref<2x16x168xbf16, #tpu.memory_space<vmem>>, vector<2x16x168xbf16>
    %57 = vector.shape_cast %56 : vector<2x16x168xbf16> to vector<32x168xbf16>
    %c0_30 = arith.constant 0 : index
    %c0_31 = arith.constant 0 : index
    %c0_32 = arith.constant 0 : index
    %58 = vector.load %arg4[%c0_30, %c0_31, %c0_32] : memref<5x168x160xbf16, #tpu.memory_space<vmem>>, vector<1x168x160xbf16>
    %59 = vector.shape_cast %58 : vector<1x168x160xbf16> to vector<168x160xbf16>
    %cst_33 = arith.constant dense<0.000000e+00> : vector<32x160xf32>
    %60 = tpu.matmul %57, %59, %cst_33 {dimension_numbers = #tpu.dot_dimension_numbers<[1], [0], [0], [1], [0, 0, 1, 1], [], []>} : vector<32x168xbf16>, vector<168x160xbf16>, vector<32x160xf32> -> vector<32x160xf32>
    %61 = vector.shape_cast %60 : vector<32x160xf32> to vector<2x16x160xf32>
    %62 = vector.extract_strided_slice %61 {offsets = [0, 0, 0], sizes = [2, 10, 160], strides = [1, 1, 1]} : vector<2x16x160xf32> to vector<2x10x160xf32>
    %c1_34 = arith.constant 1 : index
    %c0_35 = arith.constant 0 : index
    %c0_36 = arith.constant 0 : index
    %63 = vector.load %arg4[%c1_34, %c0_35, %c0_36] : memref<5x168x160xbf16, #tpu.memory_space<vmem>>, vector<1x168x160xbf16>
    %64 = vector.shape_cast %63 : vector<1x168x160xbf16> to vector<168x160xbf16>
    %cst_37 = arith.constant dense<0.000000e+00> : vector<32x160xf32>
    %65 = tpu.matmul %57, %64, %cst_37 {dimension_numbers = #tpu.dot_dimension_numbers<[1], [0], [0], [1], [0, 0, 1, 1], [], []>} : vector<32x168xbf16>, vector<168x160xbf16>, vector<32x160xf32> -> vector<32x160xf32>
    %66 = vector.shape_cast %65 : vector<32x160xf32> to vector<2x16x160xf32>
    %67 = vector.extract_strided_slice %66 {offsets = [0, 1, 0], sizes = [2, 10, 160], strides = [1, 1, 1]} : vector<2x16x160xf32> to vector<2x10x160xf32>
    %68 = arith.addf %62, %67 : vector<2x10x160xf32>
    %c2_38 = arith.constant 2 : index
    %c0_39 = arith.constant 0 : index
    %c0_40 = arith.constant 0 : index
    %69 = vector.load %arg4[%c2_38, %c0_39, %c0_40] : memref<5x168x160xbf16, #tpu.memory_space<vmem>>, vector<1x168x160xbf16>
    %70 = vector.shape_cast %69 : vector<1x168x160xbf16> to vector<168x160xbf16>
    %cst_41 = arith.constant dense<0.000000e+00> : vector<32x160xf32>
    %71 = tpu.matmul %57, %70, %cst_41 {dimension_numbers = #tpu.dot_dimension_numbers<[1], [0], [0], [1], [0, 0, 1, 1], [], []>} : vector<32x168xbf16>, vector<168x160xbf16>, vector<32x160xf32> -> vector<32x160xf32>
    %72 = vector.shape_cast %71 : vector<32x160xf32> to vector<2x16x160xf32>
    %73 = vector.extract_strided_slice %72 {offsets = [0, 2, 0], sizes = [2, 10, 160], strides = [1, 1, 1]} : vector<2x16x160xf32> to vector<2x10x160xf32>
    %74 = arith.addf %68, %73 : vector<2x10x160xf32>
    %c3_42 = arith.constant 3 : index
    %c0_43 = arith.constant 0 : index
    %c0_44 = arith.constant 0 : index
    %75 = vector.load %arg4[%c3_42, %c0_43, %c0_44] : memref<5x168x160xbf16, #tpu.memory_space<vmem>>, vector<1x168x160xbf16>
    %76 = vector.shape_cast %75 : vector<1x168x160xbf16> to vector<168x160xbf16>
    %cst_45 = arith.constant dense<0.000000e+00> : vector<32x160xf32>
    %77 = tpu.matmul %57, %76, %cst_45 {dimension_numbers = #tpu.dot_dimension_numbers<[1], [0], [0], [1], [0, 0, 1, 1], [], []>} : vector<32x168xbf16>, vector<168x160xbf16>, vector<32x160xf32> -> vector<32x160xf32>
    %78 = vector.shape_cast %77 : vector<32x160xf32> to vector<2x16x160xf32>
    %79 = vector.extract_strided_slice %78 {offsets = [0, 3, 0], sizes = [2, 10, 160], strides = [1, 1, 1]} : vector<2x16x160xf32> to vector<2x10x160xf32>
    %80 = arith.addf %74, %79 : vector<2x10x160xf32>
    %c4_46 = arith.constant 4 : index
    %c0_47 = arith.constant 0 : index
    %c0_48 = arith.constant 0 : index
    %81 = vector.load %arg4[%c4_46, %c0_47, %c0_48] : memref<5x168x160xbf16, #tpu.memory_space<vmem>>, vector<1x168x160xbf16>
    %82 = vector.shape_cast %81 : vector<1x168x160xbf16> to vector<168x160xbf16>
    %cst_49 = arith.constant dense<0.000000e+00> : vector<32x160xf32>
    %83 = tpu.matmul %57, %82, %cst_49 {dimension_numbers = #tpu.dot_dimension_numbers<[1], [0], [0], [1], [0, 0, 1, 1], [], []>} : vector<32x168xbf16>, vector<168x160xbf16>, vector<32x160xf32> -> vector<32x160xf32>
    %84 = vector.shape_cast %83 : vector<32x160xf32> to vector<2x16x160xf32>
    %85 = vector.extract_strided_slice %84 {offsets = [0, 4, 0], sizes = [2, 10, 160], strides = [1, 1, 1]} : vector<2x16x160xf32> to vector<2x10x160xf32>
    %86 = arith.addf %80, %85 : vector<2x10x160xf32>
    %c0_50 = arith.constant 0 : index
    %c0_51 = arith.constant 0 : index
    %87 = vector.load %arg5[%c0_50, %c0_51] : memref<1x160xf32, #tpu.memory_space<vmem>>, vector<1x160xf32>
    %88 = vector.shape_cast %87 : vector<1x160xf32> to vector<1x1x160xf32>
    %89 = vector.broadcast %88 : vector<1x1x160xf32> to vector<2x10x160xf32>
    %90 = arith.addf %86, %89 : vector<2x10x160xf32>
    %cst_52 = arith.constant 0.000000e+00 : f32
    %91 = vector.broadcast %cst_52 : f32 to vector<2x10x160xf32>
    %92 = arith.maximumf %90, %91 : vector<2x10x160xf32>
    %93 = arith.truncf %92 : vector<2x10x160xf32> to vector<2x10x160xbf16>
    %c0_53 = arith.constant 0 : index
    %c0_54 = arith.constant 0 : index
    %c0_55 = arith.constant 0 : index
    %94 = vector.load %arg14[%c0_53, %c0_54, %c0_55] : memref<2x10x160xbf16, #tpu.memory_space<vmem>>, vector<2x10x160xbf16>
    tpu.vector_store %arg14[%c0_53, %c0_54, %c0_55], %93 {strides = array<i32>} : memref<2x10x160xbf16, #tpu.memory_space<vmem>>, vector<2x10x160xbf16>,
    %c0_56 = arith.constant 0 : index
    %c0_57 = arith.constant 0 : index
    %c0_58 = arith.constant 0 : index
    %95 = vector.load %arg14[%c0_56, %c0_57, %c0_58] : memref<2x10x160xbf16, #tpu.memory_space<vmem>>, vector<2x1x160xbf16>
    %96 = vector.shape_cast %95 : vector<2x1x160xbf16> to vector<2x160xbf16>
    %c0_59 = arith.constant 0 : index
    %c1_60 = arith.constant 1 : index
    %c0_61 = arith.constant 0 : index
    %97 = vector.load %arg14[%c0_59, %c1_60, %c0_61] : memref<2x10x160xbf16, #tpu.memory_space<vmem>>, vector<2x1x160xbf16>
    %98 = vector.shape_cast %97 : vector<2x1x160xbf16> to vector<2x160xbf16>
    %c0_62 = arith.constant 0 : index
    %c2_63 = arith.constant 2 : index
    %c0_64 = arith.constant 0 : index
    %99 = vector.load %arg14[%c0_62, %c2_63, %c0_64] : memref<2x10x160xbf16, #tpu.memory_space<vmem>>, vector<2x1x160xbf16>
    %100 = vector.shape_cast %99 : vector<2x1x160xbf16> to vector<2x160xbf16>
    %c0_65 = arith.constant 0 : index
    %c3_66 = arith.constant 3 : index
    %c0_67 = arith.constant 0 : index
    %101 = vector.load %arg14[%c0_65, %c3_66, %c0_67] : memref<2x10x160xbf16, #tpu.memory_space<vmem>>, vector<2x1x160xbf16>
    %102 = vector.shape_cast %101 : vector<2x1x160xbf16> to vector<2x160xbf16>
    %c0_68 = arith.constant 0 : index
    %c4_69 = arith.constant 4 : index
    %c0_70 = arith.constant 0 : index
    %103 = vector.load %arg14[%c0_68, %c4_69, %c0_70] : memref<2x10x160xbf16, #tpu.memory_space<vmem>>, vector<2x1x160xbf16>
    %104 = vector.shape_cast %103 : vector<2x1x160xbf16> to vector<2x160xbf16>
    %c0_71 = arith.constant 0 : index
    %c5 = arith.constant 5 : index
    %c0_72 = arith.constant 0 : index
    %105 = vector.load %arg14[%c0_71, %c5, %c0_72] : memref<2x10x160xbf16, #tpu.memory_space<vmem>>, vector<2x1x160xbf16>
    %106 = vector.shape_cast %105 : vector<2x1x160xbf16> to vector<2x160xbf16>
    %c0_73 = arith.constant 0 : index
    %c6 = arith.constant 6 : index
    %c0_74 = arith.constant 0 : index
    %107 = vector.load %arg14[%c0_73, %c6, %c0_74] : memref<2x10x160xbf16, #tpu.memory_space<vmem>>, vector<2x1x160xbf16>
    %108 = vector.shape_cast %107 : vector<2x1x160xbf16> to vector<2x160xbf16>
    %c0_75 = arith.constant 0 : index
    %c7 = arith.constant 7 : index
    %c0_76 = arith.constant 0 : index
    %109 = vector.load %arg14[%c0_75, %c7, %c0_76] : memref<2x10x160xbf16, #tpu.memory_space<vmem>>, vector<2x1x160xbf16>
    %110 = vector.shape_cast %109 : vector<2x1x160xbf16> to vector<2x160xbf16>
    %c0_77 = arith.constant 0 : index
    %c8 = arith.constant 8 : index
    %c0_78 = arith.constant 0 : index
    %111 = vector.load %arg14[%c0_77, %c8, %c0_78] : memref<2x10x160xbf16, #tpu.memory_space<vmem>>, vector<2x1x160xbf16>
    %112 = vector.shape_cast %111 : vector<2x1x160xbf16> to vector<2x160xbf16>
    %c0_79 = arith.constant 0 : index
    %c9 = arith.constant 9 : index
    %c0_80 = arith.constant 0 : index
    %113 = vector.load %arg14[%c0_79, %c9, %c0_80] : memref<2x10x160xbf16, #tpu.memory_space<vmem>>, vector<2x1x160xbf16>
    %114 = vector.shape_cast %113 : vector<2x1x160xbf16> to vector<2x160xbf16>
    %115 = tpu.concatenate %96, %98, %100, %102, %104, %106, %108, %110, %112, %114 in 1 : vector<2x160xbf16>, vector<2x160xbf16>, vector<2x160xbf16>, vector<2x160xbf16>, vector<2x160xbf16>, vector<2x160xbf16>, vector<2x160xbf16>, vector<2x160xbf16>, vector<2x160xbf16>, vector<2x160xbf16> -> vector<2x1600xbf16>
    %c0_81 = arith.constant 0 : index
    %c0_82 = arith.constant 0 : index
    %116 = vector.load %arg6[%c0_81, %c0_82] : memref<1600x120xbf16, #tpu.memory_space<vmem>>, vector<1600x120xbf16>
    %cst_83 = arith.constant dense<0.000000e+00> : vector<2x120xf32>
    %117 = tpu.matmul %115, %116, %cst_83 {dimension_numbers = #tpu.dot_dimension_numbers<[1], [0], [0], [1], [0, 0, 1, 1], [], []>} : vector<2x1600xbf16>, vector<1600x120xbf16>, vector<2x120xf32> -> vector<2x120xf32>
    %c0_84 = arith.constant 0 : index
    %c0_85 = arith.constant 0 : index
    %118 = vector.load %arg7[%c0_84, %c0_85] : memref<1x120xf32, #tpu.memory_space<vmem>>, vector<1x120xf32>
    %119 = vector.broadcast %118 : vector<1x120xf32> to vector<2x120xf32>
    %120 = arith.addf %117, %119 : vector<2x120xf32>
    %cst_86 = arith.constant 0.000000e+00 : f32
    %121 = vector.broadcast %cst_86 : f32 to vector<2x120xf32>
    %122 = arith.maximumf %120, %121 : vector<2x120xf32>
    %123 = arith.truncf %122 : vector<2x120xf32> to vector<2x120xbf16>
    %c0_87 = arith.constant 0 : index
    %c0_88 = arith.constant 0 : index
    %124 = vector.load %arg8[%c0_87, %c0_88] : memref<120x84xbf16, #tpu.memory_space<vmem>>, vector<120x84xbf16>
    %cst_89 = arith.constant dense<0.000000e+00> : vector<2x84xf32>
    %125 = tpu.matmul %123, %124, %cst_89 {dimension_numbers = #tpu.dot_dimension_numbers<[1], [0], [0], [1], [0, 0, 1, 1], [], []>} : vector<2x120xbf16>, vector<120x84xbf16>, vector<2x84xf32> -> vector<2x84xf32>
    %c0_90 = arith.constant 0 : index
    %c0_91 = arith.constant 0 : index
    %126 = vector.load %arg9[%c0_90, %c0_91] : memref<1x84xf32, #tpu.memory_space<vmem>>, vector<1x84xf32>
    %127 = vector.broadcast %126 : vector<1x84xf32> to vector<2x84xf32>
    %128 = arith.addf %125, %127 : vector<2x84xf32>
    %cst_92 = arith.constant 0.000000e+00 : f32
    %129 = vector.broadcast %cst_92 : f32 to vector<2x84xf32>
    %130 = arith.maximumf %128, %129 : vector<2x84xf32>
    %131 = arith.truncf %130 : vector<2x84xf32> to vector<2x84xbf16>
    %c0_93 = arith.constant 0 : index
    %c0_94 = arith.constant 0 : index
    %132 = vector.load %arg10[%c0_93, %c0_94] : memref<84x10xbf16, #tpu.memory_space<vmem>>, vector<84x10xbf16>
    %cst_95 = arith.constant dense<0.000000e+00> : vector<2x10xf32>
    %133 = tpu.matmul %131, %132, %cst_95 {dimension_numbers = #tpu.dot_dimension_numbers<[1], [0], [0], [1], [0, 0, 1, 1], [], []>} : vector<2x84xbf16>, vector<84x10xbf16>, vector<2x10xf32> -> vector<2x10xf32>
    %c0_96 = arith.constant 0 : index
    %c0_97 = arith.constant 0 : index
    %134 = vector.load %arg11[%c0_96, %c0_97] : memref<1x10xf32, #tpu.memory_space<vmem>>, vector<1x10xf32>
    %135 = vector.broadcast %134 : vector<1x10xf32> to vector<2x10xf32>
    %136 = arith.addf %133, %135 : vector<2x10xf32>
    %c0_98 = arith.constant 0 : index
    %c0_99 = arith.constant 0 : index
    %137 = vector.load %arg12[%c0_98, %c0_99] : memref<2x10xf32, #tpu.memory_space<vmem>>, vector<2x10xf32>
    tpu.vector_store %arg12[%c0_98, %c0_99], %136 {strides = array<i32>} : memref<2x10xf32, #tpu.memory_space<vmem>>, vector<2x10xf32>,
    return
  }
  func.func @transform_0(%arg0: i32) -> (i32, i32, i32) {
    %c0_i32 = arith.constant 0 : i32
    %c0_i32_0 = arith.constant 0 : i32
    %c0_i32_1 = arith.constant 0 : i32
    return %arg0, %c0_i32, %c0_i32_0 : i32, i32, i32
  }
  func.func @transform_1(%arg0: i32) -> (i32, i32, i32) {
    %c0_i32 = arith.constant 0 : i32
    %c0_i32_0 = arith.constant 0 : i32
    %c0_i32_1 = arith.constant 0 : i32
    %c0_i32_2 = arith.constant 0 : i32
    return %c0_i32, %c0_i32_0, %c0_i32_1 : i32, i32, i32
  }
  func.func @transform_2(%arg0: i32) -> (i32, i32) {
    %c0_i32 = arith.constant 0 : i32
    %c0_i32_0 = arith.constant 0 : i32
    %c0_i32_1 = arith.constant 0 : i32
    return %c0_i32, %c0_i32_0 : i32, i32
  }
  func.func @transform_3(%arg0: i32) -> (i32, i32, i32) {
    %c0_i32 = arith.constant 0 : i32
    %c0_i32_0 = arith.constant 0 : i32
    %c0_i32_1 = arith.constant 0 : i32
    %c0_i32_2 = arith.constant 0 : i32
    return %c0_i32, %c0_i32_0, %c0_i32_1 : i32, i32, i32
  }
  func.func @transform_4(%arg0: i32) -> (i32, i32) {
    %c0_i32 = arith.constant 0 : i32
    %c0_i32_0 = arith.constant 0 : i32
    %c0_i32_1 = arith.constant 0 : i32
    return %c0_i32, %c0_i32_0 : i32, i32
  }
  func.func @transform_5(%arg0: i32) -> (i32, i32) {
    %c0_i32 = arith.constant 0 : i32
    %c0_i32_0 = arith.constant 0 : i32
    %c0_i32_1 = arith.constant 0 : i32
    return %c0_i32, %c0_i32_0 : i32, i32
  }
  func.func @transform_6(%arg0: i32) -> (i32, i32) {
    %c0_i32 = arith.constant 0 : i32
    %c0_i32_0 = arith.constant 0 : i32
    %c0_i32_1 = arith.constant 0 : i32
    return %c0_i32, %c0_i32_0 : i32, i32
  }
  func.func @transform_7(%arg0: i32) -> (i32, i32) {
    %c0_i32 = arith.constant 0 : i32
    %c0_i32_0 = arith.constant 0 : i32
    %c0_i32_1 = arith.constant 0 : i32
    return %c0_i32, %c0_i32_0 : i32, i32
  }
  func.func @transform_8(%arg0: i32) -> (i32, i32) {
    %c0_i32 = arith.constant 0 : i32
    %c0_i32_0 = arith.constant 0 : i32
    %c0_i32_1 = arith.constant 0 : i32
    return %c0_i32, %c0_i32_0 : i32, i32
  }
  func.func @transform_9(%arg0: i32) -> (i32, i32) {
    %c0_i32 = arith.constant 0 : i32
    %c0_i32_0 = arith.constant 0 : i32
    %c0_i32_1 = arith.constant 0 : i32
    return %c0_i32, %c0_i32_0 : i32, i32
  }
  func.func @transform_10(%arg0: i32) -> (i32, i32) {
    %c0_i32 = arith.constant 0 : i32
    %c0_i32_0 = arith.constant 0 : i32
    %c0_i32_1 = arith.constant 0 : i32
    return %c0_i32, %c0_i32_0 : i32, i32
  }
  func.func @transform_11(%arg0: i32) -> (i32, i32) {
    %c0_i32 = arith.constant 0 : i32
    %c0_i32_0 = arith.constant 0 : i32
    return %arg0, %c0_i32 : i32, i32
  }
}

</mosaic_0001>

<bundles_post_ra>
// kernel: tile.13
= control target key start
LH: loop header
LB: loop body
LE: loop exit
PB: predicated region body
PF: predicated region fallthrough
CT: control target
= control target key end

     0   :  { %s40_s0 = inlined_call_operand.vmem [shape: f32[6], index: 0, kind: input, shape index: {}]   ;;  %s41_s1 = inlined_call_operand.vmem [shape: f32[28,6], index: 1, kind: output, shape index: {}]  }
   0x1   :  { %v4_v0 = vld [vmem:[%s40_s0] ss:$0 sm:$0xff] }
   0x2   :  { %5 = vst [vmem:[%s41_s1] sm:$0xff] %v4_v0 }
   0x3   :  { %12 = vst [vmem:[%s41_s1 + $0x8] sm:$0xff] %v4_v0 }
   0x4   :  { %13 = vst [vmem:[%s41_s1 + $0x10] sm:$0xff] %v4_v0 }
   0x5   :  { %14 = vst [vmem:[%s41_s1 + $0x18] sm:$0xff] %v4_v0 }

// kernel: tile.14
= control target key start
LH: loop header
LB: loop body
LE: loop exit
PB: predicated region body
PF: predicated region fallthrough
CT: control target
= control target key end

     0   :  { %vm9_vm0 = vcmask 15360   ;;  %s248_s12 = smov 126   ;;  %s249_s13 = smov 114   ;;  %vm3_vm1 = vcmask 48128   ;;  %vm13_vm2 = vcmask 31744   ;;  %vm16_vm3 = vcmask 1048560   ;;  %s378_s0 = inlined_call_operand.vmem [shape: f32[28,6], index: 0, kind: input, shape index: {}]   ;;  %s379_s1 = inlined_call_operand.vmem [shape: f32[1,168], index: 1, kind: output, shape index: {}]  }
   0x1   :  { %v192_v0 = vld [vmem:[%s378_s0 + $0x15] sm:$0x1]   ;;  %v195_v3 = vld [vmem:[%s378_s0 + $0x13] sm:$0x1]   ;;  %v197_v4 = vld [vmem:[%s378_s0 + $0x11] sm:$0x1]  }
   0x2   :  { %v193_v1 = vld [vmem:[%s378_s0 + $0x15] sm:$0x1]   ;;  %26 = vrot.lane.b32.xlu1 %v195_v3, %s249_s13  ;;  %s250_s16 = smov 102   ;;  %v194_v5 = vld [vmem:[%s378_s0 + $0x14] sm:$0x1]   ;;  %s251_s21 = smov 120  }
   0x3   :  { %v10_v2 = vsel %vm9_vm0, %v193_v1, %v192_v0  ;;  %38 = vrot.lane.b32.xlu2 %v197_v4, %s250_s16  ;;  %v196_v6 = vld [vmem:[%s378_s0 + $0x12] sm:$0x1]   ;;  %s252_s22 = smov 108   ;;  %v198_v7 = vld [vmem:[%s378_s0 + $0x10] sm:$0x1]   ;;  %s253_s25 = smov 96  }
   0x4   :  { %11 = vrot.lane.b32.xlu0 %v10_v2, %s248_s12  ;;  %v199_v8 = vld [vmem:[%s378_s0 + $0xf] sm:$0x1]   ;;  %v200_v9 = vld [vmem:[%s378_s0 + $0xe] sm:$0x1]   ;;  %s254_s30 = smov 90   ;;  %s255_s2 = smov 84  }
   0x5   :  { %v201_v10 = vld [vmem:[%s378_s0 + $0xd] sm:$0x1]   ;;  %s256_s5 = smov 78   ;;  %v202_v11 = vld [vmem:[%s378_s0 + $0xc] sm:$0x1]   ;;  %s257_s10 = smov 72  }
   0x6   :  { %v203_v12 = vld [vmem:[%s378_s0 + $0xb] sm:$0x1]   ;;  %s258_s11 = smov 66   ;;  %v204_v13 = vld [vmem:[%s378_s0 + $0xa] sm:$0x1]   ;;  %s259_s14 = smov 60  }
   0x7   :  { %v205_v14 = vld [vmem:[%s378_s0 + $0x9] sm:$0x1]   ;;  %v206_v15 = vld [vmem:[%s378_s0 + $0x8] sm:$0x1]   ;;  %s260_s19 = smov 54   ;;  %s261_s20 = smov 48  }
   0x8   :  { %v207_v16 = vld [vmem:[%s378_s0 + $0x7] sm:$0x1]   ;;  %s262_s23 = smov 42   ;;  %v208_v17 = vld [vmem:[%s378_s0 + $0x6] sm:$0x1]   ;;  %s263_s28 = smov 36  }
   0x9   :  { %v209_v18 = vld [vmem:[%s378_s0 + $0x1b] sm:$0x1]   ;;  %s264_s29 = smov 34   ;;  %v210_v19 = vld [vmem:[%s378_s0 + $0x5] sm:$0x1]   ;;  %s265_s3 = smov 30  }
   0xa   :  { %32 = vrot.lane.b32.xlu1 %v196_v6, %s252_s22  ;;  %v211_v20 = vld [vmem:[%s378_s0 + $0x1a] sm:$0x1]   ;;  %v212_v21 = vld [vmem:[%s378_s0 + $0x4] sm:$0x1]   ;;  %s266_s8 = smov 28   ;;  %s267_s9 = smov 24  }
   0xb   :  { %44 = vrot.lane.b32.xlu2 %v198_v7, %s253_s25  ;;  %v213_v22 = vld [vmem:[%s378_s0 + $0x19] sm:$0x1]   ;;  %s268_s12 = smov 22   ;;  %v214_v23 = vld [vmem:[%s378_s0 + $0x3] sm:$0x1]   ;;  %s269_s17 = smov 18  }
   0xc   :  { %20 = vrot.lane.b32.xlu0 %v194_v5, %s251_s21  ;;  %v215_v24 = vld [vmem:[%s378_s0 + $0x18] sm:$0x1]   ;;  %s270_s18 = smov 16   ;;  %v216_v25 = vld [vmem:[%s378_s0 + $0x2] sm:$0x1]   ;;  %s271_s21 = smov 12  }
   0xd   :  { %v217_v26 = vld [vmem:[%s378_s0 + $0x17] sm:$0x1]   ;;  %v218_v27 = vld [vmem:[%s378_s0 + $0x1] sm:$0x1]   ;;  %s272_s26 = smov 10   ;;  %s273_s27 = smov 6  }
   0xe   :  { %v219_v28 = vld [vmem:[%s378_s0 + $0x16] sm:$0x1]   ;;  %v2_v29 = vld [vmem:[%s378_s0] sm:$0x1]   ;;  %vm22_vm4 = vcmask 1032128   ;;  %vm28_vm5 = vcmask 982928  }
   0xf   :  { %4 = vst.msk [vmem:[#allocation0] sm:$0x1] %vm3_vm1, %v2_v29   ;;  %vm34_vm6 = vcmask 933728   ;;  %vm40_vm7 = vcmask 884528   ;;  %vm46_vm8 = vcmask 835328   ;;  %vm52_vm9 = vcmask 786128  }
  0x10   :  { %vm58_vm10 = vcmask 736928   ;;  %vm64_vm11 = vcmask 687728   ;;  %vm70_vm12 = vcmask 638528   ;;  %vm76_vm13 = vcmask 589328  }
  0x11   :  { %vm82_vm14 = vcmask 540128   ;;  %vm88_vm15 = vcmask 490928   ;;  %vm94_vm0 = vcmask 441728   ;;  %vm100_vm1 = vcmask 392528  }
  0x12   :  { %56 = vrot.lane.b32.xlu1 %v200_v9, %s255_s2 }
  0x13   :  { %62 = vrot.lane.b32.xlu2 %v201_v10, %s256_s5 }
  0x14   :  { %50 = vrot.lane.b32.xlu0 %v199_v8, %s254_s30  ;;  %s274_s30 = smov 4  }
  0x1a   :  { %74 = vrot.lane.b32.xlu1 %v203_v12, %s258_s11 }
  0x1b   :  { %80 = vrot.lane.b32.xlu2 %v204_v13, %s259_s14 }
  0x1c   :  { %68 = vrot.lane.b32.xlu0 %v202_v11, %s257_s10 }
  0x22   :  { %92 = vrot.lane.b32.xlu1 %v206_v15, %s261_s20 }
  0x23   :  { %98 = vrot.lane.b32.xlu2 %v207_v16, %s262_s23 }
  0x24   :  { %86 = vrot.lane.b32.xlu0 %v205_v14, %s260_s19 }
  0x2a   :  { %110 = vrot.lane.b32.xlu1 %v209_v18, %s264_s29 }
  0x2b   :  { %117 = vrot.lane.b32.xlu2 %v210_v19, %s265_s3 }
  0x2c   :  { %104 = vrot.lane.b32.xlu0 %v208_v17, %s263_s28 }
  0x32   :  { %130 = vrot.lane.b32.xlu1 %v212_v21, %s267_s9 }
  0x33   :  { %136 = vrot.lane.b32.xlu2 %v213_v22, %s268_s12 }
  0x34   :  { %123 = vrot.lane.b32.xlu0 %v211_v20, %s266_s8 }
  0x3a   :  { %149 = vrot.lane.b32.xlu1 %v215_v24, %s270_s18 }
  0x3b   :  { %156 = vrot.lane.b32.xlu2 %v216_v25, %s271_s21 }
  0x3c   :  { %143 = vrot.lane.b32.xlu0 %v214_v23, %s269_s17 }
  0x42   :  { %169 = vrot.lane.b32.xlu1 %v218_v27, %s273_s27 }
  0x43   :  { %175 = vrot.lane.b32.xlu2 %v219_v28, %s274_s30 }
  0x44   :  { %162 = vrot.lane.b32.xlu0 %v217_v26, %s272_s26 }
  0x5d   :  { %v39_v30 = vpop.permute.xlu2 %38  }
  0x65   :  { %v45_v31 = vpop.permute.xlu2 %44  }
  0x6d   :  { %v63_v32 = vpop.permute.xlu2 %62  }
  0x74   :  { %v27_v34 = vpop.permute.xlu1 %26  }
  0x75   :  { %v81_v35 = vpop.permute.xlu2 %80  }
  0x76   :  { %v12_v33 = vpop.permute.xlu0 %11  }
  0x77   :  { %15 = vst.msk [vmem:[#allocation0 + $0x8] sm:$0x1] %vm13_vm2, %v12_v33   ;;  %vm106_vm2 = vcmask 343328  }
  0x78   :  { %17 = vst.msk [vmem:[#allocation0] sm:$0x1] %vm16_vm3, %v12_v33   ;;  %vm119_vm3 = vcmask 294128  }
  0x7c   :  { %v33_v37 = vpop.permute.xlu1 %32  }
  0x7d   :  { %v99_v38 = vpop.permute.xlu2 %98  }
  0x7e   :  { %v21_v36 = vpop.permute.xlu0 %20  }
  0x7f   :  { %23 = vst.msk [vmem:[#allocation0] sm:$0x1] %vm22_vm4, %v21_v36   ;;  %vm112_vm4 = vcmask 326928  }
  0x80   :  { %29 = vst.msk [vmem:[#allocation0] sm:$0x1] %vm28_vm5, %v27_v34   ;;  %vm125_vm5 = vcmask 277728  }
  0x81   :  { %35 = vst.msk [vmem:[#allocation0] sm:$0x1] %vm34_vm6, %v33_v37   ;;  %vm138_vm6 = vcmask 228528  }
  0x82   :  { %41 = vst.msk [vmem:[#allocation0] sm:$0x1] %vm40_vm7, %v39_v30   ;;  %vm132_vm7 = vcmask 244928  }
  0x83   :  { %47 = vst.msk [vmem:[#allocation0] sm:$0x1] %vm46_vm8, %v45_v31   ;;  %vm145_vm8 = vcmask 195728  }
  0x84   :  { %v57_v40 = vpop.permute.xlu1 %56  }
  0x85   :  { %v118_v41 = vpop.permute.xlu2 %117  }
  0x86   :  { %v51_v39 = vpop.permute.xlu0 %50  }
  0x87   :  { %53 = vst.msk [vmem:[#allocation0] sm:$0x1] %vm52_vm9, %v51_v39   ;;  %vm158_vm9 = vcmask 146528  }
  0x88   :  { %59 = vst.msk [vmem:[#allocation0] sm:$0x1] %vm58_vm10, %v57_v40   ;;  %vm151_vm10 = vcmask 179328  }
  0x89   :  { %65 = vst.msk [vmem:[#allocation0] sm:$0x1] %vm64_vm11, %v63_v32   ;;  %vm164_vm11 = vcmask 130128  }
  0x8c   :  { %v75_v43 = vpop.permute.xlu1 %74  }
  0x8d   :  { %v137_v44 = vpop.permute.xlu2 %136  }
  0x8e   :  { %v69_v42 = vpop.permute.xlu0 %68  }
  0x8f   :  { %71 = vst.msk [vmem:[#allocation0] sm:$0x1] %vm70_vm12, %v69_v42   ;;  %vm177_vm12 = vcmask 80928  }
  0x90   :  { %77 = vst.msk [vmem:[#allocation0] sm:$0x1] %vm76_vm13, %v75_v43   ;;  %vm171_vm13 = vcmask 97328  }
  0x91   :  { %83 = vst.msk [vmem:[#allocation0] sm:$0x1] %vm82_vm14, %v81_v35  }
  0x94   :  { %v93_v46 = vpop.permute.xlu1 %92  }
  0x95   :  { %v157_v47 = vpop.permute.xlu2 %156  }
  0x96   :  { %v87_v45 = vpop.permute.xlu0 %86  }
  0x97   :  { %89 = vst.msk [vmem:[#allocation0] sm:$0x1] %vm88_vm15, %v87_v45  }
  0x98   :  { %95 = vst.msk [vmem:[#allocation0] sm:$0x1] %vm94_vm0, %v93_v46  }
  0x99   :  { %101 = vst.msk [vmem:[#allocation0] sm:$0x1] %vm100_vm1, %v99_v38  }
  0x9c   :  { %v111_v49 = vpop.permute.xlu1 %110  }
  0x9d   :  { %114 = vst.msk [vmem:[#allocation0 + $0x8] sm:$0x1] %vm112_vm4, %v111_v49   ;;  %v176_v50 = vpop.permute.xlu2 %175  }
  0x9e   :  { %v105_v48 = vpop.permute.xlu0 %104  }
  0x9f   :  { %107 = vst.msk [vmem:[#allocation0] sm:$0x1] %vm106_vm2, %v105_v48  }
  0xa0   :  { %120 = vst.msk [vmem:[#allocation0] sm:$0x1] %vm119_vm3, %v118_v41  }
  0xa4   :  { %v131_v52 = vpop.permute.xlu1 %130  }
  0xa5   :  { %133 = vst.msk [vmem:[#allocation0] sm:$0x1] %vm132_vm7, %v131_v52  }
  0xa6   :  { %v124_v51 = vpop.permute.xlu0 %123  }
  0xa7   :  { %127 = vst.msk [vmem:[#allocation0 + $0x8] sm:$0x1] %vm125_vm5, %v124_v51  }
  0xa8   :  { %140 = vst.msk [vmem:[#allocation0 + $0x8] sm:$0x1] %vm138_vm6, %v137_v44  }
  0xac   :  { %v150_v54 = vpop.permute.xlu1 %149  }
  0xad   :  { %153 = vst.msk [vmem:[#allocation0 + $0x8] sm:$0x1] %vm151_vm10, %v150_v54  }
  0xae   :  { %v144_v53 = vpop.permute.xlu0 %143  }
  0xaf   :  { %146 = vst.msk [vmem:[#allocation0] sm:$0x1] %vm145_vm8, %v144_v53  }
  0xb0   :  { %159 = vst.msk [vmem:[#allocation0] sm:$0x1] %vm158_vm9, %v157_v47  }
  0xb4   :  { %v170_v56 = vpop.permute.xlu1 %169  }
  0xb5   :  { %172 = vst.msk [vmem:[#allocation0] sm:$0x1] %vm171_vm13, %v170_v56  }
  0xb6   :  { %v163_v55 = vpop.permute.xlu0 %162  }
  0xb7   :  { %166 = vst.msk [vmem:[#allocation0 + $0x8] sm:$0x1] %vm164_vm11, %v163_v55  }
  0xb8   :  { %179 = vst.msk [vmem:[#allocation0 + $0x8] sm:$0x1] %vm177_vm12, %v176_v50  }
  0xbc   :  { %v182_v58 = vld [vmem:[#allocation0] sm:$0x1] }
  0xbd   :  { %185 = vst [vmem:[%s379_s1] sm:$0x1] %v182_v58 }
  0xbf   :  { %v187_v57 = vld [vmem:[#allocation0 + $0x8] sm:$0x1] }
  0xc0   :  { %220 = vst [vmem:[%s379_s1 + $0x1] sm:$0x1] %v187_v57 }

// kernel: tile.18
= control target key start
LH: loop header
LB: loop body
LE: loop exit
PB: predicated region body
PF: predicated region fallthrough
CT: control target
= control target key end

     0   :  { %s28_s0 = inlined_call_operand.vmem [shape: f32[16], index: 0, kind: input, shape index: {}]   ;;  %s29_s1 = inlined_call_operand.vmem [shape: f32[10,16], index: 1, kind: output, shape index: {}]  }
   0x1   :  { %v4_v0 = vld [vmem:[%s28_s0] ss:$0 sm:$0xff] }
   0x2   :  { %5 = vst [vmem:[%s29_s1] sm:$0xff] %v4_v0 }
   0x3   :  { %8 = vst [vmem:[%s29_s1 + $0x8] sm:$0xff] %v4_v0 }

// kernel: tile.19
= control target key start
LH: loop header
LB: loop body
LE: loop exit
PB: predicated region body
PF: predicated region fallthrough
CT: control target
= control target key end

     0   :  { %s76_s10 = smov 112   ;;  %s77_s11 = smov 80   ;;  %vm4_vm0 = vcmask 130048   ;;  %vm10_vm1 = vcmask 1048448   ;;  %vm16_vm2 = vcmask 917248   ;;  %vm22_vm3 = vcmask 786048   ;;  %s123_s0 = inlined_call_operand.vmem [shape: f32[10,16], index: 0, kind: input, shape index: {}]   ;;  %s124_s1 = inlined_call_operand.vmem [shape: f32[1,160], index: 1, kind: output, shape index: {}]  }
   0x1   :  { %v61_v0 = vld [vmem:[%s123_s0 + $0x7] sm:$0x1]   ;;  %v63_v1 = vld [vmem:[%s123_s0 + $0x5] sm:$0x1]   ;;  %v65_v2 = vld [vmem:[%s123_s0 + $0x3] sm:$0x1]  }
   0x2   :  { %8 = vrot.lane.b32.xlu0 %v61_v0, %s76_s10  ;;  %20 = vrot.lane.b32.xlu1 %v63_v1, %s77_s11  ;;  %s78_s14 = smov 48   ;;  %v62_v3 = vld [vmem:[%s123_s0 + $0x6] sm:$0x1]   ;;  %v64_v4 = vld [vmem:[%s123_s0 + $0x4] sm:$0x1]   ;;  %s79_s19 = smov 96  }
   0x3   :  { %32 = vrot.lane.b32.xlu2 %v65_v2, %s78_s14  ;;  %s80_s20 = smov 64   ;;  %v66_v5 = vld [vmem:[%s123_s0 + $0x2] sm:$0x1]   ;;  %s43_s23 = smov 3  ;;  %vm28_vm4 = vcmask 654848   ;;  %vm34_vm5 = vcmask 523648  }
   0x4   :  { %s81_s24 = smov 32   ;;  %v67_v6 = vld [vmem:[%s123_s0 + $0x1] ss:$8 sm:%s43_s23]   ;;  %s82_s27 = smov 16   ;;  %vm40_vm6 = vcmask 392448   ;;  %vm47_vm7 = vcmask 261248  }
   0x5   :  { %s2_s28 = smov 3 }
   0x6   :  { %v3_v7 = vld [vmem:[%s123_s0] ss:$8 sm:%s2_s28]  }
   0x7   :  { %5 = vst.msk [vmem:[#allocation0] ss:$8 sm:$0x3] %vm4_vm0, %v3_v7  }
   0xa   :  { %14 = vrot.lane.b32.xlu0 %v62_v3, %s79_s19  ;;  %26 = vrot.lane.b32.xlu1 %v64_v4, %s80_s20 }
   0xb   :  { %38 = vrot.lane.b32.xlu2 %v66_v5, %s81_s24 }
  0x12   :  { %45 = vrot.lane.b32.xlu0 %v67_v6, %s82_s27 }
  0x5d   :  { %v33_v8 = vpop.permute.xlu2 %32  }
  0x65   :  { %v39_v9 = vpop.permute.xlu2 %38  }
  0x74   :  { %v9_v10 = vpop.permute.xlu0 %8   ;;  %v21_v11 = vpop.permute.xlu1 %20  }
  0x75   :  { %11 = vst.msk [vmem:[#allocation0] sm:$0x1] %vm10_vm1, %v9_v10  }
  0x7c   :  { %v15_v12 = vpop.permute.xlu0 %14   ;;  %v27_v13 = vpop.permute.xlu1 %26  }
  0x7d   :  { %17 = vst.msk [vmem:[#allocation0] sm:$0x1] %vm16_vm2, %v15_v12  }
  0x7e   :  { %23 = vst.msk [vmem:[#allocation0] sm:$0x1] %vm22_vm3, %v21_v11  }
  0x7f   :  { %29 = vst.msk [vmem:[#allocation0] sm:$0x1] %vm28_vm4, %v27_v13  }
  0x80   :  { %35 = vst.msk [vmem:[#allocation0] sm:$0x1] %vm34_vm5, %v33_v8  }
  0x81   :  { %41 = vst.msk [vmem:[#allocation0] sm:$0x1] %vm40_vm6, %v39_v9  }
  0x84   :  { %v46_v14 = vpop.permute.xlu0 %45  }
  0x85   :  { %48 = vst.msk [vmem:[#allocation0] ss:$8 sm:$0x3] %vm47_vm7, %v46_v14  }
  0x8c   :  { %v51_v15 = vld [vmem:[#allocation0] sm:$0x1]  ;;  %v56_v16 = vld [vmem:[#allocation0 + $0x8] sm:$0x1] }
  0x8d   :  { %54 = vst [vmem:[%s124_s1] sm:$0x1] %v51_v15 }
  0x8e   :  { %68 = vst [vmem:[%s124_s1 + $0x1] sm:$0x1] %v56_v16 }

// kernel: lenet_forward.1
= control target key start
LH: loop header
LB: loop body
LE: loop exit
PB: predicated region body
PF: predicated region fallthrough
CT: control target
= control target key end

     0   :  { %vm92_vm0 = vcmask 261120   ;;  %s6852_s0 = inlined_call_operand.vmem [shape: bf16[2,32,32], index: 0, kind: input, shape index: {}]   ;;  %s6853_s1 = inlined_call_operand.vmem [shape: bf16[5,32,168], index: 1, kind: input, shape index: {}]   ;;  %s6854_s2 = inlined_call_operand.vmem [shape: f32[1,168], index: 2, kind: input, shape index: {}]   ;;  %s6855_s3 = inlined_call_operand.vmem [shape: bf16[5,168,160], index: 3, kind: input, shape index: {}]   ;;  %s6856_s4 = inlined_call_operand.vmem [shape: f32[1,160], index: 4, kind: input, shape index: {}]   ;;  %s6857_s5 = inlined_call_operand.vmem [shape: bf16[1600,120], index: 5, kind: input, shape index: {}]   ;;  %s6858_s6 = inlined_call_operand.vmem [shape: f32[1,120], index: 6, kind: input, shape index: {}]   ;;  %s6859_s7 = inlined_call_operand.vmem [shape: bf16[120,84], index: 7, kind: input, shape index: {}]   ;;  %s6860_s8 = inlined_call_operand.vmem [shape: f32[1,84], index: 8, kind: input, shape index: {}]   ;;  %s6861_s9 = inlined_call_operand.vmem [shape: bf16[84,10], index: 9, kind: input, shape index: {}]   ;;  %s6862_s10 = inlined_call_operand.vmem [shape: f32[1,10], index: 10, kind: input, shape index: {}]   ;;  %s6863_s11 = inlined_call_operand.hbm [shape: f32[2,10], index: 11, kind: output, shape index: {}]  }
   0x1   :  { %v3478_v0 = vld [vmem:[%s6853_s1 + $0x10] sm:$0xf]  ;;  %v4602_v1 = vld [vmem:[%s6853_s1 + $0x14] sm:$0xf0]  ;;  %v4601_v2 = vld [vmem:[%s6853_s1 + $0x14] sm:$0xf] }
   0x2   :  { %v3479_v3 = vor.u32 %v4602_v1, %v3478_v0  ;;  %v3480_v4 = vld [vmem:[%s6853_s1 + $0x18] sm:$0xf0]  ;;  %v3506_v5 = vld [vmem:[%s6853_s1 + $0x30] sm:$0xf]  ;;  %v4606_v6 = vld [vmem:[%s6853_s1 + $0x34] sm:$0xf0] }
   0x3   :  { %v3483_v7 = vor.u32 %v4601_v2, %v3480_v4  ;;  %v3507_v8 = vor.u32 %v4606_v6, %v3506_v5  ;;  %v4605_v9 = vld [vmem:[%s6853_s1 + $0x34] sm:$0xf]  ;;  %v3508_v10 = vld [vmem:[%s6853_s1 + $0x38] sm:$0xf0]  ;;  %v3470_v11 = vld [vmem:[%s6853_s1] sm:$0xf] }
   0x4   :  { %111 = vmatpush.bf16.msra.mxu0 %v3479_v3  ;;  %v3511_v12 = vor.u32 %v4605_v9, %v3508_v10  ;;  %v4600_v13 = vld [vmem:[%s6853_s1 + $0x4] sm:$0xf0]  ;;  %v4599_v14 = vld [vmem:[%s6853_s1 + $0x4] sm:$0xf]  ;;  %v3472_v15 = vld [vmem:[%s6853_s1 + $0x8] sm:$0xf0] }
   0x5   :  { %140 = vmatpush.bf16.msra.mxu1 %v3483_v7  ;;  %194 = vmatpush.bf16.msra.mxu2 %v3507_v8  ;;  %v3471_v16 = vor.u32 %v4600_v13, %v3470_v11  ;;  %v3475_v17 = vor.u32 %v4599_v14, %v3472_v15  ;;  %v3498_v18 = vld [vmem:[%s6853_s1 + $0x20] sm:$0xf]  ;;  %v4604_v19 = vld [vmem:[%s6853_s1 + $0x24] sm:$0xf0]  ;;  %v4603_v20 = vld [vmem:[%s6853_s1 + $0x24] sm:$0xf] }
   0x6   :  { %223 = vmatpush.bf16.msra.mxu3 %v3511_v12  ;;  %v3499_v21 = vor.u32 %v4604_v19, %v3498_v18  ;;  %v3500_v22 = vld [vmem:[%s6853_s1 + $0x28] sm:$0xf0]  ;;  %v4988_v23 = vld [vmem:[%s6852_s0] sm:$0xff]  ;;  %v3534_v24 = vld [vmem:[%s6853_s1 + $0x50] sm:$0xf] }
   0x7   :  { %v3503_v25 = vor.u32 %v4603_v20, %v3500_v22  ;;  %v4610_v26 = vld [vmem:[%s6853_s1 + $0x54] sm:$0xf0]  ;;  %v4609_v27 = vld [vmem:[%s6853_s1 + $0x54] sm:$0xf]  ;;  %v3536_v28 = vld [vmem:[%s6853_s1 + $0x58] sm:$0xf0] }
   0x8   :  { %112 = vmatpush.bf16.msra.mxu0 %v3471_v16  ;;  %v3535_v29 = vor.u32 %v4610_v26, %v3534_v24  ;;  %v3539_v30 = vor.u32 %v4609_v27, %v3536_v28 }
   0x9   :  { %141 = vmatpush.bf16.msra.mxu1 %v3475_v17  ;;  %195 = vmatpush.bf16.msra.mxu2 %v3499_v21 }
   0xa   :  { %16 = vsyncpa [#allocation5], 0  ;;  %224 = vmatpush.bf16.msra.mxu3 %v3503_v25  ;;  %v3526_v31 = vld [vmem:[%s6853_s1 + $0x40] sm:$0xf]  ;;  %v4608_v32 = vld [vmem:[%s6853_s1 + $0x44] sm:$0xf0] }
   0xb   :  { %3484 = vmatmul.msk.bf16.vlgmr.msra.gmra.mxu0 %vm92_vm0, %v4988_v23  ;;  %v4607_v33 = vld [vmem:[%s6853_s1 + $0x44] sm:$0xf]  ;;  %v3527_v34 = vor.u32 %v4608_v32, %v3526_v31  ;;  %v3528_v35 = vld [vmem:[%s6853_s1 + $0x48] sm:$0xf0]  ;;  %v3562_v38 = vld [vmem:[%s6853_s1 + $0x70] sm:$0xf] }
   0xc   :  { %322 = vmatpush.bf16.msrb.mxu0 %v3535_v29  ;;  %3488 = vmatmul.msk.bf16.vlgmr.msra.gmra.mxu1 %vm92_vm0, %v4988_v23  ;;  %v3531_v36 = vor.u32 %v4607_v33, %v3528_v35  ;;  %v5025_v37 = vld [vmem:[%s6852_s0 + $0x8] sm:$0xff]  ;;  %v4614_v39 = vld [vmem:[%s6853_s1 + $0x74] sm:$0xf0]  ;;  %v4613_v40 = vld [vmem:[%s6853_s1 + $0x74] sm:$0xf]  ;;  %vm262_vm1 = vcmask 1046528  }
   0xd   :  { %351 = vmatpush.bf16.msrb.mxu1 %v3539_v30  ;;  %3512 = vmatmul.msk.bf16.vlgmr.msra.gmra.mxu2 %vm92_vm0, %v4988_v23  ;;  %v3563_v41 = vor.u32 %v4614_v39, %v3562_v38  ;;  %v3564_v42 = vld [vmem:[%s6853_s1 + $0x78] sm:$0xf0]  ;;  %v3554_v43 = vld [vmem:[%s6853_s1 + $0x60] sm:$0xf]  ;;  %v4612_v44 = vld [vmem:[%s6853_s1 + $0x64] sm:$0xf0] }
   0xe   :  { %3516 = vmatmul.msk.bf16.vlgmr.msra.gmra.mxu3 %vm92_vm0, %v4988_v23  ;;  %v3567_v45 = vor.u32 %v4613_v40, %v3564_v42  ;;  %v4611_v46 = vld [vmem:[%s6853_s1 + $0x64] sm:$0xf]  ;;  %v3556_v47 = vld [vmem:[%s6853_s1 + $0x68] sm:$0xf0]  ;;  %v3555_v48 = vor.u32 %v4612_v44, %v3554_v43  ;;  %v5062_v50 = vld [vmem:[%s6852_s0 + $0x10] sm:$0xff]  ;;  %vm807_vm2 = vcmask 1043456  }
   0xf   :  { %477 = vmatpush.bf16.msrb.mxu2 %v3563_v41  ;;  %v3559_v49 = vor.u32 %v4611_v46, %v3556_v47  ;;  %v3590_v51 = vld [vmem:[%s6853_s1 + $0x90] sm:$0xf]  ;;  %v4618_v52 = vld [vmem:[%s6853_s1 + $0x94] sm:$0xf0]  ;;  %v4617_v53 = vld [vmem:[%s6853_s1 + $0x94] sm:$0xf] }
  0x10   :  { %323 = vmatpush.bf16.msrb.mxu0 %v3527_v34  ;;  %506 = vmatpush.bf16.msrb.mxu3 %v3567_v45  ;;  %v3591_v54 = vor.u32 %v4618_v52, %v3590_v51  ;;  %v3592_v55 = vld [vmem:[%s6853_s1 + $0x98] sm:$0xf0]  ;;  %v3582_v58 = vld [vmem:[%s6853_s1 + $0x80] sm:$0xf]  ;;  %v4616_v59 = vld [vmem:[%s6853_s1 + $0x84] sm:$0xf0] }
  0x11   :  { %352 = vmatpush.bf16.msrb.mxu1 %v3531_v36  ;;  %v3595_v56 = vor.u32 %v4617_v53, %v3592_v55  ;;  %v5087_v57 = vld [vmem:[%s6852_s0 + $0x18] sm:$0xff]  ;;  %v4615_v60 = vld [vmem:[%s6853_s1 + $0x84] sm:$0xf]  ;;  %v3583_v61 = vor.u32 %v4616_v59, %v3582_v58  ;;  %v3584_v62 = vld [vmem:[%s6853_s1 + $0x88] sm:$0xf0]  ;;  %vm817_vm3 = vcmask 1043459  }
  0x12   :  { %v3587_v63 = vor.u32 %v4615_v60, %v3584_v62  ;;  %vm818_vm4 = vcmask 326663   ;;  %vm573_vm6 = vcmask 1045504   ;;  %vm808_vm7 = vcmask 326660   ;;  %s4873_s0 = smov 32   ;;  %s4874_s21 = smov 96  }
  0x13   :  { %478 = vmatpush.bf16.msrb.mxu2 %v3555_v48  ;;  %vm819_vm5 = vmor %vm818_vm4, %vm817_vm3  ;;  %vm811_vm8 = vcmask 1042432   ;;  %vm812_vm9 = vcmask 325636   ;;  %vm970_vm12 = vcmask 326656   ;;  %vm1766_vm13 = vcmask 1044480   ;;  %s4875_s22 = smov 64   ;;  %s4876_s26 = smov [#allocation4]  }
  0x14   :  { %507 = vmatpush.bf16.msrb.mxu3 %v3559_v49  ;;  %633 = vmatpush.bf16.msra.mxu0 %v3591_v54  ;;  %vm5554_vm10 = vmor %vm808_vm7, %vm807_vm2  ;;  %vm2069_vm14 = vcmask 1040384   ;;  %vm2070_vm15 = vcmask 258052   ;;  %vm2145_vm7 = vcmask 523264   ;;  %s3441_s27 = sshll.u32 %s4876_s26, 4  ;;  %s3443_s28 = sshll.u32 %s6863_s11, 4  ;;  %s3442_s27 = int_to_ptr.vmem [resolvable:$true] %s3441_s27  ;;  %s3444_s28 = int_to_ptr.hbm [resolvable:$true] %s3443_s28 }
  0x15   :  { %662 = vmatpush.bf16.msra.mxu1 %v3595_v56  ;;  %vm5560_vm11 = vmor %vm812_vm9, %vm811_vm8  ;;  %vm3413_vm8 = vcmask 687104   ;;  %vm3434_vm9 = vcmask 74752  }
  0x16   :  { %vm6347_vm3 = vmor %vm2070_vm15, %vm2069_vm14 }
  0x18   :  { %634 = vmatpush.bf16.msra.mxu0 %v3583_v61 }
  0x19   :  { %663 = vmatpush.bf16.msra.mxu1 %v3587_v63 }
  0x1b   :  { %3485 = vmatmul.msk.bf16.gmra.mxu0 %vm92_vm0, %v5025_v37 }
  0x1c   :  { %3489 = vmatmul.msk.bf16.gmra.mxu1 %vm92_vm0, %v5025_v37 }
  0x1d   :  { %3513 = vmatmul.msk.bf16.gmra.mxu2 %vm92_vm0, %v5025_v37 }
  0x1e   :  { %3517 = vmatmul.msk.bf16.gmra.mxu3 %vm92_vm0, %v5025_v37 }
  0x2b   :  { %3486 = vmatmul.msk.bf16.gmra.mxu0 %vm92_vm0, %v5062_v50 }
  0x2c   :  { %3490 = vmatmul.msk.bf16.gmra.mxu1 %vm92_vm0, %v5062_v50 }
  0x2d   :  { %3514 = vmatmul.msk.bf16.gmra.mxu2 %vm92_vm0, %v5062_v50 }
  0x2e   :  { %3518 = vmatmul.msk.bf16.gmra.mxu3 %vm92_vm0, %v5062_v50 }
  0x3b   :  { %3487 = vmatmul.msk.bf16.gmra.mxu0 %vm92_vm0, %v5087_v57 }
  0x3c   :  { %3491 = vmatmul.msk.bf16.gmra.mxu1 %vm92_vm0, %v5087_v57 }
  0x3d   :  { %3515 = vmatmul.msk.bf16.gmra.mxu2 %vm92_vm0, %v5087_v57 }
  0x3e   :  { %3519 = vmatmul.msk.bf16.gmra.mxu3 %vm92_vm0, %v5087_v57 }
  0x4b   :  { %3540 = vmatmul.msk.bf16.vlgmr.msrb.gmra.mxu0 %vm92_vm0, %v4988_v23 }
  0x4c   :  { %3544 = vmatmul.msk.bf16.vlgmr.msrb.gmra.mxu1 %vm92_vm0, %v4988_v23 }
  0x4d   :  { %3568 = vmatmul.msk.bf16.vlgmr.msrb.gmra.mxu2 %vm92_vm0, %v4988_v23 }
  0x4e   :  { %3572 = vmatmul.msk.bf16.vlgmr.msrb.gmra.mxu3 %vm92_vm0, %v4988_v23 }
  0x5b   :  { %3541 = vmatmul.msk.bf16.gmra.mxu0 %vm92_vm0, %v5025_v37 }
  0x5c   :  { %3545 = vmatmul.msk.bf16.gmra.mxu1 %vm92_vm0, %v5025_v37 }
  0x5d   :  { %3569 = vmatmul.msk.bf16.gmra.mxu2 %vm92_vm0, %v5025_v37 }
  0x5e   :  { %3573 = vmatmul.msk.bf16.gmra.mxu3 %vm92_vm0, %v5025_v37 }
  0x6b   :  { %3542 = vmatmul.msk.bf16.gmra.mxu0 %vm92_vm0, %v5062_v50 }
  0x6c   :  { %3546 = vmatmul.msk.bf16.gmra.mxu1 %vm92_vm0, %v5062_v50 }
  0x6d   :  { %3570 = vmatmul.msk.bf16.gmra.mxu2 %vm92_vm0, %v5062_v50 }
  0x6e   :  { %3574 = vmatmul.msk.bf16.gmra.mxu3 %vm92_vm0, %v5062_v50 }
  0x7b   :  { %3543 = vmatmul.msk.bf16.gmra.mxu0 %vm92_vm0, %v5087_v57 }
  0x7c   :  { %3547 = vmatmul.msk.bf16.gmra.mxu1 %vm92_vm0, %v5087_v57 }
  0x7d   :  { %3571 = vmatmul.msk.bf16.gmra.mxu2 %vm92_vm0, %v5087_v57 }
  0x7e   :  { %3575 = vmatmul.msk.bf16.gmra.mxu3 %vm92_vm0, %v5087_v57 }
  0x88   :  { %v114_v0 = vpop.f32.mrf.mxu0 }
  0x89   :  { %v143_v1 = vpop.f32.mrf.mxu1 }
  0x8b   :  { %3596 = vmatmul.msk.bf16.vlgmr.msra.gmra.mxu0 %vm92_vm0, %v4988_v23 }
  0x8c   :  { %3600 = vmatmul.msk.bf16.vlgmr.msra.gmra.mxu1 %vm92_vm0, %v4988_v23 }
  0x90   :  { %v197_v2 = vpop.f32.mrf.mxu2  ;;  %v5145_v4 = vpop.f32.mrf.mxu0 }
  0x91   :  { %v226_v3 = vpop.f32.mrf.mxu3  ;;  %v5147_v5 = vpop.f32.mrf.mxu1  ;;  %v263_v6 = vrot.slane %v197_v2, 1 }
  0x92   :  { %v266_v7 = vrot.slane %v226_v3, 1 }
  0x98   :  { %v5149_v8 = vpop.f32.mrf.mxu2  ;;  %v119_v11 = vpop.f32.mrf.mxu0 }
  0x99   :  { %v264_v9 = vrot.slane %v5149_v8, 1  ;;  %v5152_v10 = vpop.f32.mrf.mxu3  ;;  %v148_v13 = vpop.f32.mrf.mxu1 }
  0x9a   :  { %v267_v12 = vrot.slane %v5152_v10, 1 }
  0x9b   :  { %v265_v14 = vsel %vm262_vm1, %v263_v6, %v264_v9  ;;  %3597 = vmatmul.msk.bf16.gmra.mxu0 %vm92_vm0, %v5025_v37 }
  0x9c   :  { %v5158_v15 = vadd.f32 %v265_v14, %v119_v11  ;;  %v268_v16 = vsel %vm262_vm1, %v266_v7, %v267_v12  ;;  %3601 = vmatmul.msk.bf16.gmra.mxu1 %vm92_vm0, %v5025_v37 }
  0x9d   :  { %v5165_v17 = vadd.f32 %v268_v16, %v148_v13 }
  0xa0   :  { %v202_v18 = vpop.f32.mrf.mxu2  ;;  %v5169_v21 = vpop.f32.mrf.mxu0 }
  0xa1   :  { %v246_v19 = vadd.f32 %v202_v18, %v114_v0  ;;  %v231_v20 = vpop.f32.mrf.mxu3  ;;  %v5171_v23 = vpop.f32.mrf.mxu1 }
  0xa2   :  { %v247_v22 = vadd.f32 %v231_v20, %v143_v1 }
  0xa8   :  { %v5173_v24 = vpop.f32.mrf.mxu2  ;;  %v124_v26 = vpop.f32.mrf.mxu0 }
  0xa9   :  { %v5175_v25 = vpop.f32.mrf.mxu3  ;;  %v153_v27 = vpop.f32.mrf.mxu1 }
  0xab   :  { %3598 = vmatmul.msk.bf16.gmra.mxu0 %vm92_vm0, %v5062_v50 }
  0xac   :  { %3602 = vmatmul.msk.bf16.gmra.mxu1 %vm92_vm0, %v5062_v50 }
  0xb0   :  { %v207_v28 = vpop.f32.mrf.mxu2  ;;  %v5181_v30 = vpop.f32.mrf.mxu0 }
  0xb1   :  { %v236_v29 = vpop.f32.mrf.mxu3  ;;  %v5183_v31 = vpop.f32.mrf.mxu1  ;;  %v269_v32 = vrot.slane %v207_v28, 1  ;;  %v5254_v28 = vld [vmem:[%s6855_s3 + $0xa0] sm:$0xff] }
  0xb2   :  { %v272_v33 = vrot.slane %v236_v29, 1 }
  0xb8   :  { %v5185_v34 = vpop.f32.mrf.mxu2  ;;  %v129_v37 = vpop.f32.mrf.mxu0 }
  0xb9   :  { %v6869_v35 = vrot.slane %v5185_v34, 1  ;;  %v5188_v36 = vpop.f32.mrf.mxu3  ;;  %v158_v39 = vpop.f32.mrf.mxu1 }
  0xba   :  { %v6868_v38 = vrot.slane %v5188_v36, 1 }
  0xbb   :  { %v271_v40 = vsel %vm262_vm1, %v269_v32, %v6869_v35  ;;  %3599 = vmatmul.msk.bf16.gmra.mxu0 %vm92_vm0, %v5087_v57  ;;  %v4640_v35 = vld [vmem:[%s6855_s3 + $0x84] sm:$0xf0] }
  0xbc   :  { %v5194_v41 = vadd.f32 %v271_v40, %v129_v37  ;;  %v274_v42 = vsel %vm262_vm1, %v272_v33, %v6868_v38  ;;  %3603 = vmatmul.msk.bf16.gmra.mxu1 %vm92_vm0, %v5087_v57 }
  0xbd   :  { %v5201_v43 = vadd.f32 %v274_v42, %v158_v39 }
  0xc0   :  { %v212_v44 = vpop.f32.mrf.mxu2  ;;  %v5205_v47 = vpop.f32.mrf.mxu0 }
  0xc1   :  { %v250_v45 = vadd.f32 %v212_v44, %v124_v26  ;;  %v241_v46 = vpop.f32.mrf.mxu3  ;;  %v5207_v49 = vpop.f32.mrf.mxu1 }
  0xc2   :  { %v251_v48 = vadd.f32 %v241_v46, %v153_v27 }
  0xc8   :  { %v325_v50 = vpop.f32.mrf.mxu0  ;;  %v5225_v0 = vpop.f32.mrf.mxu2 }
  0xc9   :  { %v354_v51 = vpop.f32.mrf.mxu1  ;;  %v382_v53 = vrot.slane %v325_v50, 1  ;;  %v5227_v1 = vpop.f32.mrf.mxu3 }
  0xca   :  { %v385_v56 = vrot.slane %v354_v51, 1 }
  0xd0   :  { %v5209_v52 = vpop.f32.mrf.mxu0 }
  0xd1   :  { %v383_v54 = vrot.slane %v5209_v52, 1  ;;  %v5212_v55 = vpop.f32.mrf.mxu1  ;;  %v5249_v27 = vpop.f32.mrf.mxu3 }
  0xd2   :  { %v386_v57 = vrot.slane %v5212_v55, 1 }
  0xd3   :  { %v384_v58 = vsel %vm262_vm1, %v382_v53, %v383_v54 }
  0xd4   :  { %v5218_v59 = vadd.f32 %v384_v58, %v246_v19  ;;  %v387_v60 = vsel %vm262_vm1, %v385_v56, %v386_v57 }
  0xd5   :  { %v5223_v61 = vadd.f32 %v387_v60, %v247_v22  ;;  %v5247_v22 = vpop.f32.mrf.mxu2  ;;  %v3678_v60 = vld [vmem:[%s6855_s3 + $0x70] sm:$0xf] }
  0xd8   :  { %v330_v62 = vpop.f32.mrf.mxu0 }
  0xd9   :  { %v359_v63 = vpop.f32.mrf.mxu1  ;;  %v418_v3 = vrot.slane %v330_v62, 1  ;;  %v5269_v50 = vpop.f32.mrf.mxu3  ;;  %v4638_v62 = vld [vmem:[%s6855_s3 + $0x74] sm:$0xf0] }
  0xda   :  { %v421_v11 = vrot.slane %v359_v63, 1 }
  0xdd   :  { %v5264_v44 = vpop.f32.mrf.mxu2 }
  0xe0   :  { %v5229_v2 = vpop.f32.mrf.mxu0 }
  0xe1   :  { %v6871_v6 = vrot.slane %v5229_v2, 1  ;;  %v5232_v7 = vpop.f32.mrf.mxu1 }
  0xe2   :  { %v6870_v13 = vrot.slane %v5232_v7, 1 }
  0xe3   :  { %v420_v14 = vsel %vm262_vm1, %v418_v3, %v6871_v6  ;;  %v3679_v3 = vor.u32 %v4638_v62, %v3678_v60  ;;  %v3662_v62 = vld [vmem:[%s6855_s3 + $0x50] sm:$0xf] }
  0xe4   :  { %v5239_v16 = vadd.f32 %v420_v14, %v5158_v15  ;;  %v423_v18 = vsel %vm262_vm1, %v421_v11, %v6870_v13  ;;  %v926_v15 = vunpack.c.l.b16 %v5254_v28  ;;  %v3670_v14 = vld [vmem:[%s6855_s3 + $0x60] sm:$0xf]  ;;  %v3727_v13 = vld [vmem:[%s6855_s3 + $0xa8] sm:$0xf]  ;;  %v4644_v6 = vld [vmem:[%s6855_s3 + $0xac] sm:$0xf0] }
  0xe5   :  { %v5245_v19 = vadd.f32 %v423_v18, %v5165_v17  ;;  %v4636_v18 = vld [vmem:[%s6855_s3 + $0x64] sm:$0xf0]  ;;  %983 = vmatpush.bf16.msra.mxu2 %v3679_v3  ;;  %v4634_v3 = vld [vmem:[%s6855_s3 + $0x54] sm:$0xf0] }
  0xe6   :  { %v948_v29 = vpack.c.b16 %v926_v15, %v926_v15  ;;  %v4656_v15 = vld [vmem:[%s6855_s3 + $0x10c] sm:$0xf0] }
  0xe8   :  { %v335_v20 = vpop.f32.mrf.mxu0  ;;  %v978_v39 = vsel %vm807_vm2, %v948_v29, 0  ;;  %v3694_v29 = vld [vmem:[%s6855_s3 + $0x90] sm:$0xf] }
  0xe9   :  { %v364_v26 = vpop.f32.mrf.mxu1  ;;  %v388_v33 = vrot.slane %v335_v20, 1  ;;  %1007 = vmatpush.bf16.msra.mxu3 %v978_v39  ;;  %v3671_v20 = vor.u32 %v4636_v18, %v3670_v14  ;;  %v4642_v39 = vld [vmem:[%s6855_s3 + $0x94] sm:$0xf0]  ;;  %v3663_v14 = vor.u32 %v4634_v3, %v3662_v62  ;;  %v3759_v62 = vld [vmem:[%s6855_s3 + $0xe8] sm:$0xf] }
  0xea   :  { %v391_v40 = vrot.slane %v364_v26, 1  ;;  %v3775_v26 = vld [vmem:[%s6855_s3 + $0x108] sm:$0xf]  ;;  %v3767_v18 = vld [vmem:[%s6855_s3 + $0xf8] sm:$0xf] }
  0xeb   :  { %984 = vmatpush.bf16.msra.mxu2 %v3671_v20  ;;  %v4654_v20 = vld [vmem:[%s6855_s3 + $0xfc] sm:$0xf0] }
  0xef   :  { %985 = vmatpush.bf16.msra.mxu2 %v3663_v14 }
  0xf0   :  { %v5257_v32 = vpop.f32.mrf.mxu0 }
  0xf1   :  { %v6867_v17 = vrot.slane %v5257_v32, 1  ;;  %v5260_v37 = vpop.f32.mrf.mxu1 }
  0xf2   :  { %v6866_v42 = vrot.slane %v5260_v37, 1 }
  0xf3   :  { %v390_v46 = vsel %vm262_vm1, %v388_v33, %v6867_v17  ;;  %v3776_v33 = vor.u32 %v4656_v15, %v3775_v26 }
  0xf4   :  { %v5271_v51 = vadd.f32 %v390_v46, %v250_v45  ;;  %v393_v53 = vsel %vm262_vm1, %v391_v40, %v6866_v42  ;;  %v3783_v45 = vld [vmem:[%s6855_s3 + $0x118] sm:$0xf]  ;;  %v5308_v40 = vpop.f32.mrf.mxu2  ;;  %v3695_v46 = vor.u32 %v4642_v39, %v3694_v29  ;;  %v3768_v29 = vor.u32 %v4654_v20, %v3767_v18 }
  0xf5   :  { %v5276_v56 = vadd.f32 %v393_v53, %v251_v48  ;;  %v4658_v48 = vld [vmem:[%s6855_s3 + $0x11c] sm:$0xf0]  ;;  %v5310_v53 = vpop.f32.mrf.mxu3  ;;  %v4626_v42 = vld [vmem:[%s6855_s3 + $0x14] sm:$0xf0]  ;;  %v537_v8 = vrot.slane %v5308_v40, 1  ;;  %v249_v40 = vadd.f32 %v5175_v25, %v5147_v5  ;;  %v575_v5 = vrot.slane %v5264_v44, 2 }
  0xf6   :  { %v3784_v11 = vor.u32 %v4658_v48, %v3783_v45  ;;  %1008 = vmatpush.bf16.msra.mxu3 %v3695_v46  ;;  %v4632_v46 = vld [vmem:[%s6855_s3 + $0x44] sm:$0xf0]  ;;  %v6872_v44 = vrot.slane %v5229_v2, 1 }
  0xf8   :  { %v340_v58 = vpop.f32.mrf.mxu0  ;;  %1192 = vmatpush.bf16.msrb.mxu0 %v3784_v11 }
  0xf9   :  { %v369_v63 = vpop.f32.mrf.mxu1  ;;  %v424_v45 = vrot.slane %v340_v58, 1 }
  0xfa   :  { %v427_v26 = vrot.slane %v369_v63, 1  ;;  %v3654_v63 = vld [vmem:[%s6855_s3 + $0x40] sm:$0xf] }
  0xfb   :  { %v3655_v3 = vor.u32 %v4632_v46, %v3654_v63  ;;  %v3751_v63 = vld [vmem:[%s6855_s3 + $0xd8] sm:$0xf]  ;;  %v4650_v46 = vld [vmem:[%s6855_s3 + $0xdc] sm:$0xf0] }
  0xfc   :  { %1193 = vmatpush.bf16.msrb.mxu0 %v3776_v33  ;;  %v5354_v18 = vpop.f32.mrf.mxu2 }
  0xfd   :  { %986 = vmatpush.bf16.msra.mxu2 %v3655_v3  ;;  %v5356_v20 = vpop.f32.mrf.mxu3  ;;  %v5377_v3 = vld [vmem:[%s6855_s3 + $0x148] sm:$0xff] }
 0x100   :  { %v5312_v60 = vpop.f32.mrf.mxu0  ;;  %1194 = vmatpush.bf16.msrb.mxu0 %v3768_v29  ;;  %v3646_v29 = vld [vmem:[%s6855_s3 + $0x30] sm:$0xf] }
 0x101   :  { %v6865_v48 = vrot.slane %v5312_v60, 1  ;;  %v5321_v11 = vpop.f32.mrf.mxu1 }
 0x102   :  { %v6864_v15 = vrot.slane %v5321_v11, 1 }
 0x103   :  { %v426_v58 = vsel %vm262_vm1, %v424_v45, %v6865_v48  ;;  %v4652_v45 = vld [vmem:[%s6855_s3 + $0xec] sm:$0xf0] }
 0x104   :  { %v5334_v33 = vadd.f32 %v426_v58, %v5194_v41  ;;  %v429_v39 = vsel %vm262_vm1, %v427_v26, %v6864_v15  ;;  %v3760_v14 = vor.u32 %v4652_v45, %v3759_v62  ;;  %v3752_v62 = vor.u32 %v4650_v46, %v3751_v63  ;;  %v3630_v48 = vld [vmem:[%s6855_s3 + $0x10] sm:$0xf]  ;;  %v5400_v17 = vpop.f32.mrf.mxu2 }
 0x105   :  { %v5349_v41 = vadd.f32 %v429_v39, %v5201_v43  ;;  %v4630_v43 = vld [vmem:[%s6855_s3 + $0x34] sm:$0xf0]  ;;  %v1142_v45 = vunpack.c.l.b16 %v5377_v3 }
 0x106   :  { %1195 = vmatpush.bf16.msrb.mxu0 %v3760_v14  ;;  %v3647_v39 = vor.u32 %v4630_v43, %v3646_v29  ;;  %v3638_v14 = vld [vmem:[%s6855_s3 + $0x20] sm:$0xf]  ;;  %v4628_v29 = vld [vmem:[%s6855_s3 + $0x24] sm:$0xf0] }
 0x107   :  { %v3743_v43 = vld [vmem:[%s6855_s3 + $0xc8] sm:$0xf]  ;;  %v3639_v63 = vor.u32 %v4628_v29, %v3638_v14  ;;  %v4872_v14 = vmov 0   ;;  %v3631_v29 = vor.u32 %v4626_v42, %v3630_v48  ;;  %v4662_v42 = vld [vmem:[%s6855_s3 + $0x13c] sm:$0xf0] }
 0x108   :  { %v5358_v26 = vpop.f32.mrf.mxu0  ;;  %987 = vmatpush.bf16.msra.mxu2 %v3647_v39  ;;  %v4648_v39 = vld [vmem:[%s6855_s3 + $0xcc] sm:$0xf0]  ;;  %820 = vst.msk [vmem:[#allocation2 + $0x8] sm:$0x88] %vm819_vm5, %v4872_v14 }
 0x109   :  { %v5366_v58 = vpop.f32.mrf.mxu1  ;;  %v3744_v46 = vor.u32 %v4648_v39, %v3743_v43  ;;  %v3735_v43 = vld [vmem:[%s6855_s3 + $0xb8] sm:$0xf]  ;;  %v5410_v39 = vpop.f32.mrf.mxu3  ;;  %821 = vst.msk [vmem:[#allocation2 + $0x18] sm:$0x88] %vm819_vm5, %v4872_v14  ;;  %v3686_v14 = vld [vmem:[%s6855_s3 + $0x80] sm:$0xf] }
 0x10a   :  { %1196 = vmatpush.bf16.msrb.mxu0 %v3752_v62  ;;  %v1164_v62 = vpack.c.b16 %v1142_v45, %v1142_v45  ;;  %v696_v55 = vrot.slane %v5366_v58, 2  ;;  %vm2100_vm5 = vcmask 1041409  }
 0x10c   :  { %988 = vmatpush.bf16.msra.mxu2 %v3639_v63  ;;  %v5405_v45 = vsel %vm807_vm2, %v1164_v62, 0  ;;  %v4646_v63 = vld [vmem:[%s6855_s3 + $0xbc] sm:$0xf0]  ;;  %v3799_v62 = vld [vmem:[%s6855_s3 + $0x138] sm:$0xf] }
 0x10d   :  { %1216 = vmatpush.bf16.msrb.mxu1 %v5405_v45  ;;  %v5422_v48 = vor.u32 %v4662_v42, %v3799_v62  ;;  %v3687_v62 = vor.u32 %v4640_v35, %v3686_v14  ;;  %v4624_v42 = vld [vmem:[%s6855_s3 + $0x4] sm:$0xf0]  ;;  %v248_v35 = vadd.f32 %v5173_v24, %v5145_v4  ;;  %v578_v24 = vrot.slane %v5269_v50, 2 }
 0x10e   :  { %1197 = vmatpush.bf16.msrb.mxu0 %v3744_v46  ;;  %v3736_v46 = vor.u32 %v4646_v63, %v3735_v43  ;;  %v3622_v43 = vld [vmem:[%s6855_s3] sm:$0xf]  ;;  %v285_v63 = vadd.f32 %v264_v9, %v5169_v21  ;;  %v538_v9 = vrot.slane %v5354_v18, 1  ;;  %v3791_v21 = vld [vmem:[%s6855_s3 + $0x128] sm:$0xf] }
 0x10f   :  { %v3623_v10 = vor.u32 %v4624_v42, %v3622_v43  ;;  %1009 = vmatpush.bf16.msra.mxu3 %v3687_v62  ;;  %v577_v42 = vrot.slane %v5249_v27, 2  ;;  %v404_v4 = vadd.f32 %v383_v54, %v248_v35  ;;  %v405_v54 = vadd.f32 %v386_v57, %v249_v40 }
 0x110   :  { %v5392_v15 = vpop.f32.mrf.mxu0  ;;  %989 = vmatpush.bf16.msra.mxu2 %v3631_v29  ;;  %v286_v29 = vadd.f32 %v267_v12, %v5171_v23  ;;  %v3728_v12 = vor.u32 %v4644_v6, %v3727_v13  ;;  %v4660_v23 = vld [vmem:[%s6855_s3 + $0x12c] sm:$0xf0]  ;;  %v574_v6 = vrot.slane %v5247_v22, 2  ;;  %v540_v13 = vrot.slane %v5310_v53, 1 }
 0x111   :  { %v5402_v38 = vpop.f32.mrf.mxu1  ;;  %1217 = vmatpush.bf16.msrb.mxu1 %v5422_v48  ;;  %v5461_v18 = vor.u32 %v4660_v23, %v3791_v21  ;;  %v694_v14 = vrot.slane %v5392_v15, 2  ;;  %v5475_v22 = vld [vmem:[%s6855_s3 + $0x1f0] sm:$0xff]  ;;  %v539_v53 = vsel %vm262_vm1, %v537_v8, %v538_v9  ;;  %v693_v15 = vrot.slane %v5358_v26, 2  ;;  %v5494_v8 = vpop.f32.mrf.mxu3 }
 0x112   :  { %1198 = vmatpush.bf16.msrb.mxu0 %v3736_v46  ;;  %v541_v46 = vrot.slane %v5356_v20, 1  ;;  %v697_v27 = vrot.slane %v5402_v38, 2  ;;  %v1387_v52 = vunpack.c.l.b16 %v5475_v22  ;;  %v440_v50 = vadd.f32 %v6872_v44, %v285_v63  ;;  %v757_v38 = vld [vmem:[%s6854_s2] sm:$0x3] }
 0x113   :  { %v6873_v20 = vrot.slane %v5232_v7, 1  ;;  %v695_v57 = vsel %vm573_vm6, %v693_v15, %v694_v14  ;;  %v576_v63 = vsel %vm573_vm6, %v574_v6, %v575_v5  ;;  %v579_v7 = vsel %vm573_vm6, %v577_v42, %v578_v24 }
 0x114   :  { %990 = vmatpush.bf16.msra.mxu2 %v3623_v10  ;;  %v559_v10 = vadd.f32 %v538_v9, %v404_v4  ;;  %v542_v26 = vsel %vm262_vm1, %v540_v13, %v541_v46  ;;  %v1409_v2 = vpack.c.b16 %v1387_v52, %v1387_v52  ;;  %v560_v9 = vadd.f32 %v541_v46, %v405_v54 }
 0x115   :  { %1218 = vmatpush.bf16.msrb.mxu1 %v5461_v18  ;;  %v441_v62 = vadd.f32 %v6873_v20, %v286_v29  ;;  %v557_v29 = vadd.f32 %v539_v53, %v5218_v59  ;;  %v5501_v23 = vperm.slane %v757_v38, 0  ;;  %v698_v35 = vsel %vm573_vm6, %v696_v55, %v697_v27  ;;  %v3896_v55 = vld [vmem:[%s6855_s3 + $0x1d0] sm:$0xf] }
 0x116   :  { %1199 = vmatpush.bf16.msrb.mxu0 %v3728_v12  ;;  %v5488_v12 = vpop.f32.mrf.mxu2  ;;  %v715_v21 = vadd.f32 %v694_v14, %v559_v10  ;;  %v1432_v40 = vsel %vm807_vm2, %v1409_v2, 0  ;;  %v558_v13 = vadd.f32 %v542_v26, %v5223_v61  ;;  %v716_v4 = vadd.f32 %v697_v27, %v560_v9  ;;  %v3904_v14 = vld [vmem:[%s6855_s3 + $0x1e0] sm:$0xf]  ;;  %v4682_v61 = vld [vmem:[%s6855_s3 + $0x1e4] sm:$0xf0] }
 0x117   :  { %v713_v58 = vadd.f32 %v695_v57, %v557_v29  ;;  %v5506_v15 = vperm.slane %v757_v38, 1  ;;  %v594_v6 = vadd.f32 %v576_v63, %v5239_v16  ;;  %v596_v42 = vadd.f32 %v575_v5, %v440_v50 }
 0x118   :  { %v641_v43 = vpop.f32.mrf.mxu0  ;;  %v595_v59 = vadd.f32 %v579_v7, %v5245_v19  ;;  %v597_v46 = vadd.f32 %v578_v24, %v441_v62  ;;  %v714_v53 = vadd.f32 %v698_v35, %v558_v13  ;;  %v3905_v20 = vor.u32 %v4682_v61, %v3904_v14  ;;  %v3680_v14 = vld [vmem:[%s6855_s3 + $0x78] sm:$0xf0] }
 0x119   :  { %v670_v25 = vpop.f32.mrf.mxu1  ;;  %1461 = vmatpush.bf16.msra.mxu1 %v1432_v40  ;;  %v729_v27 = vrot.slane %v641_v43, 2  ;;  %v765_v16 = vadd.f32 %v5501_v23, %v715_v21  ;;  %v763_v19 = vadd.f32 %v5501_v23, %v713_v58  ;;  %v766_v24 = vadd.f32 %v5506_v15, %v716_v4  ;;  %v5531_v9 = vpop.f32.mrf.mxu3 }
 0x11a   :  { %v732_v5 = vrot.slane %v670_v25, 2  ;;  %v4680_v25 = vld [vmem:[%s6855_s3 + $0x1d4] sm:$0xf0]  ;;  %v764_v2 = vadd.f32 %v5506_v15, %v714_v53 }
 0x11b   :  { %v3897_v29 = vor.u32 %v4680_v25, %v3896_v55  ;;  %v773_v21 = vmax.f32 %v765_v16, 0.0  ;;  %v771_v13 = vmax.f32 %v763_v19, 0.0  ;;  %v774_v58 = vmax.f32 %v766_v24, 0.0  ;;  %v4678_v16 = vld [vmem:[%s6855_s3 + $0x1c4] sm:$0xf0] }
 0x11c   :  { %v772_v61 = vmax.f32 %v764_v2, 0.0  ;;  %v3880_v55 = vld [vmem:[%s6855_s3 + $0x1b0] sm:$0xf] }
 0x11d   :  { %1462 = vmatpush.bf16.msra.mxu1 %v3905_v20  ;;  %v3888_v20 = vld [vmem:[%s6855_s3 + $0x1c0] sm:$0xf] }
 0x11e   :  { %v5527_v57 = vpop.f32.mrf.mxu2  ;;  %v3889_v24 = vor.u32 %v4678_v16, %v3888_v20  ;;  %v546_v20 = vrot.slane %v5531_v9, 1 }
 0x120   :  { %v643_v52 = vpop.f32.mrf.mxu0  ;;  %1437 = vmatpush.bf16.msra.mxu0 %v3889_v24  ;;  %v6879_v24 = vrot.slane %v5188_v36, 1 }
 0x121   :  { %v730_v54 = vrot.slane %v643_v52, 2  ;;  %v672_v44 = vpop.f32.mrf.mxu1  ;;  %1463 = vmatpush.bf16.msra.mxu1 %v3897_v29  ;;  %v580_v29 = vrot.slane %v5400_v17, 2  ;;  %v3872_v17 = vld [vmem:[%s6855_s3 + $0x1a0] sm:$0xf] }
 0x122   :  { %v733_v50 = vrot.slane %v672_v44, 2 }
 0x123   :  { %v731_v62 = vsel %vm573_vm6, %v729_v27, %v730_v54  ;;  %v751_v10 = vadd.f32 %v730_v54, %v596_v42 }
 0x124   :  { %v749_v38 = vadd.f32 %v731_v62, %v594_v6  ;;  %v734_v26 = vsel %vm573_vm6, %v732_v5, %v733_v50  ;;  %v752_v43 = vadd.f32 %v733_v50, %v597_v46 }
 0x125   :  { %v781_v63 = vadd.f32 %v5501_v23, %v751_v10  ;;  %v750_v7 = vadd.f32 %v734_v26, %v595_v59  ;;  %v4637_v59 = vld [vmem:[%s6855_s3 + $0x74] sm:$0xf]  ;;  %v4635_v26 = vld [vmem:[%s6855_s3 + $0x64] sm:$0xf]  ;;  %v3969_v10 = vld [vmem:[%s6855_s3 + $0x238] sm:$0xf] }
 0x126   :  { %v779_v35 = vadd.f32 %v5501_v23, %v749_v38  ;;  %v782_v40 = vadd.f32 %v5506_v15, %v752_v43  ;;  %v3683_v44 = vor.u32 %v4637_v59, %v3680_v14  ;;  %v3672_v43 = vld [vmem:[%s6855_s3 + $0x68] sm:$0xf0]  ;;  %v4674_v14 = vld [vmem:[%s6855_s3 + $0x1a4] sm:$0xf0] }
 0x127   :  { %v789_v4 = vmax.f32 %v781_v63, 0.0  ;;  %v780_v6 = vadd.f32 %v5506_v15, %v750_v7  ;;  %v3675_v2 = vor.u32 %v4635_v26, %v3672_v43  ;;  %v4676_v63 = vld [vmem:[%s6855_s3 + $0x1b4] sm:$0xf0] }
 0x128   :  { %v787_v42 = vmax.f32 %v779_v35, 0.0  ;;  %v790_v52 = vmax.f32 %v782_v40, 0.0  ;;  %v5536_v46 = vpop.f32.mrf.mxu0  ;;  %1021 = vmatpush.bf16.msrb.mxu2 %v3683_v44  ;;  %v3881_v7 = vor.u32 %v4676_v63, %v3880_v55  ;;  %v5581_v35 = vpop.f32.mrf.mxu3  ;;  %v3873_v44 = vor.u32 %v4674_v14, %v3872_v17  ;;  %v4672_v26 = vld [vmem:[%s6855_s3 + $0x194] sm:$0xf0]  ;;  %v5659_v14 = vld [vmem:[%s6855_s3 + $0x94] sm:$0xf] }
 0x129   :  { %v797_v53 = vadd.f32 %v789_v4, %v773_v21  ;;  %v788_v27 = vmax.f32 %v780_v6, 0.0  ;;  %v5544_v54 = vpop.f32.mrf.mxu1  ;;  %v497_v21 = vpop.f32.mrf.mxu2  ;;  %v583_v4 = vrot.slane %v5410_v39, 2  ;;  %v581_v6 = vrot.slane %v5488_v12, 2 }
 0x12a   :  { %v795_v5 = vadd.f32 %v787_v42, %v771_v13  ;;  %v798_v50 = vadd.f32 %v790_v52, %v774_v58  ;;  %1438 = vmatpush.bf16.msra.mxu0 %v3881_v7  ;;  %v4633_v13 = vld [vmem:[%s6855_s3 + $0x54] sm:$0xf]  ;;  %v3664_v58 = vld [vmem:[%s6855_s3 + $0x58] sm:$0xf0]  ;;  %v584_v42 = vrot.slane %v5494_v8, 2  ;;  %v253_v39 = vadd.f32 %v5227_v1, %v5183_v31 }
 0x12b   :  { %v796_v62 = vadd.f32 %v788_v27, %v772_v61  ;;  %v3667_v59 = vor.u32 %v4633_v13, %v3664_v58  ;;  %v252_v61 = vadd.f32 %v5225_v0, %v5181_v30  ;;  %v544_v27 = vrot.slane %v497_v21, 1  ;;  %v4631_v31 = vld [vmem:[%s6855_s3 + $0x44] sm:$0xf]  ;;  %v3656_v1 = vld [vmem:[%s6855_s3 + $0x48] sm:$0xf0] }
 0x12c   :  { %v804_v38 = vpack.c.bf16 %v798_v50, %v797_v53  ;;  %1022 = vmatpush.bf16.msrb.mxu2 %v3675_v2  ;;  %v543_v53 = vrot.slane %v5527_v57, 1  ;;  %v547_v16 = vrot.slane %v5581_v35, 1  ;;  %v290_v30 = vadd.f32 %v6879_v24, %v5207_v49  ;;  %v5696_v24 = vld [vmem:[%s6855_s3 + $0x298] sm:$0xff] }
 0x12d   :  { %v803_v25 = vpack.c.bf16 %v796_v62, %v795_v5  ;;  %v6878_v5 = vrot.slane %v5185_v34, 1  ;;  %v6880_v0 = vrot.slane %v5257_v32, 1  ;;  %v3864_v34 = vld [vmem:[%s6855_s3 + $0x190] sm:$0xf]  ;;  %v5631_v49 = vsel %vm573_vm6, %v580_v29, %v581_v6 }
 0x12e   :  { %814 = vst.msk [vmem:[#allocation2 + $0x8] sm:$0x77] %vm5560_vm11, %v804_v38  ;;  %1439 = vmatpush.bf16.msra.mxu0 %v3873_v44  ;;  %v5636_v32 = vsel %vm573_vm6, %v583_v4, %v584_v42  ;;  %v3659_v38 = vor.u32 %v4631_v31, %v3656_v1  ;;  %v3865_v2 = vor.u32 %v4672_v26, %v3864_v34  ;;  %v699_v29 = vrot.slane %v5536_v46, 2  ;;  %v4629_v46 = vld [vmem:[%s6855_s3 + $0x34] sm:$0xf] }
 0x12f   :  { %810 = vst.msk [vmem:[#allocation2] sm:$0xff] %vm5554_vm10, %v803_v25  ;;  %v289_v50 = vadd.f32 %v6878_v5, %v5205_v47  ;;  %v408_v57 = vadd.f32 %v6880_v0, %v252_v61  ;;  %v6881_v47 = vrot.slane %v5260_v37, 1  ;;  %v545_v37 = vsel %vm262_vm1, %v543_v53, %v544_v27  ;;  %v4627_v5 = vld [vmem:[%s6855_s3 + $0x24] sm:$0xf]  ;;  %v3848_v31 = vld [vmem:[%s6855_s3 + $0x170] sm:$0xf] }
 0x130   :  { %v5583_v40 = vpop.f32.mrf.mxu0  ;;  %1023 = vmatpush.bf16.msrb.mxu2 %v3667_v59  ;;  %v6882_v35 = vrot.slane %v5312_v60, 1  ;;  %v6883_v58 = vrot.slane %v5321_v11, 1  ;;  %v3648_v60 = vld [vmem:[%s6855_s3 + $0x38] sm:$0xf0]  ;;  %v561_v11 = vadd.f32 %v545_v37, %v5271_v51  ;;  %v4670_v51 = vld [vmem:[%s6855_s3 + $0x184] sm:$0xf0]  ;;  %v1632_v34 = vunpack.c.l.b16 %v5696_v24 }
 0x131   :  { %v5597_v52 = vpop.f32.mrf.mxu1  ;;  %v409_v36 = vadd.f32 %v6881_v47, %v253_v39  ;;  %v700_v25 = vrot.slane %v5583_v40, 2  ;;  %v563_v4 = vadd.f32 %v544_v27, %v408_v57  ;;  %v927_v40 = vunpack.c.h.b16 %v5254_v28  ;;  %v3696_v28 = vld [vmem:[%s6855_s3 + $0x98] sm:$0xf0]  ;;  %v3856_v27 = vld [vmem:[%s6855_s3 + $0x180] sm:$0xf] }
 0x132   :  { %v703_v21 = vrot.slane %v5597_v52, 2  ;;  %v444_v13 = vadd.f32 %v6882_v35, %v289_v50  ;;  %v445_v17 = vadd.f32 %v6883_v58, %v290_v30  ;;  %1440 = vmatpush.bf16.msra.mxu0 %v3865_v2  ;;  %v548_v52 = vsel %vm262_vm1, %v546_v20, %v547_v16  ;;  %v3640_v50 = vld [vmem:[%s6855_s3 + $0x28] sm:$0xf0]  ;;  %v4668_v1 = vld [vmem:[%s6855_s3 + $0x174] sm:$0xf0] }
 0x133   :  { %v3651_v53 = vor.u32 %v4629_v46, %v3648_v60  ;;  %v701_v44 = vsel %vm573_vm6, %v699_v29, %v700_v25  ;;  %v949_v39 = vpack.c.b16 %v927_v40, %v927_v40  ;;  %v3857_v20 = vor.u32 %v4670_v51, %v3856_v27  ;;  %v3688_v26 = vld [vmem:[%s6855_s3 + $0x88] sm:$0xf0]  ;;  %v4625_v37 = vld [vmem:[%s6855_s3 + $0x14] sm:$0xf]  ;;  %v4009_v58 = vld [vmem:[%s6855_s3 + $0x288] sm:$0xf] }
 0x134   :  { %1024 = vmatpush.bf16.msrb.mxu2 %v3659_v38  ;;  %v702_v30 = vrot.slane %v5544_v54, 2  ;;  %v719_v0 = vadd.f32 %v700_v25, %v563_v4  ;;  %v3643_v57 = vor.u32 %v4627_v5, %v3640_v50  ;;  %v564_v47 = vadd.f32 %v547_v16, %v409_v36  ;;  %v4639_v38 = vld [vmem:[%s6855_s3 + $0x84] sm:$0xf]  ;;  %v4666_v25 = vld [vmem:[%s6855_s3 + $0x164] sm:$0xf0] }
 0x135   :  { %v3608_v9 = vld [vmem:[#allocation2 + $0x8] sm:$0xf0]  ;;  %v4620_v62 = vld [vmem:[#allocation2 + $0x4] sm:$0xf0]  ;;  %v3849_v54 = vor.u32 %v4668_v1, %v3848_v31  ;;  %v717_v16 = vadd.f32 %v701_v44, %v561_v11  ;;  %v1654_v36 = vpack.c.b16 %v1632_v34, %v1632_v34  ;;  %v562_v2 = vadd.f32 %v548_v52, %v5276_v56  ;;  %v4702_v4 = vld [vmem:[%s6855_s3 + $0x28c] sm:$0xf0] }
 0x136   :  { %v4619_v43 = vld [vmem:[#allocation2 + $0x4] sm:$0xf]  ;;  %v3606_v55 = vld [vmem:[#allocation2] sm:$0xf]  ;;  %1441 = vmatpush.bf16.msra.mxu0 %v3857_v20  ;;  %v704_v12 = vsel %vm573_vm6, %v702_v30, %v703_v21  ;;  %v720_v29 = vadd.f32 %v703_v21, %v564_v47  ;;  %v598_v35 = vadd.f32 %v5631_v49, %v5334_v33  ;;  %v769_v56 = vadd.f32 %v5501_v23, %v719_v0  ;;  %v3624_v49 = vld [vmem:[%s6855_s3 + $0x8] sm:$0xf0] }
 0x137   :  { %v5643_v63 = vor.u32 %v4620_v62, %v3606_v55  ;;  %v5645_v7 = vor.u32 %v4619_v43, %v3608_v9  ;;  %v600_v9 = vadd.f32 %v581_v6, %v444_v13  ;;  %v981_v62 = vsel %vm807_vm2, %v949_v39, 0  ;;  %v3632_v43 = vld [vmem:[%s6855_s3 + $0x18] sm:$0xf0]  ;;  %v3840_v55 = vld [vmem:[%s6855_s3 + $0x160] sm:$0xf] }
 0x138   :  { %v5653_v59 = vpop.f32.mrf.mxu0  ;;  %1025 = vmatpush.bf16.msrb.mxu2 %v3651_v53  ;;  %1045 = vmatpush.bf16.msrb.mxu3 %v981_v62  ;;  %v3699_v6 = vor.u32 %v5659_v14, %v3696_v28  ;;  %v601_v13 = vadd.f32 %v584_v42, %v445_v17  ;;  %v4623_v40 = vld [vmem:[%s6855_s3 + $0x4] sm:$0xf]  ;;  %v599_v33 = vadd.f32 %v5636_v32, %v5349_v41  ;;  %v1677_v8 = vsel %vm807_vm2, %v1654_v36, 0  ;;  %v3832_v21 = vld [vmem:[%s6855_s3 + $0x150] sm:$0xf] }
 0x139   :  { %v5669_v61 = vpop.f32.mrf.mxu1  ;;  %991 = vmatmul.bf16.vlgmr.msra.gmra.mxu2 %v5643_v63  ;;  %3700 = vmatmul.msk.bf16.vlgmr.msra.gmra.mxu3 %vm970_vm12, %v5645_v7  ;;  %v3635_v42 = vor.u32 %v4625_v37, %v3632_v43  ;;  %v718_v17 = vadd.f32 %v704_v12, %v562_v2  ;;  %v3841_v46 = vor.u32 %v4666_v25, %v3840_v55  ;;  %v4664_v41 = vld [vmem:[%s6855_s3 + $0x154] sm:$0xf0]  ;;  %v4700_v11 = vld [vmem:[%s6855_s3 + $0x27c] sm:$0xf0]  ;;  %v735_v28 = vrot.slane %v5653_v59, 2 }
 0x13a   :  { %1200 = vmatmul.bf16.vlgmr.msrb.gmra.mxu0 %v5643_v63  ;;  %3805 = vmatmul.msk.bf16.vlgmr.msrb.gmra.mxu1 %vm970_vm12, %v5645_v7  ;;  %v4010_v60 = vor.u32 %v4702_v4, %v4009_v58  ;;  %v4001_v32 = vld [vmem:[%s6855_s3 + $0x278] sm:$0xf]  ;;  %v767_v52 = vadd.f32 %v5501_v23, %v717_v16  ;;  %v3691_v51 = vor.u32 %v4639_v38, %v3688_v26  ;;  %v738_v39 = vrot.slane %v5669_v61, 2  ;;  %v4657_v36 = vld [vmem:[%s6855_s3 + $0x11c] sm:$0xf] }
 0x13b   :  { %1442 = vmatpush.bf16.msra.mxu0 %v3849_v54  ;;  %1706 = vmatpush.bf16.msrb.mxu1 %v1677_v8  ;;  %v770_v44 = vadd.f32 %v5506_v15, %v720_v29  ;;  %v3627_v5 = vor.u32 %v4623_v40, %v3624_v49  ;;  %v3833_v0 = vor.u32 %v4664_v41, %v3832_v21  ;;  %v777_v61 = vmax.f32 %v769_v56, 0.0  ;;  %v4698_v2 = vld [vmem:[%s6855_s3 + $0x26c] sm:$0xf0]  ;;  %v4655_v58 = vld [vmem:[%s6855_s3 + $0x10c] sm:$0xf] }
 0x13c   :  { %1026 = vmatpush.bf16.msrb.mxu2 %v3643_v57  ;;  %1046 = vmatpush.bf16.msrb.mxu3 %v3699_v6  ;;  %v4002_v57 = vor.u32 %v4700_v11, %v4001_v32  ;;  %v768_v34 = vadd.f32 %v5506_v15, %v718_v17  ;;  %v775_v38 = vmax.f32 %v767_v52, 0.0  ;;  %v3777_v4 = vld [vmem:[%s6855_s3 + $0x110] sm:$0xf0]  ;;  %v3985_v40 = vld [vmem:[%s6855_s3 + $0x258] sm:$0xf] }
 0x13d   :  { %v778_v26 = vmax.f32 %v770_v44, 0.0  ;;  %v4696_v8 = vld [vmem:[%s6855_s3 + $0x25c] sm:$0xf0]  ;;  %v4653_v21 = vld [vmem:[%s6855_s3 + $0xfc] sm:$0xf] }
 0x13e   :  { %v776_v43 = vmax.f32 %v768_v34, 0.0  ;;  %v3986_v49 = vor.u32 %v4696_v8, %v3985_v40  ;;  %v3769_v17 = vld [vmem:[%s6855_s3 + $0x100] sm:$0xf0]  ;;  %v4651_v32 = vld [vmem:[%s6855_s3 + $0xec] sm:$0xf]  ;;  %v1143_v8 = vunpack.c.h.b16 %v5377_v3 }
 0x13f   :  { %1443 = vmatpush.bf16.msra.mxu0 %v3841_v46  ;;  %1707 = vmatpush.bf16.msrb.mxu1 %v4010_v60  ;;  %v4694_v46 = vld [vmem:[%s6855_s3 + $0x24c] sm:$0xf0]  ;;  %v3772_v60 = vor.u32 %v4653_v21, %v3769_v17  ;;  %v3761_v11 = vld [vmem:[%s6855_s3 + $0xf0] sm:$0xf0]  ;;  %v3953_v34 = vld [vmem:[%s6855_s3 + $0x218] sm:$0xf] }
 0x140   :  { %v653_v14 = vpop.f32.mrf.mxu0  ;;  %1027 = vmatpush.bf16.msrb.mxu2 %v3635_v42  ;;  %1047 = vmatpush.bf16.msrb.mxu3 %v3691_v51  ;;  %v3764_v19 = vor.u32 %v4651_v32, %v3761_v11  ;;  %v4677_v40 = vld [vmem:[%s6855_s3 + $0x1c4] sm:$0xf]  ;;  %v4675_v17 = vld [vmem:[%s6855_s3 + $0x1b4] sm:$0xf]  ;;  %v4090_v3 = vld [vmem:[%s6855_s3 + $0x300] sm:$0xf] }
 0x141   :  { %v736_v53 = vrot.slane %v653_v14, 2  ;;  %v682_v27 = vpop.f32.mrf.mxu1  ;;  %v3801_v32 = vld [vmem:[%s6855_s3 + $0x140] sm:$0xf0] }
 0x142   :  { %v739_v20 = vrot.slane %v682_v27, 2 }
 0x143   :  { %v737_v50 = vsel %vm573_vm6, %v735_v28, %v736_v53  ;;  %v755_v30 = vadd.f32 %v736_v53, %v600_v9  ;;  %1444 = vmatpush.bf16.msra.mxu0 %v3833_v0  ;;  %1708 = vmatpush.bf16.msrb.mxu1 %v4002_v57  ;;  %v4690_v0 = vld [vmem:[%s6855_s3 + $0x22c] sm:$0xf0]  ;;  %v5852_v57 = vld [vmem:[%s6855_s3 + $0x340] sm:$0xff] }
 0x144   :  { %v753_v31 = vadd.f32 %v737_v50, %v598_v35  ;;  %v740_v1 = vsel %vm573_vm6, %v738_v39, %v739_v20  ;;  %v756_v59 = vadd.f32 %v739_v20, %v601_v13  ;;  %4835 = vmatpush.bf16.msra.mxu3 %v5405_v45  ;;  %1028 = vmatpush.bf16.msrb.mxu2 %v3627_v5  ;;  %v4649_v20 = vld [vmem:[%s6855_s3 + $0xdc] sm:$0xf]  ;;  %v3753_v5 = vld [vmem:[%s6855_s3 + $0xe0] sm:$0xf0]  ;;  %v3961_v50 = vld [vmem:[%s6855_s3 + $0x228] sm:$0xf] }
 0x145   :  { %v785_v47 = vadd.f32 %v5501_v23, %v755_v30  ;;  %v754_v62 = vadd.f32 %v740_v1, %v599_v33  ;;  %v3780_v33 = vor.u32 %v4655_v58, %v3777_v4  ;;  %v3756_v30 = vor.u32 %v4649_v20, %v3753_v5  ;;  %v4647_v1 = vld [vmem:[%s6855_s3 + $0xcc] sm:$0xf]  ;;  %v3793_v20 = vld [vmem:[%s6855_s3 + $0x130] sm:$0xf0] }
 0x146   :  { %v783_v54 = vadd.f32 %v5501_v23, %v753_v31  ;;  %v786_v9 = vadd.f32 %v5506_v15, %v756_v59  ;;  %v3785_v23 = vld [vmem:[%s6855_s3 + $0x120] sm:$0xf0]  ;;  %v3962_v31 = vor.u32 %v4690_v0, %v3961_v50  ;;  %v3745_v59 = vld [vmem:[%s6855_s3 + $0xd0] sm:$0xf0]  ;;  %v4074_v0 = vld [vmem:[%s6855_s3 + $0x2e0] sm:$0xf] }
 0x147   :  { %v793_v37 = vmax.f32 %v785_v47, 0.0  ;;  %v784_v16 = vadd.f32 %v5506_v15, %v754_v62  ;;  %v3788_v25 = vor.u32 %v4657_v36, %v3785_v23  ;;  %v3993_v15 = vld [vmem:[%s6855_s3 + $0x268] sm:$0xf]  ;;  %v1878_v47 = vunpack.c.l.b16 %v5852_v57  ;;  %v4671_v50 = vld [vmem:[%s6855_s3 + $0x194] sm:$0xf] }
 0x148   :  { %v791_v12 = vmax.f32 %v783_v54, 0.0  ;;  %v794_v6 = vmax.f32 %v786_v9, 0.0  ;;  %v3994_v13 = vor.u32 %v4698_v2, %v3993_v15  ;;  %4836 = vmatpush.bf16.msra.mxu3 %v5422_v48  ;;  %v3977_v48 = vld [vmem:[%s6855_s3 + $0x248] sm:$0xf]  ;;  %v3748_v62 = vor.u32 %v4647_v1, %v3745_v59  ;;  %v4106_v15 = vld [vmem:[%s6855_s3 + $0x320] sm:$0xf] }
 0x149   :  { %v801_v45 = vadd.f32 %v793_v37, %v777_v61  ;;  %v792_v55 = vmax.f32 %v784_v16, 0.0  ;;  %1230 = vmatpush.bf16.msra.mxu2 %v3788_v25  ;;  %v3978_v41 = vor.u32 %v4694_v46, %v3977_v48  ;;  %v4688_v61 = vld [vmem:[%s6855_s3 + $0x21c] sm:$0xf0]  ;;  %v1900_v9 = vpack.c.b16 %v1878_v47, %v1878_v47  ;;  %v4114_v37 = vld [vmem:[%s6855_s3 + $0x330] sm:$0xf] }
 0x14a   :  { %v799_v29 = vadd.f32 %v791_v12, %v775_v38  ;;  %v802_v35 = vadd.f32 %v794_v6, %v778_v26  ;;  %3910 = vmatmul.msk.bf16.vlgmr.msra.gmra.mxu1 %vm970_vm12, %v5645_v7  ;;  %1682 = vmatpush.bf16.msrb.mxu0 %v3994_v13  ;;  %v3954_v54 = vor.u32 %v4688_v61, %v3953_v34  ;;  %v4645_v38 = vld [vmem:[%s6855_s3 + $0xbc] sm:$0xf]  ;;  %v3737_v26 = vld [vmem:[%s6855_s3 + $0xc0] sm:$0xf0]  ;;  %v3945_v16 = vld [vmem:[%s6855_s3 + $0x208] sm:$0xf] }
 0x14b   :  { %v800_v56 = vadd.f32 %v792_v55, %v776_v43  ;;  %v4686_v12 = vld [vmem:[%s6855_s3 + $0x20c] sm:$0xf0]  ;;  %v4722_v6 = vld [vmem:[%s6855_s3 + $0x334] sm:$0xf0]  ;;  %v1923_v36 = vsel %vm807_vm2, %v1900_v9, 0  ;;  %v3740_v23 = vor.u32 %v4645_v38, %v3737_v26  ;;  %v1165_v48 = vpack.c.b16 %v1143_v8, %v1143_v8 }
 0x14c   :  { %v806_v42 = vpack.c.bf16 %v802_v35, %v801_v45  ;;  %4837 = vmatpush.bf16.msra.mxu3 %v5461_v18  ;;  %v4692_v18 = vld [vmem:[%s6855_s3 + $0x23c] sm:$0xf0]  ;;  %1952 = vmatpush.bf16.msra.mxu1 %v1923_v36  ;;  %v4115_v43 = vor.u32 %v4722_v6, %v4114_v37  ;;  %v4643_v45 = vld [vmem:[%s6855_s3 + $0xac] sm:$0xf]  ;;  %v3946_v55 = vor.u32 %v4686_v12, %v3945_v16  ;;  %v3729_v25 = vld [vmem:[%s6855_s3 + $0xb0] sm:$0xf0] }
 0x14d   :  { %v805_v14 = vpack.c.bf16 %v800_v56, %v799_v29  ;;  %1231 = vmatpush.bf16.msra.mxu2 %v3780_v33  ;;  %v3970_v52 = vor.u32 %v4692_v18, %v3969_v10  ;;  %v4720_v2 = vld [vmem:[%s6855_s3 + $0x324] sm:$0xf0]  ;;  %v3937_v29 = vld [vmem:[%s6855_s3 + $0x1f8] sm:$0xf]  ;;  %v4684_v35 = vld [vmem:[%s6855_s3 + $0x1fc] sm:$0xf0]  ;;  %v3732_v13 = vor.u32 %v4643_v45, %v3729_v25  ;;  %v1388_v25 = vunpack.c.h.b16 %v5475_v22 }
 0x14e   :  { %816 = vst.msk [vmem:[#allocation2 + $0x18] sm:$0x77] %vm5560_vm11, %v806_v42  ;;  %1683 = vmatpush.bf16.msrb.mxu0 %v3986_v49  ;;  %v4107_v58 = vor.u32 %v4720_v2, %v4106_v15  ;;  %v3938_v4 = vor.u32 %v4684_v35, %v3937_v29  ;;  %v3890_v56 = vld [vmem:[%s6855_s3 + $0x1c8] sm:$0xf0]  ;;  %v4098_v33 = vld [vmem:[%s6855_s3 + $0x310] sm:$0xf] }
 0x14f   :  { %815 = vst.msk [vmem:[#allocation2 + $0x10] sm:$0xff] %vm5554_vm10, %v805_v14  ;;  %v3893_v42 = vor.u32 %v4677_v40, %v3890_v56  ;;  %v4718_v49 = vld [vmem:[%s6855_s3 + $0x314] sm:$0xf0]  ;;  %v3882_v14 = vld [vmem:[%s6855_s3 + $0x1b8] sm:$0xf0] }
 0x150   :  { %1953 = vmatpush.bf16.msra.mxu1 %v4115_v43  ;;  %v4099_v21 = vor.u32 %v4718_v49, %v4098_v33  ;;  %v3885_v46 = vor.u32 %v4675_v17, %v3882_v14  ;;  %v4673_v10 = vld [vmem:[%s6855_s3 + $0x1a4] sm:$0xf]  ;;  %v3874_v18 = vld [vmem:[%s6855_s3 + $0x1a8] sm:$0xf0]  ;;  %v4066_v61 = vld [vmem:[%s6855_s3 + $0x2d0] sm:$0xf] }
 0x151   :  { %1232 = vmatpush.bf16.msra.mxu2 %v3772_v60  ;;  %v4716_v60 = vld [vmem:[%s6855_s3 + $0x304] sm:$0xf0]  ;;  %v4669_v47 = vld [vmem:[%s6855_s3 + $0x184] sm:$0xf]  ;;  %v4710_v9 = vld [vmem:[%s6855_s3 + $0x2d4] sm:$0xf0] }
 0x152   :  { %1684 = vmatpush.bf16.msrb.mxu0 %v3978_v41  ;;  %v4661_v41 = vld [vmem:[%s6855_s3 + $0x13c] sm:$0xf]  ;;  %v4091_v11 = vor.u32 %v4716_v60, %v4090_v3  ;;  %v4067_v38 = vor.u32 %v4710_v9, %v4066_v61  ;;  %v4667_v26 = vld [vmem:[%s6855_s3 + $0x174] sm:$0xf]  ;;  %v4058_v16 = vld [vmem:[%s6855_s3 + $0x2c0] sm:$0xf] }
 0x153   :  { %v3850_v37 = vld [vmem:[%s6855_s3 + $0x178] sm:$0xf0]  ;;  %v4708_v6 = vld [vmem:[%s6855_s3 + $0x2c4] sm:$0xf0]  ;;  %v3842_v43 = vld [vmem:[%s6855_s3 + $0x168] sm:$0xf0] }
 0x154   :  { %1954 = vmatpush.bf16.msra.mxu1 %v4107_v58  ;;  %v3853_v12 = vor.u32 %v4667_v26, %v3850_v37  ;;  %v4059_v36 = vor.u32 %v4708_v6, %v4058_v16  ;;  %v4050_v45 = vld [vmem:[%s6855_s3 + $0x2b0] sm:$0xf]  ;;  %v4663_v29 = vld [vmem:[%s6855_s3 + $0x154] sm:$0xf]  ;;  %v3834_v35 = vld [vmem:[%s6855_s3 + $0x158] sm:$0xf0]  ;;  %v1410_v58 = vpack.c.b16 %v1388_v25, %v1388_v25 }
 0x155   :  { %v3616_v28 = vld [vmem:[#allocation2 + $0x18] sm:$0xf0]  ;;  %v4622_v53 = vld [vmem:[#allocation2 + $0x14] sm:$0xf0]  ;;  %1233 = vmatpush.bf16.msra.mxu2 %v3764_v19  ;;  %v1190_v19 = vsel %vm807_vm2, %v1165_v48, 0 }
 0x156   :  { %v4621_v27 = vld [vmem:[#allocation2 + $0x14] sm:$0xf]  ;;  %v3614_v51 = vld [vmem:[#allocation2 + $0x10] sm:$0xf]  ;;  %1685 = vmatpush.bf16.msrb.mxu0 %v3970_v52  ;;  %v4704_v22 = vld [vmem:[%s6855_s3 + $0x2a4] sm:$0xf0] }
 0x157   :  { %v5830_v44 = vor.u32 %v4622_v53, %v3614_v51  ;;  %v5832_v39 = vor.u32 %v4621_v27, %v3616_v28  ;;  %v4082_v52 = vld [vmem:[%s6855_s3 + $0x2f0] sm:$0xf]  ;;  %v4714_v28 = vld [vmem:[%s6855_s3 + $0x2f4] sm:$0xf0]  ;;  %v3804_v53 = vor.u32 %v4661_v41, %v3801_v32  ;;  %v3877_v27 = vor.u32 %v4673_v10, %v3874_v18  ;;  %v4659_v51 = vld [vmem:[%s6855_s3 + $0x12c] sm:$0xf] }
 0x158   :  { %v4083_v5 = vor.u32 %v4714_v28, %v4082_v52  ;;  %v3796_v1 = vor.u32 %v4659_v51, %v3793_v20  ;;  %v1435_v56 = vsel %vm807_vm2, %v1410_v58, 0  ;;  %v4681_v33 = vld [vmem:[%s6855_s3 + $0x1e4] sm:$0xf]  ;;  %v3906_v8 = vld [vmem:[%s6855_s3 + $0x1e8] sm:$0xf0]  ;;  %v1633_v51 = vunpack.c.h.b16 %v5696_v24 }
 0x159   :  { %996 = vmatmul.bf16.gmra.mxu2 %v5830_v44  ;;  %3701 = vmatmul.msk.bf16.gmra.mxu3 %vm970_vm12, %v5832_v39  ;;  %v3995_v49 = vld [vmem:[%s6855_s3 + $0x270] sm:$0xf0]  ;;  %v4695_v17 = vld [vmem:[%s6855_s3 + $0x25c] sm:$0xf]  ;;  %v3987_v14 = vld [vmem:[%s6855_s3 + $0x260] sm:$0xf0]  ;;  %v3909_v3 = vor.u32 %v4681_v33, %v3906_v8 }
 0x15a   :  { %1205 = vmatmul.bf16.gmra.mxu0 %v5830_v44  ;;  %3911 = vmatmul.msk.bf16.gmra.mxu1 %vm970_vm12, %v5832_v39  ;;  %v3990_v48 = vor.u32 %v4695_v17, %v3987_v14  ;;  %v3898_v60 = vld [vmem:[%s6855_s3 + $0x1d8] sm:$0xf0]  ;;  %v4693_v41 = vld [vmem:[%s6855_s3 + $0x24c] sm:$0xf]  ;;  %v3979_v32 = vld [vmem:[%s6855_s3 + $0x250] sm:$0xf0]  ;;  %v1655_v20 = vpack.c.b16 %v1633_v51, %v1633_v51 }
 0x15b   :  { %1234 = vmatpush.bf16.msra.mxu2 %v3756_v30  ;;  %1686 = vmatpush.bf16.msrb.mxu0 %v3962_v31  ;;  %v3866_v30 = vld [vmem:[%s6855_s3 + $0x198] sm:$0xf0]  ;;  %v4712_v31 = vld [vmem:[%s6855_s3 + $0x2e4] sm:$0xf0]  ;;  %v3982_v10 = vor.u32 %v4693_v41, %v3979_v32  ;;  %v4689_v28 = vld [vmem:[%s6855_s3 + $0x22c] sm:$0xf] }
 0x15c   :  { %v3869_v59 = vor.u32 %v4671_v50, %v3866_v30  ;;  %v4075_v34 = vor.u32 %v4712_v31, %v4074_v0  ;;  %v4691_v18 = vld [vmem:[%s6855_s3 + $0x23c] sm:$0xf]  ;;  %v3955_v50 = vld [vmem:[%s6855_s3 + $0x220] sm:$0xf0]  ;;  %v1680_v0 = vsel %vm807_vm2, %v1655_v20, 0 }
 0x15d   :  { %v4685_v31 = vld [vmem:[%s6855_s3 + $0x20c] sm:$0xf]  ;;  %v3947_v24 = vld [vmem:[%s6855_s3 + $0x210] sm:$0xf0]  ;;  %v4715_v37 = vld [vmem:[%s6855_s3 + $0x304] sm:$0xf] }
 0x15e   :  { %v4011_v61 = vld [vmem:[%s6855_s3 + $0x290] sm:$0xf0]  ;;  %v4092_v16 = vld [vmem:[%s6855_s3 + $0x308] sm:$0xf0]  ;;  %v4699_v6 = vld [vmem:[%s6855_s3 + $0x27c] sm:$0xf] }
 0x15f   :  { %1235 = vmatpush.bf16.msra.mxu2 %v3748_v62  ;;  %1687 = vmatpush.bf16.msrb.mxu0 %v3954_v54  ;;  %v3858_v62 = vld [vmem:[%s6855_s3 + $0x188] sm:$0xf0]  ;;  %v4717_v9 = vld [vmem:[%s6855_s3 + $0x314] sm:$0xf]  ;;  %v4711_v25 = vld [vmem:[%s6855_s3 + $0x2e4] sm:$0xf] }
 0x160   :  { %v3861_v54 = vor.u32 %v4669_v47, %v3858_v62  ;;  %v4701_v62 = vld [vmem:[%s6855_s3 + $0x28c] sm:$0xf]  ;;  %v4068_v58 = vld [vmem:[%s6855_s3 + $0x2d8] sm:$0xf0] }
 0x163   :  { %1236 = vmatpush.bf16.msra.mxu2 %v3740_v23  ;;  %1688 = vmatpush.bf16.msrb.mxu0 %v3946_v55  ;;  %v4665_v23 = vld [vmem:[%s6855_s3 + $0x164] sm:$0xf]  ;;  %v4706_v55 = vld [vmem:[%s6855_s3 + $0x2b4] sm:$0xf0] }
 0x164   :  { %v3845_v15 = vor.u32 %v4665_v23, %v3842_v43  ;;  %v4051_v2 = vor.u32 %v4706_v55, %v4050_v45  ;;  %v4713_v23 = vld [vmem:[%s6855_s3 + $0x2f4] sm:$0xf]  ;;  %v4084_v45 = vld [vmem:[%s6855_s3 + $0x2f8] sm:$0xf0] }
 0x165   :  { %v4087_v55 = vor.u32 %v4713_v23, %v4084_v45 }
 0x167   :  { %1237 = vmatpush.bf16.msra.mxu2 %v3732_v13  ;;  %1689 = vmatpush.bf16.msrb.mxu0 %v3938_v4  ;;  %v4042_v13 = vld [vmem:[%s6855_s3 + $0x2a0] sm:$0xf]  ;;  %v3837_v4 = vor.u32 %v4663_v29, %v3834_v35 }
 0x168   :  { %v4043_v40 = vor.u32 %v4704_v22, %v4042_v13  ;;  %v4709_v22 = vld [vmem:[%s6855_s3 + $0x2d4] sm:$0xf] }
 0x169   :  { %1029 = vmatmul.bf16.vlgmr.msrb.gmra.mxu2 %v5643_v63  ;;  %3702 = vmatmul.msk.bf16.vlgmr.msrb.gmra.mxu3 %vm970_vm12, %v5645_v7 }
 0x16a   :  { %1445 = vmatmul.bf16.vlgmr.msra.gmra.mxu0 %v5643_v63  ;;  %4015 = vmatmul.msk.bf16.vlgmr.msrb.gmra.mxu1 %vm970_vm12, %v5645_v7 }
 0x16b   :  { %1475 = vmatpush.bf16.msrb.mxu2 %v3893_v42  ;;  %1928 = vmatpush.bf16.msra.mxu0 %v4099_v21  ;;  %v4697_v42 = vld [vmem:[%s6855_s3 + $0x26c] sm:$0xf] }
 0x16c   :  { %1254 = vmatpush.bf16.msrb.mxu3 %v1190_v19  ;;  %v3998_v21 = vor.u32 %v4697_v42, %v3995_v49  ;;  %v3971_v19 = vld [vmem:[%s6855_s3 + $0x240] sm:$0xf0]  ;;  %v4060_v49 = vld [vmem:[%s6855_s3 + $0x2c8] sm:$0xf0] }
 0x16d   :  { %v3974_v52 = vor.u32 %v4691_v18, %v3971_v19  ;;  %v4707_v42 = vld [vmem:[%s6855_s3 + $0x2c4] sm:$0xf]  ;;  %v4044_v19 = vld [vmem:[%s6855_s3 + $0x2a8] sm:$0xf0] }
 0x16e   :  { %v4063_v14 = vor.u32 %v4707_v42, %v4060_v49  ;;  %v4703_v18 = vld [vmem:[%s6855_s3 + $0x2a4] sm:$0xf] }
 0x16f   :  { %1476 = vmatpush.bf16.msrb.mxu2 %v3885_v46  ;;  %1929 = vmatpush.bf16.msra.mxu0 %v4091_v11  ;;  %v4679_v46 = vld [vmem:[%s6855_s3 + $0x1d4] sm:$0xf] }
 0x170   :  { %1255 = vmatpush.bf16.msrb.mxu3 %v3804_v53  ;;  %v3901_v11 = vor.u32 %v4679_v46, %v3898_v60  ;;  %v3963_v53 = vld [vmem:[%s6855_s3 + $0x230] sm:$0xf0]  ;;  %v4052_v46 = vld [vmem:[%s6855_s3 + $0x2b8] sm:$0xf0] }
 0x173   :  { %1477 = vmatpush.bf16.msrb.mxu2 %v3877_v27  ;;  %1930 = vmatpush.bf16.msra.mxu0 %v4083_v5  ;;  %v3966_v27 = vor.u32 %v4689_v28, %v3963_v53  ;;  %v4687_v5 = vld [vmem:[%s6855_s3 + $0x21c] sm:$0xf]  ;;  %v4721_v28 = vld [vmem:[%s6855_s3 + $0x334] sm:$0xf] }
 0x174   :  { %1256 = vmatpush.bf16.msrb.mxu3 %v3796_v1  ;;  %v3958_v30 = vor.u32 %v4687_v5, %v3955_v50  ;;  %v3950_v1 = vor.u32 %v4685_v31, %v3947_v24  ;;  %v4116_v53 = vld [vmem:[%s6855_s3 + $0x338] sm:$0xf0]  ;;  %v4719_v50 = vld [vmem:[%s6855_s3 + $0x324] sm:$0xf] }
 0x175   :  { %v4119_v51 = vor.u32 %v4721_v28, %v4116_v53 }
 0x177   :  { %1478 = vmatpush.bf16.msrb.mxu2 %v3869_v59  ;;  %1931 = vmatpush.bf16.msra.mxu0 %v4075_v34  ;;  %v4683_v59 = vld [vmem:[%s6855_s3 + $0x1fc] sm:$0xf]  ;;  %v3939_v34 = vld [vmem:[%s6855_s3 + $0x200] sm:$0xf0] }
 0x178   :  { %v3942_v47 = vor.u32 %v4683_v59, %v3939_v34 }
 0x179   :  { %1034 = vmatmul.bf16.gmra.mxu2 %v5830_v44  ;;  %3703 = vmatmul.msk.bf16.gmra.mxu3 %vm970_vm12, %v5832_v39 }
 0x17a   :  { %1450 = vmatmul.bf16.gmra.mxu0 %v5830_v44  ;;  %4016 = vmatmul.msk.bf16.gmra.mxu1 %vm970_vm12, %v5832_v39 }
 0x17b   :  { %1479 = vmatpush.bf16.msrb.mxu2 %v3861_v54  ;;  %1932 = vmatpush.bf16.msra.mxu0 %v4067_v38  ;;  %v4014_v54 = vor.u32 %v4701_v62, %v4011_v61  ;;  %v4100_v38 = vld [vmem:[%s6855_s3 + $0x318] sm:$0xf0] }
 0x17c   :  { %v4103_v26 = vor.u32 %v4717_v9, %v4100_v38 }
 0x17f   :  { %1480 = vmatpush.bf16.msrb.mxu2 %v3853_v12  ;;  %1933 = vmatpush.bf16.msra.mxu0 %v4059_v36  ;;  %v4095_v12 = vor.u32 %v4715_v37, %v4092_v16  ;;  %v4003_v36 = vld [vmem:[%s6855_s3 + $0x280] sm:$0xf0] }
 0x180   :  { %v4006_v43 = vor.u32 %v4699_v6, %v4003_v36 }
 0x183   :  { %1481 = vmatpush.bf16.msrb.mxu2 %v3845_v15  ;;  %1934 = vmatpush.bf16.msra.mxu0 %v4051_v2  ;;  %v4076_v15 = vld [vmem:[%s6855_s3 + $0x2e8] sm:$0xf0] }
 0x184   :  { %v4079_v2 = vor.u32 %v4711_v25, %v4076_v15 }
 0x187   :  { %1482 = vmatpush.bf16.msrb.mxu2 %v3837_v4  ;;  %1935 = vmatpush.bf16.msra.mxu0 %v4043_v40  ;;  %v1879_v4 = vunpack.c.h.b16 %v5852_v57  ;;  %v4071_v40 = vor.u32 %v4709_v22, %v4068_v58 }
 0x189   :  { %3806 = vmatmul.msk.bf16.vlgmr.msra.gmra.mxu3 %vm970_vm12, %v5832_v39  ;;  %1238 = vmatmul.bf16.vlgmr.msra.gmra.mxu2 %v5643_v63 }
 0x18a   :  { %1690 = vmatmul.bf16.vlgmr.msrb.gmra.mxu0 %v5643_v63  ;;  %4120 = vmatmul.msk.bf16.vlgmr.msra.gmra.mxu1 %vm970_vm12, %v5645_v7 }
 0x18b   :  { %1499 = vmatpush.bf16.msra.mxu3 %v1435_v56  ;;  %1720 = vmatpush.bf16.msra.mxu2 %v3998_v21  ;;  %v1901_v56 = vpack.c.b16 %v1879_v4, %v1879_v4 }
 0x18d   :  { %v1926_v17 = vsel %vm807_vm2, %v1901_v56, 0 }
 0x18f   :  { %1500 = vmatpush.bf16.msra.mxu3 %v3909_v3  ;;  %1721 = vmatpush.bf16.msra.mxu2 %v3990_v48  ;;  %v4705_v48 = vld [vmem:[%s6855_s3 + $0x2b4] sm:$0xf] }
 0x190   :  { %v4055_v41 = vor.u32 %v4705_v48, %v4052_v46 }
 0x193   :  { %1501 = vmatpush.bf16.msra.mxu3 %v3901_v11  ;;  %1722 = vmatpush.bf16.msra.mxu2 %v3982_v10 }
 0x197   :  { %1723 = vmatpush.bf16.msra.mxu2 %v3974_v52 }
 0x199   :  { %1243 = vmatmul.bf16.gmra.mxu2 %v5830_v44  ;;  %3807 = vmatmul.msk.bf16.vlgmr.msrb.gmra.mxu3 %vm970_vm12, %v5645_v7 }
 0x19a   :  { %1695 = vmatmul.bf16.gmra.mxu0 %v5830_v44  ;;  %4121 = vmatmul.msk.bf16.gmra.mxu1 %vm970_vm12, %v5832_v39 }
 0x19b   :  { %1724 = vmatpush.bf16.msra.mxu2 %v3966_v27  ;;  %1744 = vmatpush.bf16.msrb.mxu3 %v1680_v0  ;;  %v4047_v27 = vor.u32 %v4703_v18, %v4044_v19 }
 0x19f   :  { %1725 = vmatpush.bf16.msra.mxu2 %v3958_v30  ;;  %1745 = vmatpush.bf16.msrb.mxu3 %v4014_v54  ;;  %v4108_v30 = vld [vmem:[%s6855_s3 + $0x328] sm:$0xf0] }
 0x1a0   :  { %v4111_v0 = vor.u32 %v4719_v50, %v4108_v30 }
 0x1a3   :  { %1726 = vmatpush.bf16.msra.mxu2 %v3950_v1  ;;  %1746 = vmatpush.bf16.msrb.mxu3 %v4006_v43 }
 0x1a7   :  { %1727 = vmatpush.bf16.msra.mxu2 %v3942_v47 }
 0x1a9   :  { %3808 = vmatmul.msk.bf16.gmra.mxu3 %vm970_vm12, %v5832_v39  ;;  %1483 = vmatmul.bf16.vlgmr.msrb.gmra.mxu2 %v5643_v63 }
 0x1aa   :  { %1936 = vmatmul.bf16.vlgmr.msra.gmra.mxu0 %v5643_v63 }
 0x1ab   :  { %1966 = vmatpush.bf16.msrb.mxu2 %v4103_v26 }
 0x1af   :  { %1967 = vmatpush.bf16.msrb.mxu2 %v4095_v12 }
 0x1b3   :  { %1968 = vmatpush.bf16.msrb.mxu2 %v4087_v55 }
 0x1b7   :  { %v1201_v29 = vpop.f32.mrf.mxu0  ;;  %v1220_v35 = vpop.f32.mrf.mxu1  ;;  %1969 = vmatpush.bf16.msrb.mxu2 %v4079_v2 }
 0x1b8   :  { %v1221_v13 = vadd.f32 %v1220_v35, %v1201_v29 }
 0x1b9   :  { %1488 = vmatmul.bf16.gmra.mxu2 %v5830_v44  ;;  %3912 = vmatmul.msk.bf16.vlgmr.msra.gmra.mxu3 %vm970_vm12, %v5645_v7 }
 0x1ba   :  { %1941 = vmatmul.bf16.gmra.mxu0 %v5830_v44  ;;  %1990 = vmatpush.bf16.msra.mxu3 %v1926_v17  ;;  %v1276_v32 = vrot.slane %v1221_v13, 1 }
 0x1bb   :  { %1970 = vmatpush.bf16.msrb.mxu2 %v4071_v40 }
 0x1bc   :  { %v992_v33 = vpop.f32.mrf.mxu2  ;;  %v1011_v8 = vpop.f32.mrf.mxu3 }
 0x1bd   :  { %v1012_v21 = vadd.f32 %v1011_v8, %v992_v33 }
 0x1be   :  { %1991 = vmatpush.bf16.msra.mxu3 %v4119_v51 }
 0x1bf   :  { %v1203_v57 = vpop.f32.mrf.mxu0  ;;  %v1222_v3 = vpop.f32.mrf.mxu1  ;;  %1971 = vmatpush.bf16.msrb.mxu2 %v4063_v14 }
 0x1c0   :  { %v6169_v60 = vadd.f32 %v1222_v3, %v1203_v57 }
 0x1c2   :  { %v1277_v11 = vrot.slane %v6169_v60, 1  ;;  %1992 = vmatpush.bf16.msra.mxu3 %v4111_v0 }
 0x1c3   :  { %1972 = vmatpush.bf16.msrb.mxu2 %v4055_v41 }
 0x1c4   :  { %v1278_v10 = vsel %vm262_vm1, %v1276_v32, %v1277_v11  ;;  %v6190_v20 = vpop.f32.mrf.mxu2  ;;  %v6192_v5 = vpop.f32.mrf.mxu3 }
 0x1c5   :  { %v1296_v52 = vadd.f32 %v1278_v10, %v1012_v21 }
 0x1c7   :  { %1973 = vmatpush.bf16.msrb.mxu2 %v4047_v27  ;;  %v1465_v47 = vpop.f32.mrf.mxu1 }
 0x1c9   :  { %3913 = vmatmul.msk.bf16.gmra.mxu3 %vm970_vm12, %v5832_v39  ;;  %1728 = vmatmul.bf16.vlgmr.msra.gmra.mxu2 %v5643_v63 }
 0x1cf   :  { %v1467_v37 = vpop.f32.mrf.mxu1 }
 0x1d7   :  { %v1206_v31 = vpop.f32.mrf.mxu0 }
 0x1d9   :  { %1733 = vmatmul.bf16.gmra.mxu2 %v5830_v44  ;;  %4017 = vmatmul.msk.bf16.vlgmr.msrb.gmra.mxu3 %vm970_vm12, %v5645_v7 }
 0x1dc   :  { %v997_v24 = vpop.f32.mrf.mxu2  ;;  %v1016_v1 = vpop.f32.mrf.mxu3 }
 0x1dd   :  { %v1017_v59 = vadd.f32 %v1016_v1, %v997_v24 }
 0x1df   :  { %v1208_v34 = vpop.f32.mrf.mxu0 }
 0x1e4   :  { %v6203_v62 = vpop.f32.mrf.mxu2  ;;  %v6205_v61 = vpop.f32.mrf.mxu3 }
 0x1e7   :  { %v1446_v54 = vpop.f32.mrf.mxu0 }
 0x1e8   :  { %v1466_v9 = vadd.f32 %v1465_v47, %v1446_v54 }
 0x1e9   :  { %4018 = vmatmul.msk.bf16.gmra.mxu3 %vm970_vm12, %v5832_v39  ;;  %1974 = vmatmul.bf16.vlgmr.msrb.gmra.mxu2 %v5643_v63  ;;  %v1470_v63 = vpop.f32.mrf.mxu1 }
 0x1ea   :  { %v1521_v36 = vrot.slane %v1466_v9, 2 }
 0x1ec   :  { %v1030_v38 = vpop.f32.mrf.mxu2  ;;  %v1049_v26 = vpop.f32.mrf.mxu3 }
 0x1ed   :  { %v1050_v16 = vadd.f32 %v1049_v26, %v1030_v38 }
 0x1ef   :  { %v1448_v12 = vpop.f32.mrf.mxu0 }
 0x1f0   :  { %v6210_v6 = vadd.f32 %v1467_v37, %v1448_v12 }
 0x1f1   :  { %v1472_v8 = vpop.f32.mrf.mxu1 }
 0x1f2   :  { %v1522_v23 = vrot.slane %v6210_v6, 2  ;;  %v4726_v6 = vld [vmem:[%s6857_s5 + $0x18] sm:$0xff] }
 0x1f4   :  { %v1523_v43 = vsel %vm573_vm6, %v1521_v36, %v1522_v23  ;;  %v6216_v45 = vpop.f32.mrf.mxu2  ;;  %v6218_v55 = vpop.f32.mrf.mxu3 }
 0x1f5   :  { %v6220_v25 = vadd.f32 %v1523_v43, %v1296_v52 }
 0x1f7   :  { %v1451_v15 = vpop.f32.mrf.mxu0 }
 0x1f8   :  { %v1471_v2 = vadd.f32 %v1470_v63, %v1451_v15 }
 0x1f9   :  { %1979 = vmatmul.bf16.gmra.mxu2 %v5830_v44  ;;  %4122 = vmatmul.msk.bf16.vlgmr.msra.gmra.mxu3 %vm970_vm12, %v5645_v7 }
 0x1fa   :  { %v1527_v57 = vrot.slane %v1471_v2, 2 }
 0x1fc   :  { %v1035_v29 = vpop.f32.mrf.mxu2  ;;  %v1054_v35 = vpop.f32.mrf.mxu3 }
 0x1fd   :  { %v1055_v13 = vadd.f32 %v1054_v35, %v1035_v29 }
 0x1ff   :  { %v1453_v33 = vpop.f32.mrf.mxu0 }
 0x200   :  { %v6231_v42 = vadd.f32 %v1472_v8, %v1453_v33 }
 0x202   :  { %v1528_v21 = vrot.slane %v6231_v42, 2 }
 0x204   :  { %v6225_v22 = vpop.f32.mrf.mxu2  ;;  %v6227_v58 = vpop.f32.mrf.mxu3  ;;  %v1529_v48 = vsel %vm573_vm6, %v1527_v57, %v1528_v21 }
 0x207   :  { %v1691_v37 = vpop.f32.mrf.mxu0 }
 0x209   :  { %4123 = vmatmul.msk.bf16.gmra.mxu3 %vm970_vm12, %v5832_v39 }
 0x20c   :  { %v1225_v4 = vpop.f32.mrf.mxu3  ;;  %v1239_v40 = vpop.f32.mrf.mxu2 }
 0x20d   :  { %v1226_v56 = vadd.f32 %v1225_v4, %v1206_v31 }
 0x20f   :  { %v1282_v17 = vrot.slane %v1226_v56, 1  ;;  %v1693_v35 = vpop.f32.mrf.mxu0 }
 0x214   :  { %v1227_v44 = vpop.f32.mrf.mxu3  ;;  %v1241_v49 = vpop.f32.mrf.mxu2 }
 0x215   :  { %v6233_v7 = vadd.f32 %v1227_v44, %v1208_v34 }
 0x217   :  { %v1283_v14 = vrot.slane %v6233_v7, 1  ;;  %v6267_v44 = vpop.f32.mrf.mxu0 }
 0x219   :  { %v1284_v39 = vsel %vm262_vm1, %v1282_v17, %v1283_v14 }
 0x21a   :  { %v1300_v3 = vadd.f32 %v1284_v39, %v1017_v59 }
 0x21c   :  { %v1244_v46 = vpop.f32.mrf.mxu2  ;;  %v1258_v41 = vpop.f32.mrf.mxu3  ;;  %v6243_v32 = vadd.f32 %v1529_v48, %v1300_v3 }
 0x21d   :  { %v1259_v10 = vadd.f32 %v1258_v41, %v1239_v40 }
 0x21f   :  { %v1279_v28 = vrot.slane %v1259_v10, 1  ;;  %v1698_v41 = vpop.f32.mrf.mxu0 }
 0x224   :  { %v1246_v18 = vpop.f32.mrf.mxu2  ;;  %v1260_v19 = vpop.f32.mrf.mxu3 }
 0x225   :  { %v6245_v52 = vadd.f32 %v1260_v19, %v1241_v49 }
 0x227   :  { %v1280_v53 = vrot.slane %v6245_v52, 1  ;;  %v4725_v52 = vld [vmem:[%s6857_s5 + $0x10] sm:$0xff] }
 0x229   :  { %v1281_v27 = vsel %vm262_vm1, %v1279_v28, %v1280_v53  ;;  %v1937_v28 = vpop.f32.mrf.mxu0 }
 0x22a   :  { %v1297_v51 = vadd.f32 %v1281_v27, %v1050_v16  ;;  %v1710_v16 = vpop.f32.mrf.mxu1 }
 0x22c   :  { %v1263_v50 = vpop.f32.mrf.mxu3  ;;  %v1484_v30 = vpop.f32.mrf.mxu2 }
 0x22d   :  { %v1264_v0 = vadd.f32 %v1263_v50, %v1244_v46 }
 0x22f   :  { %v1285_v59 = vrot.slane %v1264_v0, 1 }
 0x231   :  { %v1939_v0 = vpop.f32.mrf.mxu0 }
 0x232   :  { %v1712_v4 = vpop.f32.mrf.mxu1 }
 0x234   :  { %v1265_v31 = vpop.f32.mrf.mxu3  ;;  %v1486_v24 = vpop.f32.mrf.mxu2 }
 0x235   :  { %v6251_v1 = vadd.f32 %v1265_v31, %v1246_v18 }
 0x237   :  { %v1286_v34 = vrot.slane %v6251_v1, 1 }
 0x239   :  { %v1287_v47 = vsel %vm262_vm1, %v1285_v59, %v1286_v34  ;;  %vm2066_vm1 = vcmask 261124  }
 0x23a   :  { %v1301_v54 = vadd.f32 %v1287_v47, %v1055_v13  ;;  %v6269_v49 = vpop.f32.mrf.mxu1  ;;  %v4729_v47 = vld [vmem:[%s6857_s5 + $0x30] sm:$0xff]  ;;  %vm6355_vm4 = vmor %vm2066_vm1, %vm807_vm2 }
 0x23c   :  { %v1489_v9 = vpop.f32.mrf.mxu2  ;;  %v1503_v38 = vpop.f32.mrf.mxu3 }
 0x23d   :  { %v1504_v26 = vadd.f32 %v1503_v38, %v1484_v30  ;;  %v4730_v30 = vld [vmem:[%s6857_s5 + $0x38] sm:$0xff]  ;;  %v1711_v38 = vadd.f32 %v1710_v16, %v1691_v37 }
 0x23e   :  { %3108 = vmatpush.bf16.msrb.mxu0 %v4730_v30 }
 0x23f   :  { %v1524_v63 = vrot.slane %v1504_v26, 2 }
 0x242   :  { %v1717_v10 = vpop.f32.mrf.mxu1  ;;  %3109 = vmatpush.bf16.msrb.mxu0 %v4729_v47 }
 0x244   :  { %v1491_v12 = vpop.f32.mrf.mxu2  ;;  %v1505_v36 = vpop.f32.mrf.mxu3 }
 0x245   :  { %v6257_v43 = vadd.f32 %v1505_v36, %v1486_v24 }
 0x247   :  { %v1525_v15 = vrot.slane %v6257_v43, 2 }
 0x249   :  { %v1526_v2 = vsel %vm573_vm6, %v1524_v63, %v1525_v15 }
 0x24a   :  { %v6263_v29 = vadd.f32 %v1526_v2, %v1297_v51  ;;  %v1956_v27 = vpop.f32.mrf.mxu1 }
 0x24b   :  { %v1957_v2 = vadd.f32 %v1956_v27, %v1937_v28 }
 0x24c   :  { %v1508_v13 = vpop.f32.mrf.mxu3  ;;  %v1729_v56 = vpop.f32.mrf.mxu2 }
 0x24d   :  { %v1509_v40 = vadd.f32 %v1508_v13, %v1489_v9  ;;  %v1014_v9 = vadd.f32 %v6192_v5, %v6190_v20  ;;  %v4727_v20 = vld [vmem:[%s6857_s5 + $0x20] sm:$0xff] }
 0x24f   :  { %v1530_v17 = vrot.slane %v1509_v40, 2  ;;  %v1298_v40 = vadd.f32 %v1277_v11, %v1014_v9  ;;  %v2012_v11 = vrot.slane %v1957_v2, 4  ;;  %v4724_v2 = vld [vmem:[%s6857_s5 + $0x8] sm:$0xff] }
 0x251   :  { %v1543_v5 = vadd.f32 %v1522_v23, %v1298_v40  ;;  %v1716_v40 = vadd.f32 %v6269_v49, %v6267_v44 }
 0x252   :  { %v1958_v24 = vpop.f32.mrf.mxu1 }
 0x253   :  { %v1959_v26 = vadd.f32 %v1958_v24, %v1939_v0 }
 0x254   :  { %v1510_v33 = vpop.f32.mrf.mxu3  ;;  %v1731_v39 = vpop.f32.mrf.mxu2 }
 0x255   :  { %v6265_v8 = vadd.f32 %v1510_v33, %v1491_v12  ;;  %v4728_v12 = vld [vmem:[%s6857_s5 + $0x28] sm:$0xff]  ;;  %v2013_v33 = vrot.slane %v1959_v26, 4  ;;  %v1718_v26 = vadd.f32 %v1717_v10, %v1698_v41 }
 0x256   :  { %3110 = vmatpush.bf16.msrb.mxu0 %v4728_v12 }
 0x257   :  { %v1531_v57 = vrot.slane %v6265_v8, 2 }
 0x259   :  { %v1532_v3 = vsel %vm573_vm6, %v1530_v17, %v1531_v57  ;;  %vm2159_vm6 = vcmask 785408  }
 0x25a   :  { %v6275_v48 = vadd.f32 %v1532_v3, %v1301_v54  ;;  %v1713_v54 = vadd.f32 %v1712_v4, %v1693_v35  ;;  %v1942_v35 = vpop.f32.mrf.mxu0  ;;  %v1767_v4 = vrot.slane %v1711_v38, 3  ;;  %v1961_v37 = vpop.f32.mrf.mxu1  ;;  %v2040_v3 = vld [vmem:[%s6856_s4] sm:$0x3]  ;;  %3111 = vmatpush.bf16.msrb.mxu0 %v4727_v20 }
 0x25b   :  { %v6316_v27 = vperm.slane %v2040_v3, 0  ;;  %v1962_v44 = vadd.f32 %v1961_v37, %v1942_v35 }
 0x25c   :  { %v1748_v46 = vpop.f32.mrf.mxu3  ;;  %v6277_v18 = vpop.f32.mrf.mxu2  ;;  %v1768_v63 = vrot.slane %v1713_v54, 3 }
 0x25d   :  { %v1749_v17 = vadd.f32 %v1748_v46, %v1729_v56 }
 0x25e   :  { %v1769_v60 = vsel %vm1766_vm13, %v1767_v4, %v1768_v63  ;;  %v1789_v46 = vadd.f32 %v1768_v63, %v1543_v5  ;;  %3112 = vmatpush.bf16.msrb.mxu0 %v4726_v6  ;;  %v1774_v5 = vrot.slane %v1718_v26, 3  ;;  %v1057_v6 = vadd.f32 %v6227_v58, %v6225_v22 }
 0x25f   :  { %v1787_v28 = vadd.f32 %v1769_v60, %v6220_v25  ;;  %v6324_v25 = vperm.slane %v2040_v3, 1  ;;  %v4723_v60 = vld [vmem:[%s6857_s5] sm:$0xff] }
 0x260   :  { %v2034_v0 = vadd.f32 %v2013_v33, %v1789_v46  ;;  %v1303_v42 = vadd.f32 %v1286_v34, %v1057_v6 }
 0x262   :  { %v1944_v12 = vpop.f32.mrf.mxu0  ;;  %v2048_v43 = vadd.f32 %v6316_v27, %v2034_v0  ;;  %3113 = vmatpush.bf16.msrb.mxu0 %v4725_v52  ;;  %v1963_v41 = vpop.f32.mrf.mxu1  ;;  %v1548_v0 = vadd.f32 %v1531_v57, %v1303_v42 }
 0x264   :  { %v1750_v19 = vpop.f32.mrf.mxu3  ;;  %v6279_v51 = vpop.f32.mrf.mxu2 }
 0x265   :  { %v1751_v13 = vadd.f32 %v1750_v19, %v1731_v39  ;;  %v1052_v39 = vadd.f32 %v6218_v55, %v6216_v45  ;;  %v2014_v19 = vsel %vm807_vm2, %v2012_v11, %v2013_v33  ;;  %v1770_v45 = vrot.slane %v1749_v17, 3 }
 0x266   :  { %v1964_v33 = vadd.f32 %v1963_v41, %v1944_v12  ;;  %3114 = vmatpush.bf16.msrb.mxu0 %v4724_v2 }
 0x267   :  { %v1771_v56 = vrot.slane %v1751_v13, 3  ;;  %v1299_v23 = vadd.f32 %v1280_v53, %v1052_v39  ;;  %v2032_v53 = vadd.f32 %v2014_v19, %v1787_v28  ;;  %v1019_v13 = vadd.f32 %v6205_v61, %v6203_v62 }
 0x268   :  { %v2056_v61 = vmax.f32 %v2048_v43, 0.0  ;;  %v2018_v19 = vrot.slane %v1962_v44, 4 }
 0x269   :  { %v1544_v24 = vadd.f32 %v1525_v15, %v1299_v23  ;;  %v1772_v47 = vsel %vm1766_vm13, %v1770_v45, %v1771_v56  ;;  %v2046_v10 = vadd.f32 %v6316_v27, %v2032_v53  ;;  %v1302_v20 = vadd.f32 %v1283_v14, %v1019_v13 }
 0x26a   :  { %v1773_v14 = vrot.slane %v1716_v40, 3  ;;  %3115 = vmatpush.bf16.msrb.mxu0 %v4723_v60 }
 0x26b   :  { %v1790_v9 = vadd.f32 %v1771_v56, %v1544_v24  ;;  %v2054_v11 = vmax.f32 %v2046_v10, 0.0  ;;  %v2019_v56 = vrot.slane %v1964_v33, 4 }
 0x26c   :  { %v6281_v50 = vpop.f32.mrf.mxu3  ;;  %v1975_v59 = vpop.f32.mrf.mxu2  ;;  %v1775_v23 = vsel %vm1766_vm13, %v1773_v14, %v1774_v5 }
 0x26d   :  { %v1754_v35 = vadd.f32 %v6281_v50, %v6277_v18  ;;  %v1791_v22 = vadd.f32 %v1775_v23, %v6243_v32 }
 0x26f   :  { %v1776_v50 = vrot.slane %v1754_v35, 3 }
 0x274   :  { %v6286_v31 = vpop.f32.mrf.mxu3  ;;  %v1977_v16 = vpop.f32.mrf.mxu2 }
 0x275   :  { %v1756_v49 = vadd.f32 %v6286_v31, %v6279_v51  ;;  %v1547_v31 = vadd.f32 %v1528_v21, %v1302_v20  ;;  %v2020_v21 = vsel %vm807_vm2, %v2018_v19, %v2019_v56 }
 0x277   :  { %v1777_v45 = vrot.slane %v1756_v49, 3  ;;  %v1793_v18 = vadd.f32 %v1774_v5, %v1547_v31 }
 0x279   :  { %v1778_v24 = vsel %vm1766_vm13, %v1776_v50, %v1777_v45  ;;  %v1794_v52 = vadd.f32 %v1777_v45, %v1548_v0 }
 0x27a   :  { %v1792_v34 = vadd.f32 %v1778_v24, %v6275_v48 }
 0x27c   :  { %v1994_v36 = vpop.f32.mrf.mxu3 }
 0x27d   :  { %v1995_v55 = vadd.f32 %v1994_v36, %v1975_v59  ;;  %v1788_v36 = vadd.f32 %v1772_v47, %v6263_v29  ;;  %v1980_v29 = vpop.f32.mrf.mxu2 }
 0x27f   :  { %v2015_v59 = vrot.slane %v1995_v55, 4 }
 0x284   :  { %v1996_v30 = vpop.f32.mrf.mxu3 }
 0x285   :  { %v1997_v54 = vadd.f32 %v1996_v30, %v1977_v16  ;;  %v1982_v58 = vpop.f32.mrf.mxu2  ;;  %v2038_v30 = vadd.f32 %v2019_v56, %v1793_v18 }
 0x287   :  { %v2016_v38 = vrot.slane %v1997_v54, 4  ;;  %v2036_v54 = vadd.f32 %v2020_v21, %v1791_v22 }
 0x289   :  { %v2017_v15 = vsel %vm807_vm2, %v2015_v59, %v2016_v38  ;;  %v2035_v63 = vadd.f32 %v2016_v38, %v1790_v9  ;;  %v2052_v9 = vadd.f32 %v6316_v27, %v2038_v30  ;;  %v2050_v38 = vadd.f32 %v6316_v27, %v2036_v54 }
 0x28a   :  { %v2033_v4 = vadd.f32 %v2017_v15, %v1788_v36 }
 0x28b   :  { %v2049_v17 = vadd.f32 %v6324_v25, %v2035_v63  ;;  %v2060_v12 = vmax.f32 %v2052_v9, 0.0  ;;  %v2058_v43 = vmax.f32 %v2050_v38, 0.0 }
 0x28c   :  { %v2047_v16 = vadd.f32 %v6324_v25, %v2033_v4  ;;  %v1999_v62 = vpop.f32.mrf.mxu3 }
 0x28d   :  { %v2057_v39 = vmax.f32 %v2049_v17, 0.0  ;;  %v2000_v55 = vadd.f32 %v1999_v62, %v1980_v29 }
 0x28e   :  { %v2055_v3 = vmax.f32 %v2047_v16, 0.0 }
 0x28f   :  { %v2063_v37 = vpack.c.bf16 %v2057_v39, %v2056_v61  ;;  %v2021_v53 = vrot.slane %v2000_v55, 4 }
 0x290   :  { %v2062_v46 = vpack.c.bf16 %v2055_v3, %v2054_v11 }
 0x291   :  { %2072 = vst.msk [vmem:[#allocation3 + $0x8] sm:$0x11] %vm6347_vm3, %v2063_v37 }
 0x292   :  { %2068 = vst.msk [vmem:[#allocation3] sm:$0xff] %vm6355_vm4, %v2062_v46 }
 0x294   :  { %v2001_v28 = vpop.f32.mrf.mxu3 }
 0x295   :  { %v2002_v47 = vadd.f32 %v2001_v28, %v1982_v58 }
 0x297   :  { %v2022_v1 = vrot.slane %v2002_v47, 4 }
 0x298   :  { %v6385_v10 = vld [vmem:[#allocation3 + $0x8] sm:$0x11] }
 0x299   :  { %v2023_v59 = vsel %vm807_vm2, %v2021_v53, %v2022_v1  ;;  %v2039_v32 = vadd.f32 %v2022_v1, %v1794_v52  ;;  %v2075_v48 = vld [vmem:[#allocation3] sm:$0x11]  ;;  %v2077_v13 = vld [vmem:[#allocation3] sm:$0x22]  ;;  %v2079_v40 = vld [vmem:[#allocation3] sm:$0x44]  ;;  %v2241_v61 = vunpack.c.l.b16 %v6385_v10  ;;  %v2242_v44 = vunpack.c.h.b16 %v6385_v10 }
 0x29a   :  { %v2037_v26 = vadd.f32 %v2023_v59, %v1792_v34  ;;  %v2087_v27 = vunpack.c.l.b16 %v2075_v48  ;;  %v2121_v41 = vunpack.c.l.b16 %v2077_v13  ;;  %v2122_v29 = vunpack.c.h.b16 %v2077_v13  ;;  %v6387_v33 = vld [vmem:[#allocation3] sm:$0x88]  ;;  %v4754_v13 = vld [vmem:[%s6857_s5 + $0xf8] sm:$0xff] }
 0x29b   :  { %v2053_v8 = vadd.f32 %v6324_v25, %v2039_v32  ;;  %v2164_v4 = vunpack.c.l.b16 %v2079_v40  ;;  %v2200_v11 = vunpack.c.l.b16 %v6387_v33  ;;  %v2165_v45 = vunpack.c.h.b16 %v2079_v40  ;;  %3147 = vmatpush.bf16.msrb.mxu3 %v4754_v13 }
 0x29c   :  { %v2051_v57 = vadd.f32 %v6324_v25, %v2037_v26  ;;  %v2088_v25 = vunpack.c.h.b16 %v2075_v48  ;;  %v4124_v17 = vunpack.i.l.s16 %v2087_v27  ;;  %v4128_v16 = vunpack.i.l.s16 %v2121_v41  ;;  %v4746_v48 = vld [vmem:[%s6857_s5 + $0xb8] sm:$0xff] }
 0x29d   :  { %v2061_v36 = vmax.f32 %v2053_v8, 0.0  ;;  %v4129_v14 = vunpack.i.l.s16 %v2122_v29  ;;  %v6394_v56 = vunpack.i.l.s16 %v2164_v4  ;;  %v6412_v38 = vunpack.i.l.s16 %v2200_v11  ;;  %v4737_v29 = vld [vmem:[%s6857_s5 + $0x70] sm:$0xff]  ;;  %v4762_v4 = vld [vmem:[%s6857_s5 + $0x138] sm:$0xff]  ;;  %3134 = vmatpush.bf16.msra.mxu2 %v4746_v48 }
 0x29e   :  { %v2059_v15 = vmax.f32 %v2051_v57, 0.0  ;;  %v6392_v7 = vunpack.i.l.s16 %v2088_v25  ;;  %v2107_v37 = vrot.slane %v4124_v17, 1  ;;  %v2147_v6 = vrot.slane %v4128_v16, 3  ;;  %3160 = vmatpush.bf16.msra.mxu0 %v4762_v4  ;;  %v4732_v4 = vld [vmem:[%s6857_s5 + $0x48] sm:$0xff] }
 0x29f   :  { %v2065_v63 = vpack.c.bf16 %v2061_v36, %v2060_v12  ;;  %v2133_v23 = vrot.slane %v4128_v16, 2  ;;  %v2150_v26 = vrot.slane %v4129_v14, 3  ;;  %v2136_v8 = vrot.slane %v4129_v14, 2  ;;  %v4738_v36 = vld [vmem:[%s6857_s5 + $0x78] sm:$0xff] }
 0x2a0   :  { %v2064_v2 = vpack.c.bf16 %v2059_v15, %v2058_v43  ;;  %v2109_v9 = vrot.slane %v6392_v7, 1  ;;  %v6416_v57 = vunpack.i.l.s16 %v2165_v45  ;;  %v2176_v15 = vrot.slane %v6394_v56, 4  ;;  %3121 = vmatpush.bf16.msrb.mxu1 %v4738_v36 }
 0x2a1   :  { %2074 = vst.msk [vmem:[#allocation3 + $0x18] sm:$0x11] %vm6347_vm3, %v2065_v63  ;;  %v6457_v11 = vunpack.i.l.s16 %v2241_v61  ;;  %v4736_v61 = vld [vmem:[%s6857_s5 + $0x68] sm:$0xff]  ;;  %v6484_v45 = vunpack.i.l.s16 %v2242_v44  ;;  %v2212_v10 = vrot.slane %v6412_v38, 6 }
 0x2a2   :  { %2073 = vst.msk [vmem:[#allocation3 + $0x10] sm:$0xff] %vm6355_vm4, %v2064_v2 }
 0x2a4   :  { %3122 = vmatpush.bf16.msrb.mxu1 %v4737_v29 }
 0x2a8   :  { %v6396_v46 = vld [vmem:[#allocation3 + $0x18] sm:$0x11]  ;;  %3123 = vmatpush.bf16.msrb.mxu1 %v4736_v61  ;;  %v4747_v61 = vld [vmem:[%s6857_s5 + $0xc0] sm:$0xff] }
 0x2a9   :  { %v2076_v20 = vld [vmem:[#allocation3 + $0x10] sm:$0x11]  ;;  %v2078_v5 = vld [vmem:[#allocation3 + $0x10] sm:$0x22]  ;;  %v2080_v62 = vld [vmem:[#allocation3 + $0x10] sm:$0x44]  ;;  %v2243_v30 = vunpack.c.l.b16 %v6396_v46  ;;  %v2244_v2 = vunpack.c.h.b16 %v6396_v46 }
 0x2aa   :  { %v2089_v49 = vunpack.c.l.b16 %v2076_v20  ;;  %v2123_v39 = vunpack.c.l.b16 %v2078_v5  ;;  %v2124_v60 = vunpack.c.h.b16 %v2078_v5  ;;  %v2090_v3 = vunpack.c.h.b16 %v2076_v20  ;;  %v6401_v58 = vld [vmem:[#allocation3 + $0x10] sm:$0x88] }
 0x2ab   :  { %v2166_v31 = vunpack.c.l.b16 %v2080_v62  ;;  %v2167_v28 = vunpack.c.h.b16 %v2080_v62  ;;  %v2202_v32 = vunpack.c.l.b16 %v6401_v58  ;;  %v6418_v12 = vunpack.i.l.s16 %v2243_v30  ;;  %v4745_v62 = vld [vmem:[%s6857_s5 + $0xb0] sm:$0xff] }
 0x2ac   :  { %v4126_v35 = vunpack.i.l.s16 %v2089_v49  ;;  %v4130_v51 = vunpack.i.l.s16 %v2123_v39  ;;  %v4131_v19 = vunpack.i.l.s16 %v2124_v60  ;;  %v6399_v22 = vunpack.i.l.s16 %v2090_v3  ;;  %v4753_v49 = vld [vmem:[%s6857_s5 + $0xf0] sm:$0xff]  ;;  %3135 = vmatpush.bf16.msra.mxu2 %v4745_v62  ;;  %v4731_v62 = vld [vmem:[%s6857_s5 + $0x40] sm:$0xff] }
 0x2ad   :  { %v6407_v54 = vunpack.i.l.s16 %v2166_v31  ;;  %v4135_v63 = vunpack.i.l.s16 %v2167_v28  ;;  %v6444_v20 = vunpack.i.l.s16 %v2202_v32  ;;  %v2201_v5 = vunpack.c.h.b16 %v6387_v33  ;;  %3148 = vmatpush.bf16.msrb.mxu3 %v4753_v49  ;;  %v4735_v28 = vld [vmem:[%s6857_s5 + $0x60] sm:$0xff] }
 0x2ae   :  { %v2108_v18 = vsel %vm2100_vm5, %v4126_v35, %v2107_v37  ;;  %v2099_v42 = vrot.slane %v4126_v35, 7  ;;  %v2148_v21 = vrot.slane %v4130_v51, 2  ;;  %v2134_v50 = vrot.slane %v4130_v51, 1  ;;  %v4761_v37 = vld [vmem:[%s6857_s5 + $0x130] sm:$0xff]  ;;  %3124 = vmatpush.bf16.msrb.mxu1 %v4735_v28  ;;  %v4764_v28 = vld [vmem:[%s6857_s5 + $0x148] sm:$0xff] }
 0x2af   :  { %v2111_v55 = vpack.c.b16 %v2108_v18, %v2108_v18  ;;  %v2151_v34 = vrot.slane %v4131_v19, 2  ;;  %v2137_v59 = vrot.slane %v4131_v19, 1  ;;  %v2110_v43 = vsel %vm2100_vm5, %v6399_v22, %v2109_v9  ;;  %3161 = vmatpush.bf16.msra.mxu0 %v4761_v37  ;;  %v4778_v37 = vld [vmem:[%s6857_s5 + $0x1b8] sm:$0xff] }
 0x2b0   :  { %v2149_v0 = vsel %vm2100_vm5, %v2148_v21, %v2147_v6  ;;  %v2135_v24 = vsel %vm2100_vm5, %v2134_v50, %v2133_v23  ;;  %v2101_v47 = vsel %vm2100_vm5, %v2099_v42, %v4124_v17  ;;  %v2102_v27 = vrot.slane %v6399_v22, 7  ;;  %v4752_v42 = vld [vmem:[%s6857_s5 + $0xe8] sm:$0xff] }
 0x2b1   :  { %2113 = vrot.lane.b32.xlu0 %v2111_v55, %s4873_s0  ;;  %v2153_v52 = vpack.c.b16 %v2149_v0, %v2149_v0  ;;  %v2139_v53 = vpack.c.b16 %v2135_v24, %v2135_v24  ;;  %v2104_v1 = vpack.c.b16 %v2101_v47, %v2101_v47  ;;  %v2152_v40 = vsel %vm2100_vm5, %v2151_v34, %v2150_v26  ;;  %v4760_v22 = vld [vmem:[%s6857_s5 + $0x128] sm:$0xff]  ;;  %v4743_v47 = vld [vmem:[%s6857_s5 + $0xa0] sm:$0xff] }
 0x2b2   :  { %v2138_v41 = vsel %vm2100_vm5, %v2137_v59, %v2136_v8  ;;  %v2177_v25 = vrot.slane %v6407_v54, 3  ;;  %v2185_v17 = vrot.slane %v6394_v56, 5  ;;  %v2253_v16 = vrot.slane %v6418_v12, 7  ;;  %3149 = vmatpush.bf16.msrb.mxu3 %v4752_v42  ;;  %v4734_v59 = vld [vmem:[%s6857_s5 + $0x58] sm:$0xff]  ;;  %v4776_v42 = vld [vmem:[%s6857_s5 + $0x1a8] sm:$0xff] }
 0x2b3   :  { %2155 = vrot.lane.b32.xlu2 %v2153_v52, %s4874_s21  ;;  %2141 = vrot.lane.b32.xlu1 %v2139_v53, %s4875_s22  ;;  %v2112_v39 = vpack.c.b16 %v2110_v43, %v2110_v43  ;;  %v2203_v60 = vunpack.c.h.b16 %v6401_v58  ;;  %v2179_v33 = vrot.slane %v6416_v57, 4  ;;  %v2154_v3 = vpack.c.b16 %v2152_v40, %v2152_v40  ;;  %v4742_v8 = vld [vmem:[%s6857_s5 + $0x98] sm:$0xff] }
 0x2b4   :  { %3116 = vmatmul.bf16.vlgmr.msrb.gmra.mxu0 %v2104_v1  ;;  %v2140_v14 = vpack.c.b16 %v2138_v41, %v2138_v41  ;;  %v2186_v56 = vrot.slane %v6407_v54, 4  ;;  %v6461_v35 = vunpack.i.l.s16 %v2244_v2  ;;  %v6472_v51 = vsel %vm2100_vm5, %v2102_v27, %v6392_v7  ;;  %v4744_v7 = vld [vmem:[%s6857_s5 + $0xa8] sm:$0xff]  ;;  %v4751_v54 = vld [vmem:[%s6857_s5 + $0xe0] sm:$0xff]  ;;  %3125 = vmatpush.bf16.msrb.mxu1 %v4734_v59  ;;  %v4733_v2 = vld [vmem:[%s6857_s5 + $0x50] sm:$0xff] }
 0x2b5   :  { %v2180_v31 = vrot.slane %v4135_v63, 3  ;;  %v6475_v46 = vsel %vm2100_vm5, %v2177_v25, %v2176_v15  ;;  %v6479_v6 = vsel %vm2100_vm5, %v2253_v16, %v6457_v11  ;;  %v2213_v23 = vrot.slane %v6444_v20, 5  ;;  %3136 = vmatpush.bf16.msra.mxu2 %v4744_v7  ;;  %3162 = vmatpush.bf16.msra.mxu0 %v4760_v22  ;;  %v4759_v1 = vld [vmem:[%s6857_s5 + $0x120] sm:$0xff]  ;;  %v4749_v27 = vld [vmem:[%s6857_s5 + $0xd0] sm:$0xff]  ;;  %v4766_v7 = vld [vmem:[%s6857_s5 + $0x158] sm:$0xff] }
 0x2b6   :  { %v2189_v19 = vrot.slane %v4135_v63, 4  ;;  %v2255_v18 = vrot.slane %v6461_v35, 7  ;;  %v2187_v21 = vsel %vm2100_vm5, %v2186_v56, %v2185_v17  ;;  %v2188_v50 = vrot.slane %v6416_v57, 5  ;;  %3150 = vmatpush.bf16.msrb.mxu3 %v4751_v54  ;;  %v4750_v57 = vld [vmem:[%s6857_s5 + $0xd8] sm:$0xff]  ;;  %v4757_v25 = vld [vmem:[%s6857_s5 + $0x110] sm:$0xff]  ;;  %v4739_v56 = vld [vmem:[%s6857_s5 + $0x80] sm:$0xff] }
 0x2b7   :  { %v6497_v44 = vsel %vm2100_vm5, %v2180_v31, %v2179_v33  ;;  %v4139_v55 = vunpack.i.l.s16 %v2203_v60  ;;  %v2214_v30 = vsel %vm2100_vm5, %v2213_v23, %v2212_v10  ;;  %v4137_v24 = vunpack.i.l.s16 %v2201_v5  ;;  %v4758_v63 = vld [vmem:[%s6857_s5 + $0x118] sm:$0xff]  ;;  %v4769_v33 = vld [vmem:[%s6857_s5 + $0x170] sm:$0xff]  ;;  %v4755_v31 = vld [vmem:[%s6857_s5 + $0x100] sm:$0xff] }
 0x2b8   :  { %v6506_v58 = vsel %vm2100_vm5, %v2255_v18, %v6484_v45  ;;  %v2190_v0 = vsel %vm2100_vm5, %v2189_v19, %v2188_v50  ;;  %v2191_v52 = vpack.c.b16 %v2187_v21, %v2187_v21  ;;  %v2218_v34 = vpack.c.b16 %v2214_v30, %v2214_v30  ;;  %3126 = vmatpush.bf16.msrb.mxu1 %v4733_v2  ;;  %v4786_v23 = vld [vmem:[%s6857_s5 + $0x1f8] sm:$0xff]  ;;  %v4767_v19 = vld [vmem:[%s6857_s5 + $0x160] sm:$0xff]  ;;  %v4785_v18 = vld [vmem:[%s6857_s5 + $0x1f0] sm:$0xff] }
 0x2b9   :  { %2115 = vrot.lane.b32.xlu0 %v2112_v39, %s4873_s0  ;;  %v2216_v53 = vrot.slane %v4139_v55, 5  ;;  %v2192_v9 = vpack.c.b16 %v2190_v0, %v2190_v0  ;;  %v2215_v32 = vrot.slane %v4137_v24, 6  ;;  %v2226_v26 = vrot.slane %v6444_v20, 6  ;;  %3137 = vmatpush.bf16.msra.mxu2 %v4743_v47  ;;  %v4740_v20 = vld [vmem:[%s6857_s5 + $0x88] sm:$0xff]  ;;  %v4770_v39 = vld [vmem:[%s6857_s5 + $0x178] sm:$0xff]  ;;  %v4765_v21 = vld [vmem:[%s6857_s5 + $0x150] sm:$0xff] }
 0x2ba   :  { %v2260_v43 = vrot.slane %v6457_v11, 1  ;;  %v2225_v15 = vrot.slane %v6412_v38, 7  ;;  %3163 = vmatpush.bf16.msra.mxu0 %v4759_v1  ;;  %3151 = vmatpush.bf16.msrb.mxu3 %v4750_v57  ;;  %v4741_v38 = vld [vmem:[%s6857_s5 + $0x90] sm:$0xff]  ;;  %v2229_v41 = vrot.slane %v4139_v55, 6  ;;  %v2228_v17 = vrot.slane %v4137_v24, 7  ;;  %v4784_v10 = vld [vmem:[%s6857_s5 + $0x1e8] sm:$0xff] }
 0x2bb   :  { %2157 = vrot.lane.b32.xlu2 %v2154_v3, %s4874_s21  ;;  %2143 = vrot.lane.b32.xlu1 %v2140_v14, %s4875_s22  ;;  %v2217_v36 = vsel %vm2100_vm5, %v2216_v53, %v2215_v32  ;;  %v2262_v16 = vrot.slane %v6484_v45, 1  ;;  %v4748_v3 = vld [vmem:[%s6857_s5 + $0xc8] sm:$0xff]  ;;  %v4777_v45 = vld [vmem:[%s6857_s5 + $0x1b0] sm:$0xff] }
 0x2bc   :  { %v2261_v48 = vsel %vm2100_vm5, %v6418_v12, %v2260_v43  ;;  %v2227_v13 = vsel %vm2100_vm5, %v2226_v26, %v2225_v15  ;;  %v2219_v40 = vpack.c.b16 %v2217_v36, %v2217_v36  ;;  %v2230_v5 = vsel %vm2100_vm5, %v2229_v41, %v2228_v17  ;;  %3127 = vmatpush.bf16.msrb.mxu1 %v4732_v4  ;;  %v4756_v14 = vld [vmem:[%s6857_s5 + $0x108] sm:$0xff]  ;;  %v4775_v50 = vld [vmem:[%s6857_s5 + $0x1a0] sm:$0xff]  ;;  %v4794_v22 = vld [vmem:[%s6857_s5 + $0x238] sm:$0xff] }
 0x2bd   :  { %3138 = vmatpush.bf16.msra.mxu2 %v4742_v8  ;;  %v2264_v12 = vpack.c.b16 %v2261_v48, %v2261_v48  ;;  %v2231_v29 = vpack.c.b16 %v2227_v13, %v2227_v13  ;;  %v2263_v49 = vsel %vm2100_vm5, %v6461_v35, %v2262_v16  ;;  %v2232_v60 = vpack.c.b16 %v2230_v5, %v2230_v5  ;;  %v4768_v35 = vld [vmem:[%s6857_s5 + $0x168] sm:$0xff]  ;;  %v4783_v55 = vld [vmem:[%s6857_s5 + $0x1e0] sm:$0xff]  ;;  %v4774_v30 = vld [vmem:[%s6857_s5 + $0x198] sm:$0xff] }
 0x2be   :  { %3164 = vmatpush.bf16.msra.mxu0 %v4758_v63  ;;  %3152 = vmatpush.bf16.msrb.mxu3 %v4749_v27  ;;  %v2265_v11 = vpack.c.b16 %v2263_v49, %v2263_v49  ;;  %v4782_v0 = vld [vmem:[%s6857_s5 + $0x1d8] sm:$0xff]  ;;  %v4793_v24 = vld [vmem:[%s6857_s5 + $0x230] sm:$0xff]  ;;  %v4763_v47 = vld [vmem:[%s6857_s5 + $0x140] sm:$0xff]  ;;  %v2105_v48 = vpack.c.b16 %v6472_v51, %v6472_v51 }
 0x2bf   :  { %v4773_v54 = vld [vmem:[%s6857_s5 + $0x190] sm:$0xff]  ;;  %v4792_v53 = vld [vmem:[%s6857_s5 + $0x228] sm:$0xff]  ;;  %v4791_v59 = vld [vmem:[%s6857_s5 + $0x220] sm:$0xff] }
 0x2c0   :  { %3128 = vmatpush.bf16.msrb.mxu1 %v4731_v62  ;;  %v4772_v1 = vld [vmem:[%s6857_s5 + $0x188] sm:$0xff]  ;;  %v4771_v32 = vld [vmem:[%s6857_s5 + $0x180] sm:$0xff]  ;;  %v4790_v8 = vld [vmem:[%s6857_s5 + $0x218] sm:$0xff] }
 0x2c1   :  { %2193 = vrot.lane.b32.xlu0 %v2191_v52, %s4873_s0  ;;  %3139 = vmatpush.bf16.msra.mxu2 %v4741_v38  ;;  %v4781_v52 = vld [vmem:[%s6857_s5 + $0x1d0] sm:$0xff]  ;;  %v4779_v26 = vld [vmem:[%s6857_s5 + $0x1c0] sm:$0xff]  ;;  %v4788_v15 = vld [vmem:[%s6857_s5 + $0x208] sm:$0xff] }
 0x2c2   :  { %3165 = vmatpush.bf16.msra.mxu0 %v4757_v25  ;;  %3153 = vmatpush.bf16.msrb.mxu3 %v4748_v3  ;;  %v4789_v57 = vld [vmem:[%s6857_s5 + $0x210] sm:$0xff]  ;;  %v4787_v63 = vld [vmem:[%s6857_s5 + $0x200] sm:$0xff]  ;;  %v4822_v2 = vld [vmem:[%s6857_s5 + $0x318] sm:$0xff] }
 0x2c3   :  { %2220 = vrot.lane.b32.xlu2 %v2218_v34, %s4875_s22  ;;  %2195 = vrot.lane.b32.xlu1 %v2192_v9, %s4873_s0  ;;  %v4780_v9 = vld [vmem:[%s6857_s5 + $0x1c8] sm:$0xff]  ;;  %v4802_v13 = vld [vmem:[%s6857_s5 + $0x278] sm:$0xff] }
 0x2c4   :  { %3173 = vmatpush.bf16.msra.mxu1 %v4770_v39  ;;  %v4801_v25 = vld [vmem:[%s6857_s5 + $0x270] sm:$0xff]  ;;  %v4820_v51 = vld [vmem:[%s6857_s5 + $0x308] sm:$0xff]  ;;  %v4810_v4 = vld [vmem:[%s6857_s5 + $0x2b8] sm:$0xff] }
 0x2c5   :  { %3140 = vmatpush.bf16.msra.mxu2 %v4740_v20  ;;  %v4819_v17 = vld [vmem:[%s6857_s5 + $0x300] sm:$0xff]  ;;  %v4818_v62 = vld [vmem:[%s6857_s5 + $0x2f8] sm:$0xff]  ;;  %v4817_v3 = vld [vmem:[%s6857_s5 + $0x2f0] sm:$0xff] }
 0x2c6   :  { %3166 = vmatpush.bf16.msra.mxu0 %v4756_v14  ;;  %3154 = vmatpush.bf16.msrb.mxu3 %v4747_v61  ;;  %v4799_v39 = vld [vmem:[%s6857_s5 + $0x260] sm:$0xff]  ;;  %v4798_v14 = vld [vmem:[%s6857_s5 + $0x258] sm:$0xff] }
 0x2c8   :  { %3174 = vmatpush.bf16.msra.mxu1 %v4769_v33 }
 0x2c9   :  { %2222 = vrot.lane.b32.xlu0 %v2219_v40, %s4875_s22  ;;  %3141 = vmatpush.bf16.msra.mxu2 %v4739_v56  ;;  %v4821_v40 = vld [vmem:[%s6857_s5 + $0x310] sm:$0xff] }
 0x2ca   :  { %3167 = vmatpush.bf16.msra.mxu0 %v4755_v31  ;;  %3199 = vmatpush.bf16.msra.mxu3 %v4786_v23  ;;  %v4816_v31 = vld [vmem:[%s6857_s5 + $0x2e8] sm:$0xff]  ;;  %v4797_v23 = vld [vmem:[%s6857_s5 + $0x250] sm:$0xff] }
 0x2cb   :  { %2266 = vrot.lane.b32.xlu2 %v2264_v12, %s4873_s0  ;;  %2233 = vrot.lane.b32.xlu1 %v2231_v29, %s4874_s21  ;;  %v4800_v12 = vld [vmem:[%s6857_s5 + $0x268] sm:$0xff] }
 0x2cc   :  { %3175 = vmatpush.bf16.msra.mxu1 %v4768_v35  ;;  %v2182_v35 = vpack.c.b16 %v6475_v46, %v6475_v46  ;;  %v4807_v46 = vld [vmem:[%s6857_s5 + $0x2a0] sm:$0xff] }
 0x2cd   :  { %3186 = vmatpush.bf16.msrb.mxu2 %v4778_v37  ;;  %v4808_v37 = vld [vmem:[%s6857_s5 + $0x2a8] sm:$0xff] }
 0x2ce   :  { %3200 = vmatpush.bf16.msra.mxu3 %v4785_v18  ;;  %3212 = vmatpush.bf16.msrb.mxu0 %v4794_v22  ;;  %v4796_v18 = vld [vmem:[%s6857_s5 + $0x248] sm:$0xff] }
 0x2d0   :  { %3176 = vmatpush.bf16.msra.mxu1 %v4767_v19 }
 0x2d1   :  { %2235 = vrot.lane.b32.xlu0 %v2232_v60, %s4874_s21  ;;  %3187 = vmatpush.bf16.msrb.mxu2 %v4777_v45  ;;  %v4815_v45 = vld [vmem:[%s6857_s5 + $0x2e0] sm:$0xff] }
 0x2d2   :  { %3201 = vmatpush.bf16.msra.mxu3 %v4784_v10  ;;  %3213 = vmatpush.bf16.msrb.mxu0 %v4793_v24 }
 0x2d3   :  { %2268 = vrot.lane.b32.xlu1 %v2265_v11, %s4873_s0  ;;  %v4809_v11 = vld [vmem:[%s6857_s5 + $0x2b0] sm:$0xff] }
 0x2d4   :  { %3177 = vmatpush.bf16.msra.mxu1 %v4766_v7 }
 0x2d5   :  { %3188 = vmatpush.bf16.msrb.mxu2 %v4776_v42  ;;  %v2183_v42 = vpack.c.b16 %v6497_v44, %v6497_v44 }
 0x2d6   :  { %3202 = vmatpush.bf16.msra.mxu3 %v4783_v55  ;;  %3214 = vmatpush.bf16.msrb.mxu0 %v4792_v53  ;;  %v4804_v53 = vld [vmem:[%s6857_s5 + $0x288] sm:$0xff] }
 0x2d8   :  { %3178 = vmatpush.bf16.msra.mxu1 %v4765_v21  ;;  %v4806_v21 = vld [vmem:[%s6857_s5 + $0x298] sm:$0xff] }
 0x2d9   :  { %3189 = vmatpush.bf16.msrb.mxu2 %v4775_v50 }
 0x2da   :  { %3203 = vmatpush.bf16.msra.mxu3 %v4782_v0  ;;  %3215 = vmatpush.bf16.msrb.mxu0 %v4791_v59  ;;  %v4795_v0 = vld [vmem:[%s6857_s5 + $0x240] sm:$0xff] }
 0x2db   :  { %v4811_v59 = vld [vmem:[%s6857_s5 + $0x2c0] sm:$0xff] }
 0x2dc   :  { %3179 = vmatpush.bf16.msra.mxu1 %v4764_v28 }
 0x2dd   :  { %3190 = vmatpush.bf16.msrb.mxu2 %v4774_v30  ;;  %v4814_v30 = vld [vmem:[%s6857_s5 + $0x2d8] sm:$0xff] }
 0x2de   :  { %3204 = vmatpush.bf16.msra.mxu3 %v4781_v52  ;;  %3216 = vmatpush.bf16.msrb.mxu0 %v4790_v8  ;;  %v2257_v8 = vpack.c.b16 %v6479_v6, %v6479_v6 }
 0x2e0   :  { %3180 = vmatpush.bf16.msra.mxu1 %v4763_v47  ;;  %v4805_v47 = vld [vmem:[%s6857_s5 + $0x290] sm:$0xff] }
 0x2e1   :  { %3191 = vmatpush.bf16.msrb.mxu2 %v4773_v54  ;;  %v4813_v54 = vld [vmem:[%s6857_s5 + $0x2d0] sm:$0xff] }
 0x2e2   :  { %3205 = vmatpush.bf16.msra.mxu3 %v4780_v9  ;;  %3217 = vmatpush.bf16.msrb.mxu0 %v4789_v57  ;;  %v4803_v9 = vld [vmem:[%s6857_s5 + $0x280] sm:$0xff]  ;;  %v2258_v57 = vpack.c.b16 %v6506_v58, %v6506_v58 }
 0x2e5   :  { %3192 = vmatpush.bf16.msrb.mxu2 %v4772_v1 }
 0x2e6   :  { %3206 = vmatpush.bf16.msra.mxu3 %v4779_v26  ;;  %3218 = vmatpush.bf16.msrb.mxu0 %v4788_v15 }
 0x2e9   :  { %3193 = vmatpush.bf16.msrb.mxu2 %v4771_v32 }
 0x2ea   :  { %3219 = vmatpush.bf16.msrb.mxu0 %v4787_v63 }
 0x30d   :  { %v2156_v34 = vpop.permute.xlu2 %2155 }
 0x315   :  { %v2158_v36 = vpop.permute.xlu2 %2157 }
 0x316   :  { %v2160_v43 = vsel %vm2159_vm6, %v2156_v34, %v2158_v36 }
 0x317   :  { %3168 = vmatmul.bf16.vlgmr.msra.gmra.mxu0 %v2160_v43 }
 0x318   :  { %3268 = vmatpush.bf16.msra.mxu0 %v4822_v2  ;;  %v3293_v2 = vld [vmem:[%s6859_s7 + $0x38] sm:$0xf] }
 0x31c   :  { %3269 = vmatpush.bf16.msra.mxu0 %v4821_v40 }
 0x31d   :  { %v2221_v7 = vpop.permute.xlu2 %2220 }
 0x320   :  { %3270 = vmatpush.bf16.msra.mxu0 %v4820_v51  ;;  %v4826_v51 = vld [vmem:[%s6859_s7 + $0x18] sm:$0xff] }
 0x323   :  { %v2114_v38 = vpop.permute.xlu0 %2113 }
 0x324   :  { %v2273_v27 = vsel %vm92_vm0, %v2105_v48, %v2114_v38  ;;  %3271 = vmatpush.bf16.msra.mxu0 %v4819_v17  ;;  %v3327_v48 = vunpack.c.l.b16 %v3293_v2  ;;  %v4825_v17 = vld [vmem:[%s6859_s7 + $0x10] sm:$0xff]  ;;  %v4845_v2 = vld [vmem:[%s6862_s10] ss:$0 sm:$0xff] }
 0x325   :  { %v2142_v41 = vpop.permute.xlu1 %2141  ;;  %3129 = vmatmul.bf16.vlgmr.msrb.gmra.mxu1 %v2273_v27  ;;  %v2267_v26 = vpop.permute.xlu2 %2266  ;;  %v4828_v27 = vld [vmem:[%s6859_s7 + $0x28] sm:$0xff] }
 0x326   :  { %3225 = vmatpush.bf16.msrb.mxu1 %v4802_v13  ;;  %v2299_v43 = vsel %vm92_vm0, %v2258_v57, %v2267_v26  ;;  %v3335_v6 = vpack.c.b16 %v3327_v48, %v3327_v48 }
 0x328   :  { %v3348_v13 = vsel %vm807_vm2, %v3335_v6, 0  ;;  %vm3343_vm2 = vcmask 982016  }
 0x32a   :  { %3226 = vmatpush.bf16.msrb.mxu1 %v4801_v25  ;;  %v4843_v25 = vld [vmem:[%s6858_s6] ss:$0 sm:$0xff] }
 0x32b   :  { %v2116_v29 = vpop.permute.xlu0 %2115 }
 0x32c   :  { %v2118_v20 = vsel %vm92_vm0, %v2114_v38, %v2116_v29  ;;  %v4829_v38 = vld [vmem:[%s6859_s7 + $0x30] sm:$0xff] }
 0x32d   :  { %v2278_v5 = vsel %vm2145_vm7, %v2118_v20, %v2142_v41  ;;  %v2144_v16 = vpop.permute.xlu1 %2143 }
 0x32e   :  { %v2146_v49 = vsel %vm2145_vm7, %v2142_v41, %v2144_v16  ;;  %3142 = vmatmul.bf16.vlgmr.msra.gmra.mxu2 %v2278_v5  ;;  %3227 = vmatpush.bf16.msrb.mxu1 %v4800_v12  ;;  %v4827_v41 = vld [vmem:[%s6859_s7 + $0x20] sm:$0xff] }
 0x32f   :  { %v2283_v60 = vsel %vm2159_vm6, %v2146_v49, %v2156_v34  ;;  %3238 = vmatpush.bf16.msra.mxu2 %v4810_v4  ;;  %v4812_v34 = vld [vmem:[%s6857_s5 + $0x2c8] sm:$0xff] }
 0x330   :  { %3155 = vmatmul.bf16.vlgmr.msrb.gmra.mxu3 %v2283_v60  ;;  %v4824_v60 = vld [vmem:[%s6859_s7 + $0x8] sm:$0xff] }
 0x331   :  { %v6726_v33 = vpop.f32.mrf.mxu0  ;;  %3251 = vmatpush.bf16.msrb.mxu3 %v4818_v62 }
 0x332   :  { %3228 = vmatpush.bf16.msrb.mxu1 %v4799_v39  ;;  %v3118_v29 = vadd.f32 %v4843_v25, %v6726_v33  ;;  %v4823_v33 = vld [vmem:[%s6859_s7] sm:$0xff] }
 0x333   :  { %3239 = vmatpush.bf16.msra.mxu2 %v4809_v11  ;;  %v2194_v56 = vpop.permute.xlu0 %2193 }
 0x334   :  { %v2287_v22 = vsel %vm92_vm0, %v2183_v42, %v2194_v56  ;;  %v4833_v42 = vld [vmem:[%s6861_s9 + $0x18] sm:$0xff] }
 0x335   :  { %3252 = vmatpush.bf16.msrb.mxu3 %v4817_v3  ;;  %v2196_v61 = vpop.permute.xlu1 %2195  ;;  %3181 = vmatmul.bf16.vlgmr.msra.gmra.mxu1 %v2182_v35 }
 0x336   :  { %3229 = vmatpush.bf16.msrb.mxu1 %v4798_v14  ;;  %v2197_v50 = vsel %vm92_vm0, %v2194_v56, %v2196_v61  ;;  %v3375_v14 = vld [vmem:[%s6861_s9 + $0x28] sm:$0x3] }
 0x337   :  { %3240 = vmatpush.bf16.msra.mxu2 %v4808_v37  ;;  %v2291_v24 = vsel %vm2145_vm7, %v2197_v50, %v2221_v7  ;;  %v3401_v56 = vunpack.c.l.b16 %v3375_v14 }
 0x339   :  { %v3119_v19 = vpop.f32.mrf.mxu0  ;;  %3253 = vmatpush.bf16.msrb.mxu3 %v4816_v31  ;;  %v3407_v37 = vpack.c.b16 %v3401_v56, %v3401_v56 }
 0x33a   :  { %3230 = vmatpush.bf16.msrb.mxu1 %v4797_v23  ;;  %v4834_v19 = vld [vmem:[%s6861_s9 + $0x20] sm:$0xff] }
 0x33b   :  { %3241 = vmatpush.bf16.msra.mxu2 %v4807_v46  ;;  %v2223_v10 = vpop.permute.xlu0 %2222 }
 0x33c   :  { %v2224_v55 = vsel %vm2145_vm7, %v2221_v7, %v2223_v10 }
 0x33d   :  { %3254 = vmatpush.bf16.msrb.mxu3 %v4815_v45  ;;  %v2234_v28 = vpop.permute.xlu1 %2233 }
 0x33e   :  { %v2295_v44 = vsel %vm2159_vm6, %v2224_v55, %v2234_v28  ;;  %3194 = vmatmul.bf16.vlgmr.msrb.gmra.mxu2 %v2287_v22  ;;  %3231 = vmatpush.bf16.msrb.mxu1 %v4796_v18  ;;  %v4832_v55 = vld [vmem:[%s6861_s9 + $0x10] sm:$0xff] }
 0x33f   :  { %3220 = vmatmul.bf16.vlgmr.msrb.gmra.mxu0 %v2295_v44  ;;  %3242 = vmatpush.bf16.msra.mxu2 %v4806_v21 }
 0x340   :  { %3207 = vmatmul.bf16.vlgmr.msra.gmra.mxu3 %v2291_v24 }
 0x341   :  { %3255 = vmatpush.bf16.msrb.mxu3 %v4814_v30 }
 0x342   :  { %3232 = vmatpush.bf16.msrb.mxu1 %v4795_v0 }
 0x343   :  { %3243 = vmatpush.bf16.msra.mxu2 %v4805_v47  ;;  %v2236_v52 = vpop.permute.xlu0 %2235 }
 0x344   :  { %v2237_v1 = vsel %vm2159_vm6, %v2234_v28, %v2236_v52 }
 0x345   :  { %3256 = vmatpush.bf16.msrb.mxu3 %v4813_v54  ;;  %3233 = vmatmul.bf16.vlgmr.msrb.gmra.mxu1 %v2237_v1  ;;  %v2269_v32 = vpop.permute.xlu1 %2268 }
 0x346   :  { %v2270_v36 = vsel %vm92_vm0, %v2267_v26, %v2269_v32  ;;  %3350 = vmatpush.bf16.msra.mxu1 %v3348_v13  ;;  %vm3417_vm0 = vcmask 1041408   ;;  %v4831_v32 = vld [vmem:[%s6861_s9 + $0x8] sm:$0xff]  ;;  %v4830_v26 = vld [vmem:[%s6861_s9] sm:$0xff] }
 0x347   :  { %3244 = vmatpush.bf16.msra.mxu2 %v4804_v53  ;;  %v3419_v31 = vsel %vm3417_vm0, %v3407_v37, 0 }
 0x349   :  { %3257 = vmatpush.bf16.msrb.mxu3 %v4812_v34 }
 0x34a   :  { %3351 = vmatpush.bf16.msra.mxu1 %v4829_v38 }
 0x34b   :  { %3245 = vmatpush.bf16.msra.mxu2 %v4803_v9 }
 0x34d   :  { %3258 = vmatpush.bf16.msrb.mxu3 %v4811_v59 }
 0x34e   :  { %3246 = vmatmul.bf16.vlgmr.msra.gmra.mxu2 %v2257_v8  ;;  %3352 = vmatpush.bf16.msra.mxu1 %v4828_v27  ;;  %v4844_v8 = vld [vmem:[%s6860_s8] ss:$0 sm:$0xff] }
 0x34f   :  { %4544 = vmatmul.msk.bf16.vlgmr.msra.gmra.mxu0 %vm2145_vm7, %v2270_v36  ;;  %3423 = vmatpush.bf16.msrb.mxu2 %v3419_v31 }
 0x350   :  { %3259 = vmatmul.bf16.vlgmr.msrb.gmra.mxu3 %v2299_v43 }
 0x352   :  { %3353 = vmatpush.bf16.msra.mxu1 %v4827_v41 }
 0x353   :  { %3424 = vmatpush.bf16.msrb.mxu2 %v4834_v19 }
 0x356   :  { %3354 = vmatpush.bf16.msra.mxu1 %v4826_v51 }
 0x357   :  { %3425 = vmatpush.bf16.msrb.mxu2 %v4833_v42 }
 0x35a   :  { %3355 = vmatpush.bf16.msra.mxu1 %v4825_v17 }
 0x35b   :  { %3426 = vmatpush.bf16.msrb.mxu2 %v4832_v55 }
 0x35e   :  { %3356 = vmatpush.bf16.msra.mxu1 %v4824_v60 }
 0x35f   :  { %3427 = vmatpush.bf16.msrb.mxu2 %v4831_v32 }
 0x362   :  { %3357 = vmatpush.bf16.msra.mxu1 %v4823_v33 }
 0x363   :  { %3428 = vmatpush.bf16.msrb.mxu2 %v4830_v26 }
 0x394   :  { %v3169_v15 = vpop.f32.mrf.mxu0 }
 0x39c   :  { %v3171_v63 = vpop.f32.mrf.mxu0 }
 0x3a2   :  { %v3130_v58 = vpop.f32.mrf.mxu1 }
 0x3a3   :  { %v3131_v5 = vadd.f32 %v3130_v58, %v3118_v29 }
 0x3aa   :  { %v3132_v40 = vpop.f32.mrf.mxu1 }
 0x3b1   :  { %v3143_v12 = vpop.f32.mrf.mxu2 }
 0x3b2   :  { %v3182_v4 = vpop.f32.mrf.mxu1  ;;  %v3144_v16 = vadd.f32 %v3143_v12, %v3131_v5 }
 0x3b3   :  { %v3156_v20 = vpop.f32.mrf.mxu3 }
 0x3b4   :  { %v3157_v49 = vadd.f32 %v3156_v20, %v3144_v16 }
 0x3b6   :  { %v3170_v35 = vadd.f32 %v3169_v15, %v3157_v49 }
 0x3b8   :  { %v3183_v23 = vadd.f32 %v3182_v4, %v3170_v35 }
 0x3b9   :  { %v3145_v62 = vpop.f32.mrf.mxu2 }
 0x3ba   :  { %v3184_v39 = vpop.f32.mrf.mxu1 }
 0x3bb   :  { %v3158_v11 = vpop.f32.mrf.mxu3 }
 0x3bc   :  { %v3221_v3 = vpop.f32.mrf.mxu0 }
 0x3c1   :  { %v3195_v61 = vpop.f32.mrf.mxu2 }
 0x3c2   :  { %v3234_v46 = vpop.f32.mrf.mxu1  ;;  %v3196_v18 = vadd.f32 %v3195_v61, %v3183_v23 }
 0x3c3   :  { %v3208_v45 = vpop.f32.mrf.mxu3 }
 0x3c4   :  { %v3223_v7 = vpop.f32.mrf.mxu0  ;;  %v3209_v10 = vadd.f32 %v3208_v45, %v3196_v18 }
 0x3c6   :  { %v3222_v28 = vadd.f32 %v3221_v3, %v3209_v10 }
 0x3c8   :  { %v3235_v44 = vadd.f32 %v3234_v46, %v3222_v28 }
 0x3c9   :  { %v3197_v21 = vpop.f32.mrf.mxu2 }
 0x3ca   :  { %v3236_v50 = vpop.f32.mrf.mxu1 }
 0x3cb   :  { %v3210_v22 = vpop.f32.mrf.mxu3 }
 0x3cc   :  { %v3273_v30 = vpop.f32.mrf.mxu0 }
 0x3d1   :  { %v3247_v0 = vpop.f32.mrf.mxu2 }
 0x3d2   :  { %v3248_v24 = vadd.f32 %v3247_v0, %v3235_v44 }
 0x3d3   :  { %v3260_v47 = vpop.f32.mrf.mxu3 }
 0x3d4   :  { %v3261_v54 = vadd.f32 %v3260_v47, %v3248_v24  ;;  %v3275_v52 = vpop.f32.mrf.mxu0 }
 0x3d6   :  { %v3274_v53 = vadd.f32 %v3273_v30, %v3261_v54 }
 0x3d8   :  { %v3277_v1 = vmax.f32 %v3274_v53, 0.0 }
 0x3d9   :  { %v3249_v34 = vpop.f32.mrf.mxu2 }
 0x3da   :  { %v3278_v9 = vpack.c.bf16 %v3277_v1, %v3277_v1 }
 0x3db   :  { %v3262_v59 = vpop.f32.mrf.mxu3 }
 0x3dc   :  { %4573 = vmatmul.msk.bf16.vlgmr.msra.gmra.mxu1 %vm3343_vm2, %v3278_v9 }
 0x459   :  { %v3359_v57 = vpop.f32.mrf.mxu1 }
 0x45a   :  { %v3360_v36 = vadd.f32 %v4844_v8, %v3359_v57 }
 0x45c   :  { %v3363_v43 = vmax.f32 %v3360_v36, 0.0 }
 0x45e   :  { %v3364_v15 = vpack.c.bf16 %v3363_v43, %v3363_v43 }
 0x460   :  { %4594 = vmatmul.msk.bf16.vlgmr.msrb.gmra.mxu2 %vm3413_vm8, %v3364_v15 }
 0x461   :  { %v3361_v63 = vpop.f32.mrf.mxu1 }
 0x4e3   :  { %v3430_v48 = vpop.f32.mrf.mxu2 }
 0x4e4   :  { %v3431_v6 = vadd.f32 %v4845_v2, %v3430_v48 }
 0x4e6   :  { %3435 = vst.msk [vmem:[#allocation4] sm:$0x3] %vm3434_vm9, %v3431_v6 }
 0x4e7   :  { %3446 = dma.vmem_to_hbm [thread:$0]  %s3442_s27, 32, %s3444_s28, [#allocation5]  }
 0x4eb   :  { %v3432_v13 = vpop.f32.mrf.mxu2 }
 0x4ec   :  { %4870 = dma.done.wait [#allocation5], 32  }
 0x4ed   :  { %4871 = vsyncadd [#allocation5], 4294967264 }
 0x4ee   :  { %3451 = vsyncpa [#allocation5], 1 }

</bundles_post_ra>
